<compile_context>
chip_gen: v7x
topology: tpu7x:2x2x1
jax: 0.10.0
libtpu: 0.0.40
codegen_flags: <defaults>
</compile_context>

<pallas_src>
import numpy as np

import jax
import jax.numpy as jnp
from jax import lax
from jax.experimental import pallas as pl
from jax.experimental.pallas import tpu as pltpu


# ----------------------------------------------------------------------------
# Single kernel: per-level batched x+recurrent projection over the whole tree
# ----------------------------------------------------------------------------
def down_tree_kernel(x_ref, w_ref, b_ref, g_ref, t_ref, out_ref):
    # x_ref : (R, D)      node inputs, level-major; rows [0, P) are an all-zero
    #                      "parent of root" block, level l lives in rows
    #                      [(l+1)*P, (l+2)*P).
    # w_ref : (D+M, 8M)   stacked [W_x ; W_h]; columns =
    #                      [iou_vis 3M | iou_lang 3M | f_vis M | f_lang M]
    # b_ref : (1, 8M)     pre-summed x+h biases (same column layout)
    # g_ref : (L, P, P)   one-hot parent selector within the previous level block
    # t_ref : (R, 2M)     [t_lang bcast M | t_vis bcast M]; zero on padding rows
    # out_ref:(R, 2M)     per-row [c | h]; doubles as the recurrent state table
    M = out_ref.shape[1] // 2
    L, P, _ = g_ref.shape

    # Zero the whole slab once: root reads a zero parent state; padding rows
    # are deterministic.
    out_ref[...] = jnp.zeros_like(out_ref)

    def level_body(l, carry):
        row0 = pl.multiple_of((l + 1) * P, 8)   # this level's rows
        prev0 = pl.multiple_of(l * P, 8)        # parent level's rows

        # --- gather parent [c | h] rows via one-hot weights (level 0 selects
        #     nothing -> zero parent state for the root) --------------------
        g = g_ref[l]                                   # (P, P)
        prev = out_ref[pl.ds(prev0, P), :]             # (P, 2M)
        parent = jnp.zeros((P, 2 * M), jnp.float32)
        for j in range(P):                             # static, small unroll
            parent = parent + g[:, j:j + 1] * prev[j:j + 1, :]
        pc = parent[:, 0:M]
        ph = parent[:, M:2 * M]

        # --- one fused MXU matmul: all gates of BOTH branches ---------------
        x_lvl = x_ref[pl.ds(row0, P), :]               # (P, D)
        lhs = jnp.concatenate([x_lvl, ph], axis=1)     # (P, D+M)
        pre = jnp.dot(lhs, w_ref[...],
                      preferred_element_type=jnp.float32) + b_ref[...]  # (P, 8M)

        def branch(iou, f_pre):
            i_g = jax.nn.sigmoid(iou[:, 0:M])
            o_g = jax.nn.sigmoid(iou[:, M:2 * M])
            u_g = jnp.tanh(iou[:, 2 * M:3 * M])
            f_g = jax.nn.sigmoid(f_pre)
            c = i_g * u_g + f_g * pc        # single parent => child sums collapse
            h = o_g * jnp.tanh(c)
            return c, h

        c_vis, h_vis = branch(pre[:, 0:3 * M], pre[:, 6 * M:7 * M])
        c_lang, h_lang = branch(pre[:, 3 * M:6 * M], pre[:, 7 * M:8 * M])

        # torch.mm(type_mask, cat([*_lang, *_vis])) == t_lang*lang + t_vis*vis
        t = t_ref[pl.ds(row0, P), :]
        tl = t[:, 0:M]
        tv = t[:, M:2 * M]
        # write directly into the output row slices (no concat copy)
        out_ref[pl.ds(row0, P), 0:M] = tl * c_lang + tv * c_vis
        out_ref[pl.ds(row0, P), M:2 * M] = tl * h_lang + tv * h_vis
        return carry

    lax.fori_loop(0, L, level_body, 0, unroll=True)


# ----------------------------------------------------------------------------
# Wrapper: one pallas_call per full tree forward
# ----------------------------------------------------------------------------
@jax.jit
def down_tree_lstm_forward(x_pad, t_pad, gmat, w_full, b_all):
    R = x_pad.shape[0]
    M = w_full.shape[1] // 8
    out = pl.pallas_call(
        down_tree_kernel,
        out_shape=jax.ShapeDtypeStruct((R, 2 * M), jnp.float32),
        in_specs=[pl.BlockSpec(memory_space=pltpu.MemorySpace.VMEM)] * 5,
        out_specs=pl.BlockSpec(memory_space=pltpu.MemorySpace.VMEM),
    )(x_pad, w_full, b_all, gmat, t_pad)
    return out[:, :M], out[:, M:]            # c, h per table row


# ----------------------------------------------------------------------------
# Parameter construction (PyTorch-Linear-like uniform init) + packing
# ----------------------------------------------------------------------------
def make_params(key, in_dim, mem_dim):
    def linear(k, fan_in, fan_out):
        kw, kb = jax.random.split(k)
        bound = 1.0 / np.sqrt(fan_in)
        w = jax.random.uniform(kw, (fan_out, fan_in), jnp.float32, -bound, bound)
        b = jax.random.uniform(kb, (fan_out,), jnp.float32, -bound, bound)
        return w, b

    keys = jax.random.split(key, 8)
    names = ["ioux_vis", "iouh_vis", "fx_vis", "fh_vis",
             "ioux_lang", "iouh_lang", "fx_lang", "fh_lang"]
    fans = [(in_dim, 3 * mem_dim), (mem_dim, 3 * mem_dim),
            (in_dim, mem_dim), (mem_dim, mem_dim)] * 2
    raw = {}
    for name, k, (fi, fo) in zip(names, keys, fans):
        w, b = linear(k, fi, fo)
        raw[name + "_w"] = w
        raw[name + "_b"] = b

    # columns: [iou_vis (3M) | iou_lang (3M) | f_vis (M) | f_lang (M)]
    w_x = jnp.concatenate([raw["ioux_vis_w"].T, raw["ioux_lang_w"].T,
                           raw["fx_vis_w"].T, raw["fx_lang_w"].T], axis=1)   # (D, 8M)
    w_h = jnp.concatenate([raw["iouh_vis_w"].T, raw["iouh_lang_w"].T,
                           raw["fh_vis_w"].T, raw["fh_lang_w"].T], axis=1)   # (M, 8M)
    b_all = jnp.concatenate([raw["ioux_vis_b"] + raw["iouh_vis_b"],
                             raw["ioux_lang_b"] + raw["iouh_lang_b"],
                             raw["fx_vis_b"] + raw["fh_vis_b"],
                             raw["fx_lang_b"] + raw["fh_lang_b"]])[None, :]  # (1, 8M)
    packed = dict(w_full=jnp.concatenate([w_x, w_h], axis=0),                # (D+M, 8M)
                  b_all=b_all)
    return raw, packed


# ----------------------------------------------------------------------------
# Tree structure + host-side level scheduling (control-flow glue, no tensor math)
# ----------------------------------------------------------------------------
class Tree:
    def __init__(self, idx, parent=None):
        self.idx = idx
        self.parent = parent
        self.children = []
        self.down_state = None
        if parent is not None:
            parent.children.append(self)


def level_schedule(root):
    levels = [[root]]
    while True:
        nxt = [c for n in levels[-1] for c in n.children]
        if not nxt:
            break
        levels.append(nxt)
    return levels


def build_level_arrays(levels, inputs_np, tmasks_np, mem_dim):
    L = len(levels)
    max_w = max(len(lv) for lv in levels)
    P = ((max_w + 7) // 8) * 8            # pad every level to a multiple of 8 rows
    R = (L + 1) * P                       # + leading all-zero "parent of root" block
    D = inputs_np.shape[1]
    M = mem_dim

    x_pad = np.zeros((R, D), np.float32)
    t_pad = np.zeros((R, 2 * M), np.float32)
    gmat = np.zeros((L, P, P), np.float32)

    slot_of = {}
    row_of = {}
    for l, lv in enumerate(levels):
        for s, node in enumerate(lv):
            slot_of[id(node)] = s
            row = (l + 1) * P + s
            row_of[id(node)] = row
            x_pad[row] = inputs_np[node.idx]
            t_pad[row, :M] = tmasks_np[node.idx, 0]   # lang weight
            t_pad[row, M:] = tmasks_np[node.idx, 1]   # vis weight
            if node.parent is not None:               # root: gmat[0] stays zero
                gmat[l, s, slot_of[id(node.parent)]] = 1.0
    return jnp.asarray(x_pad), jnp.asarray(t_pad), jnp.asarray(gmat), row_of


def run_down_tree(root, inputs, tmasks, packed, mem_dim):
    levels = level_schedule(root)
    x_pad, t_pad, gmat, row_of = build_level_arrays(
        levels, np.asarray(inputs), np.asarray(tmasks), mem_dim)
    c_all, h_all = down_tree_lstm_forward(
        x_pad, t_pad, gmat, packed["w_full"], packed["b_all"])
    for lv in levels:
        for node in lv:
            r = row_of[id(node)]
            node.down_state = (c_all[r:r + 1], h_all[r:r + 1])
    return root.down_state


# ----------------------------------------------------------------------------
# Pure-JAX reference (mirrors the PyTorch module exactly, unpacked weights)
# ----------------------------------------------------------------------------
def ref_down_tree(root, inputs, tmasks, raw, mem_dim):
    M = mem_dim
    hp = jax.lax.Precision.HIGHEST

    def lin(name, v):
        return jnp.dot(v, raw[name + "_w"].T, precision=hp) + raw[name + "_b"]

    def node_branch(br, x, cc, ch):
        iou = lin(f"ioux_{br}", x) + lin(f"iouh_{br}", ch)
        i = jax.nn.sigmoid(iou[:, :M])
        o = jax.nn.sigmoid(iou[:, M:2 * M])
        u = jnp.tanh(iou[:, 2 * M:])
        f = jax.nn.sigmoid(lin(f"fh_{br}", ch) + lin(f"fx_{br}", x))
        c = i * u + f * cc
        h = o * jnp.tanh(c)
        return c, h

    states = {}

    def visit(node):
        if node.parent is None:
            cc = jnp.zeros((1, M), jnp.float32)
            ch = jnp.zeros((1, M), jnp.float32)
        else:
            cc, ch = states[node.parent.idx]
        x = inputs[node.idx][None, :]
        c_vis, h_vis = node_branch("vis", x, cc, ch)
        c_lang, h_lang = node_branch("lang", x, cc, ch)
        tm = tmasks[node.idx][None, :]
        c = jnp.dot(tm, jnp.concatenate([c_lang, c_vis], axis=0), precision=hp)
        h = jnp.dot(tm, jnp.concatenate([h_lang, h_vis], axis=0), precision=hp)
        states[node.idx] = (c, h)
        for cn in node.children:
            visit(cn)

    visit(root)
    return states


# ----------------------------------------------------------------------------
if __name__ == "__main__":
    in_dim = 128
    mem_dim = 128
    seq = 8

    key = jax.random.PRNGKey(0)
    k_par, k_x, k_t = jax.random.split(key, 3)

    raw, packed = make_params(k_par, in_dim, mem_dim)
    inputs = jax.random.normal(k_x, (seq, in_dim), jnp.float32)
    tmasks = jax.nn.softmax(jax.random.normal(k_t, (seq, 2), jnp.float32), axis=-1)

    # tree over 8 nodes: 0 -> {1, 2}; 1 -> {3, 4}; 2 -> {5}; 5 -> {6, 7}
    root = Tree(0)
    n1 = Tree(1, root); n2 = Tree(2, root)
    n3 = Tree(3, n1);   n4 = Tree(4, n1)
    n5 = Tree(5, n2)
    n6 = Tree(6, n5);   n7 = Tree(7, n5)
    nodes = [root, n1, n2, n3, n4, n5, n6, n7]

    # run with the Pallas kernel
    run_down_tree(root, inputs, tmasks, packed, mem_dim)
    jax.block_until_ready([n.down_state for n in nodes])

    # validate against a pure-JAX reference of the original module semantics
    ref_states = ref_down_tree(root, inputs, tmasks, raw, mem_dim)
    for node in nodes:
        c_k, h_k = node.down_state
        c_r, h_r = ref_states[node.idx]
        assert jnp.allclose(c_k, c_r, atol=2e-3, rtol=2e-3), f"c mismatch at node {node.idx}"
        assert jnp.allclose(h_k, h_r, atol=2e-3, rtol=2e-3), f"h mismatch at node {node.idx}"

    print("KERNEL_OK")
</pallas_src>

<mosaic_0001>
module attributes {stable_mosaic.version = 11 : i64} {
  func.func @down_tree_kernel(%arg0: memref<40x128xf32, #tpu.memory_space<vmem>>, %arg1: memref<256x1024xf32, #tpu.memory_space<vmem>>, %arg2: memref<1x1024xf32, #tpu.memory_space<vmem>>, %arg3: memref<4x8x8xf32, #tpu.memory_space<vmem>>, %arg4: memref<40x256xf32, #tpu.memory_space<vmem>>, %arg5: memref<40x256xf32, #tpu.memory_space<vmem>>) attributes {dimension_semantics = [], scalar_prefetch = 0 : i64, scratch_operands = 0 : i64, tpu.core_type = #tpu.core_type<tc>} {
    %cst = arith.constant 0.000000e+00 : f32
    %0 = vector.broadcast %cst : f32 to vector<40x256xf32>
    %c0 = arith.constant 0 : index
    %c0_0 = arith.constant 0 : index
    %1 = vector.load %arg5[%c0, %c0_0] : memref<40x256xf32, #tpu.memory_space<vmem>>, vector<40x256xf32>
    tpu.vector_store %arg5[%c0, %c0_0], %0 {strides = array<i32>} : memref<40x256xf32, #tpu.memory_space<vmem>>, vector<40x256xf32>,
    %c0_i32 = arith.constant 0 : i32
    %c1_i32 = arith.constant 1 : i32
    %2 = arith.addi %c0_i32, %c1_i32 : i32
    %c8_i32 = arith.constant 8 : i32
    %3 = arith.muli %2, %c8_i32 : i32
    %4 = tpu.assume_multiple %3, 8 : i32
    %c8_i32_1 = arith.constant 8 : i32
    %5 = arith.muli %c0_i32, %c8_i32_1 : i32
    %6 = tpu.assume_multiple %5, 8 : i32
    %7 = arith.index_cast %c0_i32 : i32 to index
    %c0_2 = arith.constant 0 : index
    %c0_3 = arith.constant 0 : index
    %8 = vector.load %arg3[%7, %c0_2, %c0_3] : memref<4x8x8xf32, #tpu.memory_space<vmem>>, vector<1x8x8xf32>
    %9 = vector.shape_cast %8 : vector<1x8x8xf32> to vector<8x8xf32>
    %10 = arith.index_cast %6 : i32 to index
    %c0_4 = arith.constant 0 : index
    %11 = vector.load %arg5[%10, %c0_4] : memref<40x256xf32, #tpu.memory_space<vmem>>, vector<8x256xf32>
    %cst_5 = arith.constant 0.000000e+00 : f32
    %12 = vector.broadcast %cst_5 : f32 to vector<8x256xf32>
    %13 = vector.extract_strided_slice %9 {offsets = [0, 0], sizes = [8, 1], strides = [1, 1]} : vector<8x8xf32> to vector<8x1xf32>
    %14 = vector.extract_strided_slice %11 {offsets = [0, 0], sizes = [1, 256], strides = [1, 1]} : vector<8x256xf32> to vector<1x256xf32>
    %15 = vector.broadcast %13 : vector<8x1xf32> to vector<8x256xf32>
    %16 = vector.broadcast %14 : vector<1x256xf32> to vector<8x256xf32>
    %17 = arith.mulf %15, %16 : vector<8x256xf32>
    %18 = arith.addf %12, %17 : vector<8x256xf32>
    %19 = vector.extract_strided_slice %9 {offsets = [0, 1], sizes = [8, 1], strides = [1, 1]} : vector<8x8xf32> to vector<8x1xf32>
    %20 = vector.extract_strided_slice %11 {offsets = [1, 0], sizes = [1, 256], strides = [1, 1]} : vector<8x256xf32> to vector<1x256xf32>
    %21 = vector.broadcast %19 : vector<8x1xf32> to vector<8x256xf32>
    %22 = vector.broadcast %20 : vector<1x256xf32> to vector<8x256xf32>
    %23 = arith.mulf %21, %22 : vector<8x256xf32>
    %24 = arith.addf %18, %23 : vector<8x256xf32>
    %25 = vector.extract_strided_slice %9 {offsets = [0, 2], sizes = [8, 1], strides = [1, 1]} : vector<8x8xf32> to vector<8x1xf32>
    %26 = vector.extract_strided_slice %11 {offsets = [2, 0], sizes = [1, 256], strides = [1, 1]} : vector<8x256xf32> to vector<1x256xf32>
    %27 = vector.broadcast %25 : vector<8x1xf32> to vector<8x256xf32>
    %28 = vector.broadcast %26 : vector<1x256xf32> to vector<8x256xf32>
    %29 = arith.mulf %27, %28 : vector<8x256xf32>
    %30 = arith.addf %24, %29 : vector<8x256xf32>
    %31 = vector.extract_strided_slice %9 {offsets = [0, 3], sizes = [8, 1], strides = [1, 1]} : vector<8x8xf32> to vector<8x1xf32>
    %32 = vector.extract_strided_slice %11 {offsets = [3, 0], sizes = [1, 256], strides = [1, 1]} : vector<8x256xf32> to vector<1x256xf32>
    %33 = vector.broadcast %31 : vector<8x1xf32> to vector<8x256xf32>
    %34 = vector.broadcast %32 : vector<1x256xf32> to vector<8x256xf32>
    %35 = arith.mulf %33, %34 : vector<8x256xf32>
    %36 = arith.addf %30, %35 : vector<8x256xf32>
    %37 = vector.extract_strided_slice %9 {offsets = [0, 4], sizes = [8, 1], strides = [1, 1]} : vector<8x8xf32> to vector<8x1xf32>
    %38 = vector.extract_strided_slice %11 {offsets = [4, 0], sizes = [1, 256], strides = [1, 1]} : vector<8x256xf32> to vector<1x256xf32>
    %39 = vector.broadcast %37 : vector<8x1xf32> to vector<8x256xf32>
    %40 = vector.broadcast %38 : vector<1x256xf32> to vector<8x256xf32>
    %41 = arith.mulf %39, %40 : vector<8x256xf32>
    %42 = arith.addf %36, %41 : vector<8x256xf32>
    %43 = vector.extract_strided_slice %9 {offsets = [0, 5], sizes = [8, 1], strides = [1, 1]} : vector<8x8xf32> to vector<8x1xf32>
    %44 = vector.extract_strided_slice %11 {offsets = [5, 0], sizes = [1, 256], strides = [1, 1]} : vector<8x256xf32> to vector<1x256xf32>
    %45 = vector.broadcast %43 : vector<8x1xf32> to vector<8x256xf32>
    %46 = vector.broadcast %44 : vector<1x256xf32> to vector<8x256xf32>
    %47 = arith.mulf %45, %46 : vector<8x256xf32>
    %48 = arith.addf %42, %47 : vector<8x256xf32>
    %49 = vector.extract_strided_slice %9 {offsets = [0, 6], sizes = [8, 1], strides = [1, 1]} : vector<8x8xf32> to vector<8x1xf32>
    %50 = vector.extract_strided_slice %11 {offsets = [6, 0], sizes = [1, 256], strides = [1, 1]} : vector<8x256xf32> to vector<1x256xf32>
    %51 = vector.broadcast %49 : vector<8x1xf32> to vector<8x256xf32>
    %52 = vector.broadcast %50 : vector<1x256xf32> to vector<8x256xf32>
    %53 = arith.mulf %51, %52 : vector<8x256xf32>
    %54 = arith.addf %48, %53 : vector<8x256xf32>
    %55 = vector.extract_strided_slice %9 {offsets = [0, 7], sizes = [8, 1], strides = [1, 1]} : vector<8x8xf32> to vector<8x1xf32>
    %56 = vector.extract_strided_slice %11 {offsets = [7, 0], sizes = [1, 256], strides = [1, 1]} : vector<8x256xf32> to vector<1x256xf32>
    %57 = vector.broadcast %55 : vector<8x1xf32> to vector<8x256xf32>
    %58 = vector.broadcast %56 : vector<1x256xf32> to vector<8x256xf32>
    %59 = arith.mulf %57, %58 : vector<8x256xf32>
    %60 = arith.addf %54, %59 : vector<8x256xf32>
    %61 = vector.extract_strided_slice %60 {offsets = [0, 0], sizes = [8, 128], strides = [1, 1]} : vector<8x256xf32> to vector<8x128xf32>
    %62 = vector.extract_strided_slice %60 {offsets = [0, 128], sizes = [8, 128], strides = [1, 1]} : vector<8x256xf32> to vector<8x128xf32>
    %63 = arith.index_cast %4 : i32 to index
    %c0_6 = arith.constant 0 : index
    %64 = vector.load %arg0[%63, %c0_6] : memref<40x128xf32, #tpu.memory_space<vmem>>, vector<8x128xf32>
    %65 = tpu.concatenate %64, %62 in 1 : vector<8x128xf32>, vector<8x128xf32> -> vector<8x256xf32>
    %c0_7 = arith.constant 0 : index
    %c0_8 = arith.constant 0 : index
    %66 = vector.load %arg1[%c0_7, %c0_8] : memref<256x1024xf32, #tpu.memory_space<vmem>>, vector<256x1024xf32>
    %cst_9 = arith.constant dense<0.000000e+00> : vector<8x1024xf32>
    %67 = tpu.matmul %65, %66, %cst_9 {dimension_numbers = #tpu.dot_dimension_numbers<[1], [0], [0], [1], [0, 0, 1, 1], [], []>} : vector<8x256xf32>, vector<256x1024xf32>, vector<8x1024xf32> -> vector<8x1024xf32>
    %c0_10 = arith.constant 0 : index
    %c0_11 = arith.constant 0 : index
    %68 = vector.load %arg2[%c0_10, %c0_11] : memref<1x1024xf32, #tpu.memory_space<vmem>>, vector<1x1024xf32>
    %69 = vector.broadcast %68 : vector<1x1024xf32> to vector<8x1024xf32>
    %70 = arith.addf %67, %69 : vector<8x1024xf32>
    %71 = vector.extract_strided_slice %70 {offsets = [0, 0], sizes = [8, 384], strides = [1, 1]} : vector<8x1024xf32> to vector<8x384xf32>
    %72 = vector.extract_strided_slice %70 {offsets = [0, 768], sizes = [8, 128], strides = [1, 1]} : vector<8x1024xf32> to vector<8x128xf32>
    %73 = vector.extract_strided_slice %71 {offsets = [0, 0], sizes = [8, 128], strides = [1, 1]} : vector<8x384xf32> to vector<8x128xf32>
    %74 = arith.negf %73 : vector<8x128xf32>
    %75 = math.exp %74 : vector<8x128xf32>
    %cst_12 = arith.constant 1.000000e+00 : f32
    %76 = vector.broadcast %cst_12 : f32 to vector<8x128xf32>
    %77 = arith.addf %76, %75 : vector<8x128xf32>
    %78 = arith.divf %76, %77 : vector<8x128xf32>
    %79 = vector.extract_strided_slice %71 {offsets = [0, 128], sizes = [8, 128], strides = [1, 1]} : vector<8x384xf32> to vector<8x128xf32>
    %80 = arith.negf %79 : vector<8x128xf32>
    %81 = math.exp %80 : vector<8x128xf32>
    %cst_13 = arith.constant 1.000000e+00 : f32
    %82 = vector.broadcast %cst_13 : f32 to vector<8x128xf32>
    %83 = arith.addf %82, %81 : vector<8x128xf32>
    %84 = arith.divf %82, %83 : vector<8x128xf32>
    %85 = vector.extract_strided_slice %71 {offsets = [0, 256], sizes = [8, 128], strides = [1, 1]} : vector<8x384xf32> to vector<8x128xf32>
    %86 = math.tanh %85 : vector<8x128xf32>
    %87 = arith.negf %72 : vector<8x128xf32>
    %88 = math.exp %87 : vector<8x128xf32>
    %cst_14 = arith.constant 1.000000e+00 : f32
    %89 = vector.broadcast %cst_14 : f32 to vector<8x128xf32>
    %90 = arith.addf %89, %88 : vector<8x128xf32>
    %91 = arith.divf %89, %90 : vector<8x128xf32>
    %92 = arith.mulf %78, %86 : vector<8x128xf32>
    %93 = arith.mulf %91, %61 : vector<8x128xf32>
    %94 = arith.addf %92, %93 : vector<8x128xf32>
    %95 = math.tanh %94 : vector<8x128xf32>
    %96 = arith.mulf %84, %95 : vector<8x128xf32>
    %97 = vector.extract_strided_slice %70 {offsets = [0, 384], sizes = [8, 384], strides = [1, 1]} : vector<8x1024xf32> to vector<8x384xf32>
    %98 = vector.extract_strided_slice %70 {offsets = [0, 896], sizes = [8, 128], strides = [1, 1]} : vector<8x1024xf32> to vector<8x128xf32>
    %99 = vector.extract_strided_slice %97 {offsets = [0, 0], sizes = [8, 128], strides = [1, 1]} : vector<8x384xf32> to vector<8x128xf32>
    %100 = arith.negf %99 : vector<8x128xf32>
    %101 = math.exp %100 : vector<8x128xf32>
    %cst_15 = arith.constant 1.000000e+00 : f32
    %102 = vector.broadcast %cst_15 : f32 to vector<8x128xf32>
    %103 = arith.addf %102, %101 : vector<8x128xf32>
    %104 = arith.divf %102, %103 : vector<8x128xf32>
    %105 = vector.extract_strided_slice %97 {offsets = [0, 128], sizes = [8, 128], strides = [1, 1]} : vector<8x384xf32> to vector<8x128xf32>
    %106 = arith.negf %105 : vector<8x128xf32>
    %107 = math.exp %106 : vector<8x128xf32>
    %cst_16 = arith.constant 1.000000e+00 : f32
    %108 = vector.broadcast %cst_16 : f32 to vector<8x128xf32>
    %109 = arith.addf %108, %107 : vector<8x128xf32>
    %110 = arith.divf %108, %109 : vector<8x128xf32>
    %111 = vector.extract_strided_slice %97 {offsets = [0, 256], sizes = [8, 128], strides = [1, 1]} : vector<8x384xf32> to vector<8x128xf32>
    %112 = math.tanh %111 : vector<8x128xf32>
    %113 = arith.negf %98 : vector<8x128xf32>
    %114 = math.exp %113 : vector<8x128xf32>
    %cst_17 = arith.constant 1.000000e+00 : f32
    %115 = vector.broadcast %cst_17 : f32 to vector<8x128xf32>
    %116 = arith.addf %115, %114 : vector<8x128xf32>
    %117 = arith.divf %115, %116 : vector<8x128xf32>
    %118 = arith.mulf %104, %112 : vector<8x128xf32>
    %119 = arith.mulf %117, %61 : vector<8x128xf32>
    %120 = arith.addf %118, %119 : vector<8x128xf32>
    %121 = math.tanh %120 : vector<8x128xf32>
    %122 = arith.mulf %110, %121 : vector<8x128xf32>
    %123 = arith.index_cast %4 : i32 to index
    %c0_18 = arith.constant 0 : index
    %124 = vector.load %arg4[%123, %c0_18] : memref<40x256xf32, #tpu.memory_space<vmem>>, vector<8x256xf32>
    %125 = vector.extract_strided_slice %124 {offsets = [0, 0], sizes = [8, 128], strides = [1, 1]} : vector<8x256xf32> to vector<8x128xf32>
    %126 = vector.extract_strided_slice %124 {offsets = [0, 128], sizes = [8, 128], strides = [1, 1]} : vector<8x256xf32> to vector<8x128xf32>
    %127 = arith.mulf %125, %120 : vector<8x128xf32>
    %128 = arith.mulf %126, %94 : vector<8x128xf32>
    %129 = arith.addf %127, %128 : vector<8x128xf32>
    %130 = arith.index_cast %4 : i32 to index
    %c0_19 = arith.constant 0 : index
    %131 = vector.load %arg5[%130, %c0_19] : memref<40x256xf32, #tpu.memory_space<vmem>>, vector<8x128xf32>
    tpu.vector_store %arg5[%130, %c0_19], %129 {strides = array<i32>} : memref<40x256xf32, #tpu.memory_space<vmem>>, vector<8x128xf32>,
    %132 = arith.mulf %125, %122 : vector<8x128xf32>
    %133 = arith.mulf %126, %96 : vector<8x128xf32>
    %134 = arith.addf %132, %133 : vector<8x128xf32>
    %135 = arith.index_cast %4 : i32 to index
    %c128 = arith.constant 128 : index
    %136 = vector.load %arg5[%135, %c128] : memref<40x256xf32, #tpu.memory_space<vmem>>, vector<8x128xf32>
    tpu.vector_store %arg5[%135, %c128], %134 {strides = array<i32>} : memref<40x256xf32, #tpu.memory_space<vmem>>, vector<8x128xf32>,
    %c1_i32_20 = arith.constant 1 : i32
    %c1_i32_21 = arith.constant 1 : i32
    %137 = arith.addi %c1_i32_20, %c1_i32_21 : i32
    %c8_i32_22 = arith.constant 8 : i32
    %138 = arith.muli %137, %c8_i32_22 : i32
    %139 = tpu.assume_multiple %138, 8 : i32
    %c8_i32_23 = arith.constant 8 : i32
    %140 = arith.muli %c1_i32_20, %c8_i32_23 : i32
    %141 = tpu.assume_multiple %140, 8 : i32
    %142 = arith.index_cast %c1_i32_20 : i32 to index
    %c0_24 = arith.constant 0 : index
    %c0_25 = arith.constant 0 : index
    %143 = vector.load %arg3[%142, %c0_24, %c0_25] : memref<4x8x8xf32, #tpu.memory_space<vmem>>, vector<1x8x8xf32>
    %144 = vector.shape_cast %143 : vector<1x8x8xf32> to vector<8x8xf32>
    %145 = arith.index_cast %141 : i32 to index
    %c0_26 = arith.constant 0 : index
    %146 = vector.load %arg5[%145, %c0_26] : memref<40x256xf32, #tpu.memory_space<vmem>>, vector<8x256xf32>
    %cst_27 = arith.constant 0.000000e+00 : f32
    %147 = vector.broadcast %cst_27 : f32 to vector<8x256xf32>
    %148 = vector.extract_strided_slice %144 {offsets = [0, 0], sizes = [8, 1], strides = [1, 1]} : vector<8x8xf32> to vector<8x1xf32>
    %149 = vector.extract_strided_slice %146 {offsets = [0, 0], sizes = [1, 256], strides = [1, 1]} : vector<8x256xf32> to vector<1x256xf32>
    %150 = vector.broadcast %148 : vector<8x1xf32> to vector<8x256xf32>
    %151 = vector.broadcast %149 : vector<1x256xf32> to vector<8x256xf32>
    %152 = arith.mulf %150, %151 : vector<8x256xf32>
    %153 = arith.addf %147, %152 : vector<8x256xf32>
    %154 = vector.extract_strided_slice %144 {offsets = [0, 1], sizes = [8, 1], strides = [1, 1]} : vector<8x8xf32> to vector<8x1xf32>
    %155 = vector.extract_strided_slice %146 {offsets = [1, 0], sizes = [1, 256], strides = [1, 1]} : vector<8x256xf32> to vector<1x256xf32>
    %156 = vector.broadcast %154 : vector<8x1xf32> to vector<8x256xf32>
    %157 = vector.broadcast %155 : vector<1x256xf32> to vector<8x256xf32>
    %158 = arith.mulf %156, %157 : vector<8x256xf32>
    %159 = arith.addf %153, %158 : vector<8x256xf32>
    %160 = vector.extract_strided_slice %144 {offsets = [0, 2], sizes = [8, 1], strides = [1, 1]} : vector<8x8xf32> to vector<8x1xf32>
    %161 = vector.extract_strided_slice %146 {offsets = [2, 0], sizes = [1, 256], strides = [1, 1]} : vector<8x256xf32> to vector<1x256xf32>
    %162 = vector.broadcast %160 : vector<8x1xf32> to vector<8x256xf32>
    %163 = vector.broadcast %161 : vector<1x256xf32> to vector<8x256xf32>
    %164 = arith.mulf %162, %163 : vector<8x256xf32>
    %165 = arith.addf %159, %164 : vector<8x256xf32>
    %166 = vector.extract_strided_slice %144 {offsets = [0, 3], sizes = [8, 1], strides = [1, 1]} : vector<8x8xf32> to vector<8x1xf32>
    %167 = vector.extract_strided_slice %146 {offsets = [3, 0], sizes = [1, 256], strides = [1, 1]} : vector<8x256xf32> to vector<1x256xf32>
    %168 = vector.broadcast %166 : vector<8x1xf32> to vector<8x256xf32>
    %169 = vector.broadcast %167 : vector<1x256xf32> to vector<8x256xf32>
    %170 = arith.mulf %168, %169 : vector<8x256xf32>
    %171 = arith.addf %165, %170 : vector<8x256xf32>
    %172 = vector.extract_strided_slice %144 {offsets = [0, 4], sizes = [8, 1], strides = [1, 1]} : vector<8x8xf32> to vector<8x1xf32>
    %173 = vector.extract_strided_slice %146 {offsets = [4, 0], sizes = [1, 256], strides = [1, 1]} : vector<8x256xf32> to vector<1x256xf32>
    %174 = vector.broadcast %172 : vector<8x1xf32> to vector<8x256xf32>
    %175 = vector.broadcast %173 : vector<1x256xf32> to vector<8x256xf32>
    %176 = arith.mulf %174, %175 : vector<8x256xf32>
    %177 = arith.addf %171, %176 : vector<8x256xf32>
    %178 = vector.extract_strided_slice %144 {offsets = [0, 5], sizes = [8, 1], strides = [1, 1]} : vector<8x8xf32> to vector<8x1xf32>
    %179 = vector.extract_strided_slice %146 {offsets = [5, 0], sizes = [1, 256], strides = [1, 1]} : vector<8x256xf32> to vector<1x256xf32>
    %180 = vector.broadcast %178 : vector<8x1xf32> to vector<8x256xf32>
    %181 = vector.broadcast %179 : vector<1x256xf32> to vector<8x256xf32>
    %182 = arith.mulf %180, %181 : vector<8x256xf32>
    %183 = arith.addf %177, %182 : vector<8x256xf32>
    %184 = vector.extract_strided_slice %144 {offsets = [0, 6], sizes = [8, 1], strides = [1, 1]} : vector<8x8xf32> to vector<8x1xf32>
    %185 = vector.extract_strided_slice %146 {offsets = [6, 0], sizes = [1, 256], strides = [1, 1]} : vector<8x256xf32> to vector<1x256xf32>
    %186 = vector.broadcast %184 : vector<8x1xf32> to vector<8x256xf32>
    %187 = vector.broadcast %185 : vector<1x256xf32> to vector<8x256xf32>
    %188 = arith.mulf %186, %187 : vector<8x256xf32>
    %189 = arith.addf %183, %188 : vector<8x256xf32>
    %190 = vector.extract_strided_slice %144 {offsets = [0, 7], sizes = [8, 1], strides = [1, 1]} : vector<8x8xf32> to vector<8x1xf32>
    %191 = vector.extract_strided_slice %146 {offsets = [7, 0], sizes = [1, 256], strides = [1, 1]} : vector<8x256xf32> to vector<1x256xf32>
    %192 = vector.broadcast %190 : vector<8x1xf32> to vector<8x256xf32>
    %193 = vector.broadcast %191 : vector<1x256xf32> to vector<8x256xf32>
    %194 = arith.mulf %192, %193 : vector<8x256xf32>
    %195 = arith.addf %189, %194 : vector<8x256xf32>
    %196 = vector.extract_strided_slice %195 {offsets = [0, 0], sizes = [8, 128], strides = [1, 1]} : vector<8x256xf32> to vector<8x128xf32>
    %197 = vector.extract_strided_slice %195 {offsets = [0, 128], sizes = [8, 128], strides = [1, 1]} : vector<8x256xf32> to vector<8x128xf32>
    %198 = arith.index_cast %139 : i32 to index
    %c0_28 = arith.constant 0 : index
    %199 = vector.load %arg0[%198, %c0_28] : memref<40x128xf32, #tpu.memory_space<vmem>>, vector<8x128xf32>
    %200 = tpu.concatenate %199, %197 in 1 : vector<8x128xf32>, vector<8x128xf32> -> vector<8x256xf32>
    %c0_29 = arith.constant 0 : index
    %c0_30 = arith.constant 0 : index
    %201 = vector.load %arg1[%c0_29, %c0_30] : memref<256x1024xf32, #tpu.memory_space<vmem>>, vector<256x1024xf32>
    %cst_31 = arith.constant dense<0.000000e+00> : vector<8x1024xf32>
    %202 = tpu.matmul %200, %201, %cst_31 {dimension_numbers = #tpu.dot_dimension_numbers<[1], [0], [0], [1], [0, 0, 1, 1], [], []>} : vector<8x256xf32>, vector<256x1024xf32>, vector<8x1024xf32> -> vector<8x1024xf32>
    %c0_32 = arith.constant 0 : index
    %c0_33 = arith.constant 0 : index
    %203 = vector.load %arg2[%c0_32, %c0_33] : memref<1x1024xf32, #tpu.memory_space<vmem>>, vector<1x1024xf32>
    %204 = vector.broadcast %203 : vector<1x1024xf32> to vector<8x1024xf32>
    %205 = arith.addf %202, %204 : vector<8x1024xf32>
    %206 = vector.extract_strided_slice %205 {offsets = [0, 0], sizes = [8, 384], strides = [1, 1]} : vector<8x1024xf32> to vector<8x384xf32>
    %207 = vector.extract_strided_slice %205 {offsets = [0, 768], sizes = [8, 128], strides = [1, 1]} : vector<8x1024xf32> to vector<8x128xf32>
    %208 = vector.extract_strided_slice %206 {offsets = [0, 0], sizes = [8, 128], strides = [1, 1]} : vector<8x384xf32> to vector<8x128xf32>
    %209 = arith.negf %208 : vector<8x128xf32>
    %210 = math.exp %209 : vector<8x128xf32>
    %cst_34 = arith.constant 1.000000e+00 : f32
    %211 = vector.broadcast %cst_34 : f32 to vector<8x128xf32>
    %212 = arith.addf %211, %210 : vector<8x128xf32>
    %213 = arith.divf %211, %212 : vector<8x128xf32>
    %214 = vector.extract_strided_slice %206 {offsets = [0, 128], sizes = [8, 128], strides = [1, 1]} : vector<8x384xf32> to vector<8x128xf32>
    %215 = arith.negf %214 : vector<8x128xf32>
    %216 = math.exp %215 : vector<8x128xf32>
    %cst_35 = arith.constant 1.000000e+00 : f32
    %217 = vector.broadcast %cst_35 : f32 to vector<8x128xf32>
    %218 = arith.addf %217, %216 : vector<8x128xf32>
    %219 = arith.divf %217, %218 : vector<8x128xf32>
    %220 = vector.extract_strided_slice %206 {offsets = [0, 256], sizes = [8, 128], strides = [1, 1]} : vector<8x384xf32> to vector<8x128xf32>
    %221 = math.tanh %220 : vector<8x128xf32>
    %222 = arith.negf %207 : vector<8x128xf32>
    %223 = math.exp %222 : vector<8x128xf32>
    %cst_36 = arith.constant 1.000000e+00 : f32
    %224 = vector.broadcast %cst_36 : f32 to vector<8x128xf32>
    %225 = arith.addf %224, %223 : vector<8x128xf32>
    %226 = arith.divf %224, %225 : vector<8x128xf32>
    %227 = arith.mulf %213, %221 : vector<8x128xf32>
    %228 = arith.mulf %226, %196 : vector<8x128xf32>
    %229 = arith.addf %227, %228 : vector<8x128xf32>
    %230 = math.tanh %229 : vector<8x128xf32>
    %231 = arith.mulf %219, %230 : vector<8x128xf32>
    %232 = vector.extract_strided_slice %205 {offsets = [0, 384], sizes = [8, 384], strides = [1, 1]} : vector<8x1024xf32> to vector<8x384xf32>
    %233 = vector.extract_strided_slice %205 {offsets = [0, 896], sizes = [8, 128], strides = [1, 1]} : vector<8x1024xf32> to vector<8x128xf32>
    %234 = vector.extract_strided_slice %232 {offsets = [0, 0], sizes = [8, 128], strides = [1, 1]} : vector<8x384xf32> to vector<8x128xf32>
    %235 = arith.negf %234 : vector<8x128xf32>
    %236 = math.exp %235 : vector<8x128xf32>
    %cst_37 = arith.constant 1.000000e+00 : f32
    %237 = vector.broadcast %cst_37 : f32 to vector<8x128xf32>
    %238 = arith.addf %237, %236 : vector<8x128xf32>
    %239 = arith.divf %237, %238 : vector<8x128xf32>
    %240 = vector.extract_strided_slice %232 {offsets = [0, 128], sizes = [8, 128], strides = [1, 1]} : vector<8x384xf32> to vector<8x128xf32>
    %241 = arith.negf %240 : vector<8x128xf32>
    %242 = math.exp %241 : vector<8x128xf32>
    %cst_38 = arith.constant 1.000000e+00 : f32
    %243 = vector.broadcast %cst_38 : f32 to vector<8x128xf32>
    %244 = arith.addf %243, %242 : vector<8x128xf32>
    %245 = arith.divf %243, %244 : vector<8x128xf32>
    %246 = vector.extract_strided_slice %232 {offsets = [0, 256], sizes = [8, 128], strides = [1, 1]} : vector<8x384xf32> to vector<8x128xf32>
    %247 = math.tanh %246 : vector<8x128xf32>
    %248 = arith.negf %233 : vector<8x128xf32>
    %249 = math.exp %248 : vector<8x128xf32>
    %cst_39 = arith.constant 1.000000e+00 : f32
    %250 = vector.broadcast %cst_39 : f32 to vector<8x128xf32>
    %251 = arith.addf %250, %249 : vector<8x128xf32>
    %252 = arith.divf %250, %251 : vector<8x128xf32>
    %253 = arith.mulf %239, %247 : vector<8x128xf32>
    %254 = arith.mulf %252, %196 : vector<8x128xf32>
    %255 = arith.addf %253, %254 : vector<8x128xf32>
    %256 = math.tanh %255 : vector<8x128xf32>
    %257 = arith.mulf %245, %256 : vector<8x128xf32>
    %258 = arith.index_cast %139 : i32 to index
    %c0_40 = arith.constant 0 : index
    %259 = vector.load %arg4[%258, %c0_40] : memref<40x256xf32, #tpu.memory_space<vmem>>, vector<8x256xf32>
    %260 = vector.extract_strided_slice %259 {offsets = [0, 0], sizes = [8, 128], strides = [1, 1]} : vector<8x256xf32> to vector<8x128xf32>
    %261 = vector.extract_strided_slice %259 {offsets = [0, 128], sizes = [8, 128], strides = [1, 1]} : vector<8x256xf32> to vector<8x128xf32>
    %262 = arith.mulf %260, %255 : vector<8x128xf32>
    %263 = arith.mulf %261, %229 : vector<8x128xf32>
    %264 = arith.addf %262, %263 : vector<8x128xf32>
    %265 = arith.index_cast %139 : i32 to index
    %c0_41 = arith.constant 0 : index
    %266 = vector.load %arg5[%265, %c0_41] : memref<40x256xf32, #tpu.memory_space<vmem>>, vector<8x128xf32>
    tpu.vector_store %arg5[%265, %c0_41], %264 {strides = array<i32>} : memref<40x256xf32, #tpu.memory_space<vmem>>, vector<8x128xf32>,
    %267 = arith.mulf %260, %257 : vector<8x128xf32>
    %268 = arith.mulf %261, %231 : vector<8x128xf32>
    %269 = arith.addf %267, %268 : vector<8x128xf32>
    %270 = arith.index_cast %139 : i32 to index
    %c128_42 = arith.constant 128 : index
    %271 = vector.load %arg5[%270, %c128_42] : memref<40x256xf32, #tpu.memory_space<vmem>>, vector<8x128xf32>
    tpu.vector_store %arg5[%270, %c128_42], %269 {strides = array<i32>} : memref<40x256xf32, #tpu.memory_space<vmem>>, vector<8x128xf32>,
    %c2_i32 = arith.constant 2 : i32
    %c1_i32_43 = arith.constant 1 : i32
    %272 = arith.addi %c2_i32, %c1_i32_43 : i32
    %c8_i32_44 = arith.constant 8 : i32
    %273 = arith.muli %272, %c8_i32_44 : i32
    %274 = tpu.assume_multiple %273, 8 : i32
    %c8_i32_45 = arith.constant 8 : i32
    %275 = arith.muli %c2_i32, %c8_i32_45 : i32
    %276 = tpu.assume_multiple %275, 8 : i32
    %277 = arith.index_cast %c2_i32 : i32 to index
    %c0_46 = arith.constant 0 : index
    %c0_47 = arith.constant 0 : index
    %278 = vector.load %arg3[%277, %c0_46, %c0_47] : memref<4x8x8xf32, #tpu.memory_space<vmem>>, vector<1x8x8xf32>
    %279 = vector.shape_cast %278 : vector<1x8x8xf32> to vector<8x8xf32>
    %280 = arith.index_cast %276 : i32 to index
    %c0_48 = arith.constant 0 : index
    %281 = vector.load %arg5[%280, %c0_48] : memref<40x256xf32, #tpu.memory_space<vmem>>, vector<8x256xf32>
    %cst_49 = arith.constant 0.000000e+00 : f32
    %282 = vector.broadcast %cst_49 : f32 to vector<8x256xf32>
    %283 = vector.extract_strided_slice %279 {offsets = [0, 0], sizes = [8, 1], strides = [1, 1]} : vector<8x8xf32> to vector<8x1xf32>
    %284 = vector.extract_strided_slice %281 {offsets = [0, 0], sizes = [1, 256], strides = [1, 1]} : vector<8x256xf32> to vector<1x256xf32>
    %285 = vector.broadcast %283 : vector<8x1xf32> to vector<8x256xf32>
    %286 = vector.broadcast %284 : vector<1x256xf32> to vector<8x256xf32>
    %287 = arith.mulf %285, %286 : vector<8x256xf32>
    %288 = arith.addf %282, %287 : vector<8x256xf32>
    %289 = vector.extract_strided_slice %279 {offsets = [0, 1], sizes = [8, 1], strides = [1, 1]} : vector<8x8xf32> to vector<8x1xf32>
    %290 = vector.extract_strided_slice %281 {offsets = [1, 0], sizes = [1, 256], strides = [1, 1]} : vector<8x256xf32> to vector<1x256xf32>
    %291 = vector.broadcast %289 : vector<8x1xf32> to vector<8x256xf32>
    %292 = vector.broadcast %290 : vector<1x256xf32> to vector<8x256xf32>
    %293 = arith.mulf %291, %292 : vector<8x256xf32>
    %294 = arith.addf %288, %293 : vector<8x256xf32>
    %295 = vector.extract_strided_slice %279 {offsets = [0, 2], sizes = [8, 1], strides = [1, 1]} : vector<8x8xf32> to vector<8x1xf32>
    %296 = vector.extract_strided_slice %281 {offsets = [2, 0], sizes = [1, 256], strides = [1, 1]} : vector<8x256xf32> to vector<1x256xf32>
    %297 = vector.broadcast %295 : vector<8x1xf32> to vector<8x256xf32>
    %298 = vector.broadcast %296 : vector<1x256xf32> to vector<8x256xf32>
    %299 = arith.mulf %297, %298 : vector<8x256xf32>
    %300 = arith.addf %294, %299 : vector<8x256xf32>
    %301 = vector.extract_strided_slice %279 {offsets = [0, 3], sizes = [8, 1], strides = [1, 1]} : vector<8x8xf32> to vector<8x1xf32>
    %302 = vector.extract_strided_slice %281 {offsets = [3, 0], sizes = [1, 256], strides = [1, 1]} : vector<8x256xf32> to vector<1x256xf32>
    %303 = vector.broadcast %301 : vector<8x1xf32> to vector<8x256xf32>
    %304 = vector.broadcast %302 : vector<1x256xf32> to vector<8x256xf32>
    %305 = arith.mulf %303, %304 : vector<8x256xf32>
    %306 = arith.addf %300, %305 : vector<8x256xf32>
    %307 = vector.extract_strided_slice %279 {offsets = [0, 4], sizes = [8, 1], strides = [1, 1]} : vector<8x8xf32> to vector<8x1xf32>
    %308 = vector.extract_strided_slice %281 {offsets = [4, 0], sizes = [1, 256], strides = [1, 1]} : vector<8x256xf32> to vector<1x256xf32>
    %309 = vector.broadcast %307 : vector<8x1xf32> to vector<8x256xf32>
    %310 = vector.broadcast %308 : vector<1x256xf32> to vector<8x256xf32>
    %311 = arith.mulf %309, %310 : vector<8x256xf32>
    %312 = arith.addf %306, %311 : vector<8x256xf32>
    %313 = vector.extract_strided_slice %279 {offsets = [0, 5], sizes = [8, 1], strides = [1, 1]} : vector<8x8xf32> to vector<8x1xf32>
    %314 = vector.extract_strided_slice %281 {offsets = [5, 0], sizes = [1, 256], strides = [1, 1]} : vector<8x256xf32> to vector<1x256xf32>
    %315 = vector.broadcast %313 : vector<8x1xf32> to vector<8x256xf32>
    %316 = vector.broadcast %314 : vector<1x256xf32> to vector<8x256xf32>
    %317 = arith.mulf %315, %316 : vector<8x256xf32>
    %318 = arith.addf %312, %317 : vector<8x256xf32>
    %319 = vector.extract_strided_slice %279 {offsets = [0, 6], sizes = [8, 1], strides = [1, 1]} : vector<8x8xf32> to vector<8x1xf32>
    %320 = vector.extract_strided_slice %281 {offsets = [6, 0], sizes = [1, 256], strides = [1, 1]} : vector<8x256xf32> to vector<1x256xf32>
    %321 = vector.broadcast %319 : vector<8x1xf32> to vector<8x256xf32>
    %322 = vector.broadcast %320 : vector<1x256xf32> to vector<8x256xf32>
    %323 = arith.mulf %321, %322 : vector<8x256xf32>
    %324 = arith.addf %318, %323 : vector<8x256xf32>
    %325 = vector.extract_strided_slice %279 {offsets = [0, 7], sizes = [8, 1], strides = [1, 1]} : vector<8x8xf32> to vector<8x1xf32>
    %326 = vector.extract_strided_slice %281 {offsets = [7, 0], sizes = [1, 256], strides = [1, 1]} : vector<8x256xf32> to vector<1x256xf32>
    %327 = vector.broadcast %325 : vector<8x1xf32> to vector<8x256xf32>
    %328 = vector.broadcast %326 : vector<1x256xf32> to vector<8x256xf32>
    %329 = arith.mulf %327, %328 : vector<8x256xf32>
    %330 = arith.addf %324, %329 : vector<8x256xf32>
    %331 = vector.extract_strided_slice %330 {offsets = [0, 0], sizes = [8, 128], strides = [1, 1]} : vector<8x256xf32> to vector<8x128xf32>
    %332 = vector.extract_strided_slice %330 {offsets = [0, 128], sizes = [8, 128], strides = [1, 1]} : vector<8x256xf32> to vector<8x128xf32>
    %333 = arith.index_cast %274 : i32 to index
    %c0_50 = arith.constant 0 : index
    %334 = vector.load %arg0[%333, %c0_50] : memref<40x128xf32, #tpu.memory_space<vmem>>, vector<8x128xf32>
    %335 = tpu.concatenate %334, %332 in 1 : vector<8x128xf32>, vector<8x128xf32> -> vector<8x256xf32>
    %c0_51 = arith.constant 0 : index
    %c0_52 = arith.constant 0 : index
    %336 = vector.load %arg1[%c0_51, %c0_52] : memref<256x1024xf32, #tpu.memory_space<vmem>>, vector<256x1024xf32>
    %cst_53 = arith.constant dense<0.000000e+00> : vector<8x1024xf32>
    %337 = tpu.matmul %335, %336, %cst_53 {dimension_numbers = #tpu.dot_dimension_numbers<[1], [0], [0], [1], [0, 0, 1, 1], [], []>} : vector<8x256xf32>, vector<256x1024xf32>, vector<8x1024xf32> -> vector<8x1024xf32>
    %c0_54 = arith.constant 0 : index
    %c0_55 = arith.constant 0 : index
    %338 = vector.load %arg2[%c0_54, %c0_55] : memref<1x1024xf32, #tpu.memory_space<vmem>>, vector<1x1024xf32>
    %339 = vector.broadcast %338 : vector<1x1024xf32> to vector<8x1024xf32>
    %340 = arith.addf %337, %339 : vector<8x1024xf32>
    %341 = vector.extract_strided_slice %340 {offsets = [0, 0], sizes = [8, 384], strides = [1, 1]} : vector<8x1024xf32> to vector<8x384xf32>
    %342 = vector.extract_strided_slice %340 {offsets = [0, 768], sizes = [8, 128], strides = [1, 1]} : vector<8x1024xf32> to vector<8x128xf32>
    %343 = vector.extract_strided_slice %341 {offsets = [0, 0], sizes = [8, 128], strides = [1, 1]} : vector<8x384xf32> to vector<8x128xf32>
    %344 = arith.negf %343 : vector<8x128xf32>
    %345 = math.exp %344 : vector<8x128xf32>
    %cst_56 = arith.constant 1.000000e+00 : f32
    %346 = vector.broadcast %cst_56 : f32 to vector<8x128xf32>
    %347 = arith.addf %346, %345 : vector<8x128xf32>
    %348 = arith.divf %346, %347 : vector<8x128xf32>
    %349 = vector.extract_strided_slice %341 {offsets = [0, 128], sizes = [8, 128], strides = [1, 1]} : vector<8x384xf32> to vector<8x128xf32>
    %350 = arith.negf %349 : vector<8x128xf32>
    %351 = math.exp %350 : vector<8x128xf32>
    %cst_57 = arith.constant 1.000000e+00 : f32
    %352 = vector.broadcast %cst_57 : f32 to vector<8x128xf32>
    %353 = arith.addf %352, %351 : vector<8x128xf32>
    %354 = arith.divf %352, %353 : vector<8x128xf32>
    %355 = vector.extract_strided_slice %341 {offsets = [0, 256], sizes = [8, 128], strides = [1, 1]} : vector<8x384xf32> to vector<8x128xf32>
    %356 = math.tanh %355 : vector<8x128xf32>
    %357 = arith.negf %342 : vector<8x128xf32>
    %358 = math.exp %357 : vector<8x128xf32>
    %cst_58 = arith.constant 1.000000e+00 : f32
    %359 = vector.broadcast %cst_58 : f32 to vector<8x128xf32>
    %360 = arith.addf %359, %358 : vector<8x128xf32>
    %361 = arith.divf %359, %360 : vector<8x128xf32>
    %362 = arith.mulf %348, %356 : vector<8x128xf32>
    %363 = arith.mulf %361, %331 : vector<8x128xf32>
    %364 = arith.addf %362, %363 : vector<8x128xf32>
    %365 = math.tanh %364 : vector<8x128xf32>
    %366 = arith.mulf %354, %365 : vector<8x128xf32>
    %367 = vector.extract_strided_slice %340 {offsets = [0, 384], sizes = [8, 384], strides = [1, 1]} : vector<8x1024xf32> to vector<8x384xf32>
    %368 = vector.extract_strided_slice %340 {offsets = [0, 896], sizes = [8, 128], strides = [1, 1]} : vector<8x1024xf32> to vector<8x128xf32>
    %369 = vector.extract_strided_slice %367 {offsets = [0, 0], sizes = [8, 128], strides = [1, 1]} : vector<8x384xf32> to vector<8x128xf32>
    %370 = arith.negf %369 : vector<8x128xf32>
    %371 = math.exp %370 : vector<8x128xf32>
    %cst_59 = arith.constant 1.000000e+00 : f32
    %372 = vector.broadcast %cst_59 : f32 to vector<8x128xf32>
    %373 = arith.addf %372, %371 : vector<8x128xf32>
    %374 = arith.divf %372, %373 : vector<8x128xf32>
    %375 = vector.extract_strided_slice %367 {offsets = [0, 128], sizes = [8, 128], strides = [1, 1]} : vector<8x384xf32> to vector<8x128xf32>
    %376 = arith.negf %375 : vector<8x128xf32>
    %377 = math.exp %376 : vector<8x128xf32>
    %cst_60 = arith.constant 1.000000e+00 : f32
    %378 = vector.broadcast %cst_60 : f32 to vector<8x128xf32>
    %379 = arith.addf %378, %377 : vector<8x128xf32>
    %380 = arith.divf %378, %379 : vector<8x128xf32>
    %381 = vector.extract_strided_slice %367 {offsets = [0, 256], sizes = [8, 128], strides = [1, 1]} : vector<8x384xf32> to vector<8x128xf32>
    %382 = math.tanh %381 : vector<8x128xf32>
    %383 = arith.negf %368 : vector<8x128xf32>
    %384 = math.exp %383 : vector<8x128xf32>
    %cst_61 = arith.constant 1.000000e+00 : f32
    %385 = vector.broadcast %cst_61 : f32 to vector<8x128xf32>
    %386 = arith.addf %385, %384 : vector<8x128xf32>
    %387 = arith.divf %385, %386 : vector<8x128xf32>
    %388 = arith.mulf %374, %382 : vector<8x128xf32>
    %389 = arith.mulf %387, %331 : vector<8x128xf32>
    %390 = arith.addf %388, %389 : vector<8x128xf32>
    %391 = math.tanh %390 : vector<8x128xf32>
    %392 = arith.mulf %380, %391 : vector<8x128xf32>
    %393 = arith.index_cast %274 : i32 to index
    %c0_62 = arith.constant 0 : index
    %394 = vector.load %arg4[%393, %c0_62] : memref<40x256xf32, #tpu.memory_space<vmem>>, vector<8x256xf32>
    %395 = vector.extract_strided_slice %394 {offsets = [0, 0], sizes = [8, 128], strides = [1, 1]} : vector<8x256xf32> to vector<8x128xf32>
    %396 = vector.extract_strided_slice %394 {offsets = [0, 128], sizes = [8, 128], strides = [1, 1]} : vector<8x256xf32> to vector<8x128xf32>
    %397 = arith.mulf %395, %390 : vector<8x128xf32>
    %398 = arith.mulf %396, %364 : vector<8x128xf32>
    %399 = arith.addf %397, %398 : vector<8x128xf32>
    %400 = arith.index_cast %274 : i32 to index
    %c0_63 = arith.constant 0 : index
    %401 = vector.load %arg5[%400, %c0_63] : memref<40x256xf32, #tpu.memory_space<vmem>>, vector<8x128xf32>
    tpu.vector_store %arg5[%400, %c0_63], %399 {strides = array<i32>} : memref<40x256xf32, #tpu.memory_space<vmem>>, vector<8x128xf32>,
    %402 = arith.mulf %395, %392 : vector<8x128xf32>
    %403 = arith.mulf %396, %366 : vector<8x128xf32>
    %404 = arith.addf %402, %403 : vector<8x128xf32>
    %405 = arith.index_cast %274 : i32 to index
    %c128_64 = arith.constant 128 : index
    %406 = vector.load %arg5[%405, %c128_64] : memref<40x256xf32, #tpu.memory_space<vmem>>, vector<8x128xf32>
    tpu.vector_store %arg5[%405, %c128_64], %404 {strides = array<i32>} : memref<40x256xf32, #tpu.memory_space<vmem>>, vector<8x128xf32>,
    %c3_i32 = arith.constant 3 : i32
    %c1_i32_65 = arith.constant 1 : i32
    %407 = arith.addi %c3_i32, %c1_i32_65 : i32
    %c8_i32_66 = arith.constant 8 : i32
    %408 = arith.muli %407, %c8_i32_66 : i32
    %409 = tpu.assume_multiple %408, 8 : i32
    %c8_i32_67 = arith.constant 8 : i32
    %410 = arith.muli %c3_i32, %c8_i32_67 : i32
    %411 = tpu.assume_multiple %410, 8 : i32
    %412 = arith.index_cast %c3_i32 : i32 to index
    %c0_68 = arith.constant 0 : index
    %c0_69 = arith.constant 0 : index
    %413 = vector.load %arg3[%412, %c0_68, %c0_69] : memref<4x8x8xf32, #tpu.memory_space<vmem>>, vector<1x8x8xf32>
    %414 = vector.shape_cast %413 : vector<1x8x8xf32> to vector<8x8xf32>
    %415 = arith.index_cast %411 : i32 to index
    %c0_70 = arith.constant 0 : index
    %416 = vector.load %arg5[%415, %c0_70] : memref<40x256xf32, #tpu.memory_space<vmem>>, vector<8x256xf32>
    %cst_71 = arith.constant 0.000000e+00 : f32
    %417 = vector.broadcast %cst_71 : f32 to vector<8x256xf32>
    %418 = vector.extract_strided_slice %414 {offsets = [0, 0], sizes = [8, 1], strides = [1, 1]} : vector<8x8xf32> to vector<8x1xf32>
    %419 = vector.extract_strided_slice %416 {offsets = [0, 0], sizes = [1, 256], strides = [1, 1]} : vector<8x256xf32> to vector<1x256xf32>
    %420 = vector.broadcast %418 : vector<8x1xf32> to vector<8x256xf32>
    %421 = vector.broadcast %419 : vector<1x256xf32> to vector<8x256xf32>
    %422 = arith.mulf %420, %421 : vector<8x256xf32>
    %423 = arith.addf %417, %422 : vector<8x256xf32>
    %424 = vector.extract_strided_slice %414 {offsets = [0, 1], sizes = [8, 1], strides = [1, 1]} : vector<8x8xf32> to vector<8x1xf32>
    %425 = vector.extract_strided_slice %416 {offsets = [1, 0], sizes = [1, 256], strides = [1, 1]} : vector<8x256xf32> to vector<1x256xf32>
    %426 = vector.broadcast %424 : vector<8x1xf32> to vector<8x256xf32>
    %427 = vector.broadcast %425 : vector<1x256xf32> to vector<8x256xf32>
    %428 = arith.mulf %426, %427 : vector<8x256xf32>
    %429 = arith.addf %423, %428 : vector<8x256xf32>
    %430 = vector.extract_strided_slice %414 {offsets = [0, 2], sizes = [8, 1], strides = [1, 1]} : vector<8x8xf32> to vector<8x1xf32>
    %431 = vector.extract_strided_slice %416 {offsets = [2, 0], sizes = [1, 256], strides = [1, 1]} : vector<8x256xf32> to vector<1x256xf32>
    %432 = vector.broadcast %430 : vector<8x1xf32> to vector<8x256xf32>
    %433 = vector.broadcast %431 : vector<1x256xf32> to vector<8x256xf32>
    %434 = arith.mulf %432, %433 : vector<8x256xf32>
    %435 = arith.addf %429, %434 : vector<8x256xf32>
    %436 = vector.extract_strided_slice %414 {offsets = [0, 3], sizes = [8, 1], strides = [1, 1]} : vector<8x8xf32> to vector<8x1xf32>
    %437 = vector.extract_strided_slice %416 {offsets = [3, 0], sizes = [1, 256], strides = [1, 1]} : vector<8x256xf32> to vector<1x256xf32>
    %438 = vector.broadcast %436 : vector<8x1xf32> to vector<8x256xf32>
    %439 = vector.broadcast %437 : vector<1x256xf32> to vector<8x256xf32>
    %440 = arith.mulf %438, %439 : vector<8x256xf32>
    %441 = arith.addf %435, %440 : vector<8x256xf32>
    %442 = vector.extract_strided_slice %414 {offsets = [0, 4], sizes = [8, 1], strides = [1, 1]} : vector<8x8xf32> to vector<8x1xf32>
    %443 = vector.extract_strided_slice %416 {offsets = [4, 0], sizes = [1, 256], strides = [1, 1]} : vector<8x256xf32> to vector<1x256xf32>
    %444 = vector.broadcast %442 : vector<8x1xf32> to vector<8x256xf32>
    %445 = vector.broadcast %443 : vector<1x256xf32> to vector<8x256xf32>
    %446 = arith.mulf %444, %445 : vector<8x256xf32>
    %447 = arith.addf %441, %446 : vector<8x256xf32>
    %448 = vector.extract_strided_slice %414 {offsets = [0, 5], sizes = [8, 1], strides = [1, 1]} : vector<8x8xf32> to vector<8x1xf32>
    %449 = vector.extract_strided_slice %416 {offsets = [5, 0], sizes = [1, 256], strides = [1, 1]} : vector<8x256xf32> to vector<1x256xf32>
    %450 = vector.broadcast %448 : vector<8x1xf32> to vector<8x256xf32>
    %451 = vector.broadcast %449 : vector<1x256xf32> to vector<8x256xf32>
    %452 = arith.mulf %450, %451 : vector<8x256xf32>
    %453 = arith.addf %447, %452 : vector<8x256xf32>
    %454 = vector.extract_strided_slice %414 {offsets = [0, 6], sizes = [8, 1], strides = [1, 1]} : vector<8x8xf32> to vector<8x1xf32>
    %455 = vector.extract_strided_slice %416 {offsets = [6, 0], sizes = [1, 256], strides = [1, 1]} : vector<8x256xf32> to vector<1x256xf32>
    %456 = vector.broadcast %454 : vector<8x1xf32> to vector<8x256xf32>
    %457 = vector.broadcast %455 : vector<1x256xf32> to vector<8x256xf32>
    %458 = arith.mulf %456, %457 : vector<8x256xf32>
    %459 = arith.addf %453, %458 : vector<8x256xf32>
    %460 = vector.extract_strided_slice %414 {offsets = [0, 7], sizes = [8, 1], strides = [1, 1]} : vector<8x8xf32> to vector<8x1xf32>
    %461 = vector.extract_strided_slice %416 {offsets = [7, 0], sizes = [1, 256], strides = [1, 1]} : vector<8x256xf32> to vector<1x256xf32>
    %462 = vector.broadcast %460 : vector<8x1xf32> to vector<8x256xf32>
    %463 = vector.broadcast %461 : vector<1x256xf32> to vector<8x256xf32>
    %464 = arith.mulf %462, %463 : vector<8x256xf32>
    %465 = arith.addf %459, %464 : vector<8x256xf32>
    %466 = vector.extract_strided_slice %465 {offsets = [0, 0], sizes = [8, 128], strides = [1, 1]} : vector<8x256xf32> to vector<8x128xf32>
    %467 = vector.extract_strided_slice %465 {offsets = [0, 128], sizes = [8, 128], strides = [1, 1]} : vector<8x256xf32> to vector<8x128xf32>
    %468 = arith.index_cast %409 : i32 to index
    %c0_72 = arith.constant 0 : index
    %469 = vector.load %arg0[%468, %c0_72] : memref<40x128xf32, #tpu.memory_space<vmem>>, vector<8x128xf32>
    %470 = tpu.concatenate %469, %467 in 1 : vector<8x128xf32>, vector<8x128xf32> -> vector<8x256xf32>
    %c0_73 = arith.constant 0 : index
    %c0_74 = arith.constant 0 : index
    %471 = vector.load %arg1[%c0_73, %c0_74] : memref<256x1024xf32, #tpu.memory_space<vmem>>, vector<256x1024xf32>
    %cst_75 = arith.constant dense<0.000000e+00> : vector<8x1024xf32>
    %472 = tpu.matmul %470, %471, %cst_75 {dimension_numbers = #tpu.dot_dimension_numbers<[1], [0], [0], [1], [0, 0, 1, 1], [], []>} : vector<8x256xf32>, vector<256x1024xf32>, vector<8x1024xf32> -> vector<8x1024xf32>
    %c0_76 = arith.constant 0 : index
    %c0_77 = arith.constant 0 : index
    %473 = vector.load %arg2[%c0_76, %c0_77] : memref<1x1024xf32, #tpu.memory_space<vmem>>, vector<1x1024xf32>
    %474 = vector.broadcast %473 : vector<1x1024xf32> to vector<8x1024xf32>
    %475 = arith.addf %472, %474 : vector<8x1024xf32>
    %476 = vector.extract_strided_slice %475 {offsets = [0, 0], sizes = [8, 384], strides = [1, 1]} : vector<8x1024xf32> to vector<8x384xf32>
    %477 = vector.extract_strided_slice %475 {offsets = [0, 768], sizes = [8, 128], strides = [1, 1]} : vector<8x1024xf32> to vector<8x128xf32>
    %478 = vector.extract_strided_slice %476 {offsets = [0, 0], sizes = [8, 128], strides = [1, 1]} : vector<8x384xf32> to vector<8x128xf32>
    %479 = arith.negf %478 : vector<8x128xf32>
    %480 = math.exp %479 : vector<8x128xf32>
    %cst_78 = arith.constant 1.000000e+00 : f32
    %481 = vector.broadcast %cst_78 : f32 to vector<8x128xf32>
    %482 = arith.addf %481, %480 : vector<8x128xf32>
    %483 = arith.divf %481, %482 : vector<8x128xf32>
    %484 = vector.extract_strided_slice %476 {offsets = [0, 128], sizes = [8, 128], strides = [1, 1]} : vector<8x384xf32> to vector<8x128xf32>
    %485 = arith.negf %484 : vector<8x128xf32>
    %486 = math.exp %485 : vector<8x128xf32>
    %cst_79 = arith.constant 1.000000e+00 : f32
    %487 = vector.broadcast %cst_79 : f32 to vector<8x128xf32>
    %488 = arith.addf %487, %486 : vector<8x128xf32>
    %489 = arith.divf %487, %488 : vector<8x128xf32>
    %490 = vector.extract_strided_slice %476 {offsets = [0, 256], sizes = [8, 128], strides = [1, 1]} : vector<8x384xf32> to vector<8x128xf32>
    %491 = math.tanh %490 : vector<8x128xf32>
    %492 = arith.negf %477 : vector<8x128xf32>
    %493 = math.exp %492 : vector<8x128xf32>
    %cst_80 = arith.constant 1.000000e+00 : f32
    %494 = vector.broadcast %cst_80 : f32 to vector<8x128xf32>
    %495 = arith.addf %494, %493 : vector<8x128xf32>
    %496 = arith.divf %494, %495 : vector<8x128xf32>
    %497 = arith.mulf %483, %491 : vector<8x128xf32>
    %498 = arith.mulf %496, %466 : vector<8x128xf32>
    %499 = arith.addf %497, %498 : vector<8x128xf32>
    %500 = math.tanh %499 : vector<8x128xf32>
    %501 = arith.mulf %489, %500 : vector<8x128xf32>
    %502 = vector.extract_strided_slice %475 {offsets = [0, 384], sizes = [8, 384], strides = [1, 1]} : vector<8x1024xf32> to vector<8x384xf32>
    %503 = vector.extract_strided_slice %475 {offsets = [0, 896], sizes = [8, 128], strides = [1, 1]} : vector<8x1024xf32> to vector<8x128xf32>
    %504 = vector.extract_strided_slice %502 {offsets = [0, 0], sizes = [8, 128], strides = [1, 1]} : vector<8x384xf32> to vector<8x128xf32>
    %505 = arith.negf %504 : vector<8x128xf32>
    %506 = math.exp %505 : vector<8x128xf32>
    %cst_81 = arith.constant 1.000000e+00 : f32
    %507 = vector.broadcast %cst_81 : f32 to vector<8x128xf32>
    %508 = arith.addf %507, %506 : vector<8x128xf32>
    %509 = arith.divf %507, %508 : vector<8x128xf32>
    %510 = vector.extract_strided_slice %502 {offsets = [0, 128], sizes = [8, 128], strides = [1, 1]} : vector<8x384xf32> to vector<8x128xf32>
    %511 = arith.negf %510 : vector<8x128xf32>
    %512 = math.exp %511 : vector<8x128xf32>
    %cst_82 = arith.constant 1.000000e+00 : f32
    %513 = vector.broadcast %cst_82 : f32 to vector<8x128xf32>
    %514 = arith.addf %513, %512 : vector<8x128xf32>
    %515 = arith.divf %513, %514 : vector<8x128xf32>
    %516 = vector.extract_strided_slice %502 {offsets = [0, 256], sizes = [8, 128], strides = [1, 1]} : vector<8x384xf32> to vector<8x128xf32>
    %517 = math.tanh %516 : vector<8x128xf32>
    %518 = arith.negf %503 : vector<8x128xf32>
    %519 = math.exp %518 : vector<8x128xf32>
    %cst_83 = arith.constant 1.000000e+00 : f32
    %520 = vector.broadcast %cst_83 : f32 to vector<8x128xf32>
    %521 = arith.addf %520, %519 : vector<8x128xf32>
    %522 = arith.divf %520, %521 : vector<8x128xf32>
    %523 = arith.mulf %509, %517 : vector<8x128xf32>
    %524 = arith.mulf %522, %466 : vector<8x128xf32>
    %525 = arith.addf %523, %524 : vector<8x128xf32>
    %526 = math.tanh %525 : vector<8x128xf32>
    %527 = arith.mulf %515, %526 : vector<8x128xf32>
    %528 = arith.index_cast %409 : i32 to index
    %c0_84 = arith.constant 0 : index
    %529 = vector.load %arg4[%528, %c0_84] : memref<40x256xf32, #tpu.memory_space<vmem>>, vector<8x256xf32>
    %530 = vector.extract_strided_slice %529 {offsets = [0, 0], sizes = [8, 128], strides = [1, 1]} : vector<8x256xf32> to vector<8x128xf32>
    %531 = vector.extract_strided_slice %529 {offsets = [0, 128], sizes = [8, 128], strides = [1, 1]} : vector<8x256xf32> to vector<8x128xf32>
    %532 = arith.mulf %530, %525 : vector<8x128xf32>
    %533 = arith.mulf %531, %499 : vector<8x128xf32>
    %534 = arith.addf %532, %533 : vector<8x128xf32>
    %535 = arith.index_cast %409 : i32 to index
    %c0_85 = arith.constant 0 : index
    %536 = vector.load %arg5[%535, %c0_85] : memref<40x256xf32, #tpu.memory_space<vmem>>, vector<8x128xf32>
    tpu.vector_store %arg5[%535, %c0_85], %534 {strides = array<i32>} : memref<40x256xf32, #tpu.memory_space<vmem>>, vector<8x128xf32>,
    %537 = arith.mulf %530, %527 : vector<8x128xf32>
    %538 = arith.mulf %531, %501 : vector<8x128xf32>
    %539 = arith.addf %537, %538 : vector<8x128xf32>
    %540 = arith.index_cast %409 : i32 to index
    %c128_86 = arith.constant 128 : index
    %541 = vector.load %arg5[%540, %c128_86] : memref<40x256xf32, #tpu.memory_space<vmem>>, vector<8x128xf32>
    tpu.vector_store %arg5[%540, %c128_86], %539 {strides = array<i32>} : memref<40x256xf32, #tpu.memory_space<vmem>>, vector<8x128xf32>,
    %c4_i32 = arith.constant 4 : i32
    return
  }
}

</mosaic_0001>

<bundles_post_ra>
// kernel: down_tree_lstm_forward.1
= control target key start
LH: loop header
LB: loop body
LE: loop exit
PB: predicated region body
PF: predicated region fallthrough
CT: control target
= control target key end

     0   :  { %10 = vsyncpa [#allocation3], 0  ;;  %s5043_s0 = inlined_call_operand.hbm [shape: f32[40,128], index: 0, kind: input, shape index: {}]   ;;  %s5044_s1 = inlined_call_operand.hbm [shape: f32[256,1024], index: 1, kind: input, shape index: {}]   ;;  %s5045_s2 = inlined_call_operand.vmem [shape: f32[1,1024], index: 2, kind: input, shape index: {}]   ;;  %s5046_s3 = inlined_call_operand.hbm [shape: f32[4,8,8], index: 3, kind: input, shape index: {}]   ;;  %s5047_s4 = inlined_call_operand.hbm [shape: f32[40,256], index: 4, kind: input, shape index: {}]   ;;  %s5048_s5 = inlined_call_operand.vmem [shape: f32[40,256], index: 5, kind: output, shape index: {}]  }
   0x1   :  { %11 = vsyncpa [#allocation5], 0 }
   0x2   :  { %12 = vsyncpa [#allocation8], 0  ;;  %s4560_s18 = smov [#allocation4]   ;;  %s4466_s22 = scalar_lea.hbm %s5044_s1, 32768 }
   0x3   :  { %s30_s19 = sshll.u32 %s4560_s18, 4  ;;  %p4467_p0 = scmp.ne.s32.totalorder %s5044_s1, %s4466_s22  ;;  %s31_s19 = int_to_ptr.vmem [resolvable:$true] %s30_s19 }
   0x4   :  { %p4470_p1 = scmp.lt.u32.totalorder %s4466_s22, %s5044_s1 }
   0x6   :  { %p4472_p2 = pnand %p4470_p1, %p4467_p0 }
   0x8   :  { %4475 = shalt.err (!%p4472_p2)
}
   0x9   :  { %s4476_s27 = scalar_lea.vmem %s31_s19, 32768  ;;  %p4481_p4 = scmp.lt.s32.totalorder %s31_s19, %s31_s19 }
   0xa   :  { %p4477_p3 = scmp.ne.s32.totalorder %s31_s19, %s4476_s27  ;;  %p4482_p5 = scmp.lt.s32.totalorder %s4476_s27, %s4476_s27 }
   0xc   :  { %p4483_p6 = por %p4482_p5, %p4481_p4 }
   0xe   :  { %p4484_p7 = pnand %p4483_p6, %p4477_p3 }
  0x10   :  { %4487 = shalt.err (!%p4484_p7)
}
  0x11   :  { %s4561_s28 = smov 1024   ;;  %s4562_s29 = smov 64  }
  0x12   :  { %36 = dma.hbm_to_vmem [thread:$0]  %s5044_s1, 32768, %s31_s19, [#allocation5], %s4561_s28, %s4561_s28, %s4562_s29  }
  0x13   :  { %s4563_s7 = smov [#allocation2]   ;;  %s4488_s11 = scalar_lea.hbm %s5043_s0, 640 }
  0x14   :  { %s18_s8 = sshll.u32 %s4563_s7, 4  ;;  %p4489_p8 = scmp.ne.s32.totalorder %s5043_s0, %s4488_s11  ;;  %s19_s8 = int_to_ptr.vmem [resolvable:$true] %s18_s8 }
  0x15   :  { %p4492_p9 = scmp.lt.u32.totalorder %s4488_s11, %s5043_s0 }
  0x17   :  { %p4494_p10 = pnand %p4492_p9, %p4489_p8 }
  0x19   :  { %4497 = shalt.err (!%p4494_p10)
}
  0x1a   :  { %s4498_s16 = scalar_lea.vmem %s19_s8, 640  ;;  %p4503_p12 = scmp.lt.s32.totalorder %s19_s8, %s19_s8 }
  0x1b   :  { %p4499_p11 = scmp.ne.s32.totalorder %s19_s8, %s4498_s16  ;;  %p4504_p13 = scmp.lt.s32.totalorder %s4498_s16, %s4498_s16 }
  0x1d   :  { %p4505_p0 = por %p4504_p13, %p4503_p12 }
  0x1f   :  { %p4506_p1 = pnand %p4505_p0, %p4499_p11 }
  0x21   :  { %4509 = shalt.err (!%p4506_p1)
}
  0x22   :  { %s4564_s1 = smov 128   ;;  %s4565_s17 = smov 8  }
  0x23   :  { %24 = dma.hbm_to_vmem [thread:$0]  %s5043_s0, 640, %s19_s8, [#allocation3], %s4564_s1, %s4564_s1, %s4565_s17  }
  0x24   :  { %s4566_s20 = smov [#allocation6]   ;;  %s4567_s22 = smov [#allocation7]  }
  0x25   :  { %s44_s21 = sshll.u32 %s4566_s20, 4  ;;  %s56_s23 = sshll.u32 %s4567_s22, 4  ;;  %s45_s21 = int_to_ptr.vmem [resolvable:$true] %s44_s21  ;;  %s4633_s23 = int_to_ptr.vmem [resolvable:$true] %s56_s23 }
  0x26   :  { %s4510_s26 = scalar_lea.hbm %s5046_s3, 512 }
  0x27   :  { %p4511_p2 = scmp.ne.s32.totalorder %s5046_s3, %s4510_s26  ;;  %p4514_p3 = scmp.lt.u32.totalorder %s4510_s26, %s5046_s3 }
  0x29   :  { %p4516_p4 = pnand %p4514_p3, %p4511_p2 }
  0x2b   :  { %4519 = shalt.err (!%p4516_p4)
}
  0x2c   :  { %s4520_s0 = scalar_lea.vmem %s45_s21, 512  ;;  %p4525_p6 = scmp.lt.s32.totalorder %s45_s21, %s45_s21 }
  0x2d   :  { %p4521_p5 = scmp.ne.s32.totalorder %s45_s21, %s4520_s0  ;;  %p4526_p7 = scmp.lt.s32.totalorder %s4520_s0, %s4520_s0 }
  0x2f   :  { %p4527_p8 = por %p4526_p7, %p4525_p6 }
  0x31   :  { %p4528_p9 = pnand %p4527_p8, %p4521_p5 }
  0x33   :  { %4531 = shalt.err (!%p4528_p9)
}
  0x34   :  { %50 = dma.hbm_to_vmem [thread:$0]  %s5046_s3, 512, %s45_s21, [#allocation5], %s4564_s1, %s4564_s1, %s4565_s17  }
  0x35   :  { %s4532_s10 = scalar_lea.hbm %s5047_s4, 1280 }
  0x36   :  { %p4533_p10 = scmp.ne.s32.totalorder %s5047_s4, %s4532_s10  ;;  %p4536_p11 = scmp.lt.u32.totalorder %s4532_s10, %s5047_s4 }
  0x38   :  { %p4538_p12 = pnand %p4536_p11, %p4533_p10 }
  0x3a   :  { %4541 = shalt.err (!%p4538_p12)
}
  0x3b   :  { %s4542_s15 = scalar_lea.vmem %s4633_s23, 1280  ;;  %p4547_p0 = scmp.lt.s32.totalorder %s4633_s23, %s4633_s23 }
  0x3c   :  { %p4543_p13 = scmp.ne.s32.totalorder %s4633_s23, %s4542_s15  ;;  %p4548_p1 = scmp.lt.s32.totalorder %s4542_s15, %s4542_s15 }
  0x3e   :  { %p4549_p2 = por %p4548_p1, %p4547_p0 }
  0x40   :  { %p4550_p3 = pnand %p4549_p2, %p4543_p13 }
  0x42   :  { %4553 = shalt.err (!%p4550_p3)
}
  0x43   :  { %s4568_s3 = smov 256   ;;  %s4569_s16 = smov 16  }
  0x44   :  { %62 = dma.hbm_to_vmem [thread:$0]  %s5047_s4, 1280, %s4633_s23, [#allocation8], %s4568_s3, %s4568_s3, %s4569_s16  }
  0x45   :  { %4554 = dma.done.wait [#allocation3], 640  }
  0x46   :  { %4555 = vsyncadd [#allocation3], 4294966656 }
  0x47   :  { %4556 = dma.done.wait [#allocation5], 33280  }
  0x48   :  { %4557 = vsyncadd [#allocation5], 4294934016 }
  0x49   :  { %4558 = dma.done.wait [#allocation8], 1280  }
  0x4a   :  { %4559 = vsyncadd [#allocation8], 4294966016  ;;  %v4570_v0 = vmov 2   ;;  %v4571_v1 = vmov 0   ;;  %v4572_v2 = vmov 0.0   ;;  %v4674_v3 = vld [vmem:[#allocation6] sm:$0xff] }
  0x4b   :  { %4305 = vset.pattern.permute.xlu1 %v4570_v0  ;;  %4303 = vset.pattern.permute.xlu0 %v4571_v1  ;;  %75 = vst [vmem:[%s5048_s5] sm:$0xff] %v4572_v2  ;;  %76 = vst [vmem:[%s5048_s5 + $0x8] sm:$0xff] %v4572_v2  ;;  %v223_v4 = vld [vmem:[#allocation4 + $0x8] sm:$0xff]  ;;  %v225_v7 = vld [vmem:[#allocation4 + $0x18] sm:$0xff]  ;;  %v4573_v23 = vmov 3   ;;  %v4574_v24 = vmov 1   ;;  %v4575_v39 = vmov 4  }
  0x4c   :  { %v231_v5 = vld [vmem:[#allocation4 + $0x48] sm:$0xff]  ;;  %125 = vperm.xlu1 %4305, %v4674_v3   ;;  %93 = vperm.xlu0 %4303, %v4674_v3   ;;  %v233_v8 = vld [vmem:[#allocation4 + $0x58] sm:$0xff]  ;;  %v222_v9 = vld [vmem:[#allocation4] sm:$0xff]  ;;  %v4576_v40 = vmov 5   ;;  %v4577_v55 = vmov 6  }
  0x4d   :  { %v3260_v6 = vpack.c.bf16 %v231_v5, %v223_v4  ;;  %v3324_v10 = vpack.c.bf16 %v233_v8, %v225_v7  ;;  %v230_v11 = vld [vmem:[#allocation4 + $0x40] sm:$0xff]  ;;  %v224_v12 = vld [vmem:[#allocation4 + $0x10] sm:$0xff]  ;;  %v239_v16 = vld [vmem:[#allocation4 + $0x88] sm:$0xff] }
  0x4e   :  { %v232_v13 = vld [vmem:[#allocation4 + $0x50] sm:$0xff]  ;;  %v3262_v14 = vpack.c.bf16 %v230_v11, %v222_v9  ;;  %v247_v17 = vld [vmem:[#allocation4 + $0xc8] sm:$0xff]  ;;  %v241_v18 = vld [vmem:[#allocation4 + $0x98] sm:$0xff]  ;;  %v4578_v11 = vmov 7  }
  0x4f   :  { %3261 = vmatprep.subr.bf16.mxu0 %v3260_v6  ;;  %v3326_v15 = vpack.c.bf16 %v232_v13, %v224_v12  ;;  %3325 = vmatprep.subr.bf16.mxu1 %v3324_v10  ;;  %v3264_v19 = vpack.c.bf16 %v247_v17, %v239_v16  ;;  %v249_v20 = vld [vmem:[#allocation4 + $0xd8] sm:$0xff]  ;;  %v238_v21 = vld [vmem:[#allocation4 + $0x80] sm:$0xff]  ;;  %v240_v26 = vld [vmem:[#allocation4 + $0x90] sm:$0xff] }
  0x50   :  { %v246_v22 = vld [vmem:[#allocation4 + $0xc0] sm:$0xff]  ;;  %4306 = vset.pattern.permute.xlu1 %v4573_v23  ;;  %4304 = vset.pattern.permute.xlu0 %v4574_v24  ;;  %v3328_v25 = vpack.c.bf16 %v249_v20, %v241_v18  ;;  %v248_v27 = vld [vmem:[#allocation4 + $0xd0] sm:$0xff]  ;;  %v255_v28 = vld [vmem:[#allocation4 + $0x108] sm:$0xff] }
  0x51   :  { %141 = vperm.xlu1 %4306, %v4674_v3   ;;  %109 = vperm.xlu0 %4304, %v4674_v3   ;;  %v263_v29 = vld [vmem:[#allocation4 + $0x148] sm:$0xff]  ;;  %v257_v30 = vld [vmem:[#allocation4 + $0x118] sm:$0xff]  ;;  %v3266_v32 = vpack.c.bf16 %v246_v22, %v238_v21  ;;  %v3330_v33 = vpack.c.bf16 %v248_v27, %v240_v26  ;;  %v254_v36 = vld [vmem:[#allocation4 + $0x100] sm:$0xff] }
  0x52   :  { %v265_v31 = vld [vmem:[#allocation4 + $0x158] sm:$0xff]  ;;  %3263 = vmatpush1.bf16.msra.mxu0 %v3262_v14  ;;  %3327 = vmatpush1.bf16.msra.mxu1 %v3326_v15  ;;  %v3268_v34 = vpack.c.bf16 %v263_v29, %v255_v28  ;;  %v262_v37 = vld [vmem:[#allocation4 + $0x140] sm:$0xff]  ;;  %v256_v38 = vld [vmem:[#allocation4 + $0x110] sm:$0xff] }
  0x53   :  { %3265 = vmatprep.subr.bf16.mxu0 %v3264_v19  ;;  %3329 = vmatprep.subr.bf16.mxu1 %v3328_v25  ;;  %v3332_v35 = vpack.c.bf16 %v265_v31, %v257_v30  ;;  %v264_v41 = vld [vmem:[#allocation4 + $0x150] sm:$0xff]  ;;  %v271_v42 = vld [vmem:[#allocation4 + $0x188] sm:$0xff]  ;;  %v273_v44 = vld [vmem:[#allocation4 + $0x198] sm:$0xff]  ;;  %v3270_v46 = vpack.c.bf16 %v262_v37, %v254_v36 }
  0x54   :  { %v279_v43 = vld [vmem:[#allocation4 + $0x1c8] sm:$0xff]  ;;  %v281_v45 = vld [vmem:[#allocation4 + $0x1d8] sm:$0xff]  ;;  %v3334_v47 = vpack.c.bf16 %v264_v41, %v256_v38  ;;  %v270_v49 = vld [vmem:[#allocation4 + $0x180] sm:$0xff] }
  0x55   :  { %4307 = vset.pattern.permute.xlu1 %v4575_v39  ;;  %4308 = vset.pattern.permute.xlu0 %v4576_v40  ;;  %v3272_v48 = vpack.c.bf16 %v279_v43, %v271_v42  ;;  %v278_v50 = vld [vmem:[#allocation4 + $0x1c0] sm:$0xff]  ;;  %v3336_v51 = vpack.c.bf16 %v281_v45, %v273_v44  ;;  %v272_v52 = vld [vmem:[#allocation4 + $0x190] sm:$0xff]  ;;  %v287_v54 = vld [vmem:[#allocation4 + $0x208] sm:$0xff] }
  0x56   :  { %157 = vperm.xlu1 %4307, %v4674_v3   ;;  %173 = vperm.xlu0 %4308, %v4674_v3   ;;  %v280_v53 = vld [vmem:[#allocation4 + $0x1d0] sm:$0xff]  ;;  %v295_v56 = vld [vmem:[#allocation4 + $0x248] sm:$0xff]  ;;  %v289_v57 = vld [vmem:[#allocation4 + $0x218] sm:$0xff]  ;;  %v3274_v59 = vpack.c.bf16 %v278_v50, %v270_v49 }
  0x57   :  { %3267 = vmatpush1.bf16.msra.mxu0 %v3266_v32  ;;  %3331 = vmatpush1.bf16.msra.mxu1 %v3330_v33  ;;  %v297_v58 = vld [vmem:[#allocation4 + $0x258] sm:$0xff]  ;;  %v3338_v60 = vpack.c.bf16 %v280_v53, %v272_v52  ;;  %v286_v61 = vld [vmem:[#allocation4 + $0x200] sm:$0xff]  ;;  %v288_v63 = vld [vmem:[#allocation4 + $0x210] sm:$0xff]  ;;  %v3276_v4 = vpack.c.bf16 %v295_v56, %v287_v54 }
  0x58   :  { %3269 = vmatprep.subr.bf16.mxu0 %v3268_v34  ;;  %3333 = vmatprep.subr.bf16.mxu1 %v3332_v35  ;;  %v294_v62 = vld [vmem:[#allocation4 + $0x240] sm:$0xff]  ;;  %v3340_v5 = vpack.c.bf16 %v297_v58, %v289_v57  ;;  %v296_v6 = vld [vmem:[#allocation4 + $0x250] sm:$0xff]  ;;  %v303_v7 = vld [vmem:[#allocation4 + $0x288] sm:$0xff] }
  0x59   :  { %v311_v8 = vld [vmem:[#allocation4 + $0x2c8] sm:$0xff]  ;;  %v305_v9 = vld [vmem:[#allocation4 + $0x298] sm:$0xff]  ;;  %v3278_v12 = vpack.c.bf16 %v294_v62, %v286_v61  ;;  %v3342_v13 = vpack.c.bf16 %v296_v6, %v288_v63  ;;  %v302_v15 = vld [vmem:[#allocation4 + $0x280] sm:$0xff] }
  0x5a   :  { %4309 = vset.pattern.permute.xlu1 %v4577_v55  ;;  %4311 = vset.pattern.permute.xlu0 %v4571_v1  ;;  %v313_v10 = vld [vmem:[#allocation4 + $0x2d8] sm:$0xff]  ;;  %v3280_v14 = vpack.c.bf16 %v311_v8, %v303_v7  ;;  %v310_v16 = vld [vmem:[#allocation4 + $0x2c0] sm:$0xff]  ;;  %v304_v17 = vld [vmem:[#allocation4 + $0x290] sm:$0xff] }
  0x5b   :  { %189 = vperm.xlu1 %4309, %v4674_v3   ;;  %3271 = vmatpush1.bf16.msra.mxu0 %v3270_v46  ;;  %v3344_v18 = vpack.c.bf16 %v313_v10, %v305_v9  ;;  %v312_v19 = vld [vmem:[#allocation4 + $0x2d0] sm:$0xff]  ;;  %v319_v20 = vld [vmem:[#allocation4 + $0x308] sm:$0xff]  ;;  %v321_v22 = vld [vmem:[#allocation4 + $0x318] sm:$0xff]  ;;  %v3282_v26 = vpack.c.bf16 %v310_v16, %v302_v15 }
  0x5c   :  { %3335 = vmatpush1.bf16.msra.mxu1 %v3334_v47  ;;  %3273 = vmatprep.subr.bf16.mxu0 %v3272_v48  ;;  %v327_v21 = vld [vmem:[#allocation4 + $0x348] sm:$0xff]  ;;  %v329_v25 = vld [vmem:[#allocation4 + $0x358] sm:$0xff]  ;;  %v3346_v27 = vpack.c.bf16 %v312_v19, %v304_v17  ;;  %v318_v28 = vld [vmem:[#allocation4 + $0x300] sm:$0xff] }
  0x5d   :  { %3337 = vmatprep.subr.bf16.mxu1 %v3336_v51  ;;  %v326_v29 = vld [vmem:[#allocation4 + $0x340] sm:$0xff]  ;;  %v320_v30 = vld [vmem:[#allocation4 + $0x310] sm:$0xff]  ;;  %v3348_v31 = vpack.c.bf16 %v329_v25, %v321_v22  ;;  %v335_v33 = vld [vmem:[#allocation4 + $0x388] sm:$0xff] }
  0x5e   :  { %v328_v32 = vld [vmem:[#allocation4 + $0x350] sm:$0xff]  ;;  %v343_v34 = vld [vmem:[#allocation4 + $0x3c8] sm:$0xff]  ;;  %v337_v35 = vld [vmem:[#allocation4 + $0x398] sm:$0xff]  ;;  %v3286_v37 = vpack.c.bf16 %v326_v29, %v318_v28 }
  0x5f   :  { %4310 = vset.pattern.permute.xlu1 %v4578_v11  ;;  %3275 = vmatpush1.bf16.msra.mxu0 %v3274_v59  ;;  %v345_v36 = vld [vmem:[#allocation4 + $0x3d8] sm:$0xff]  ;;  %v3350_v38 = vpack.c.bf16 %v328_v32, %v320_v30  ;;  %v3288_v41 = vpack.c.bf16 %v343_v34, %v335_v33  ;;  %v334_v42 = vld [vmem:[#allocation4 + $0x380] sm:$0xff]  ;;  %v336_v44 = vld [vmem:[#allocation4 + $0x390] sm:$0xff] }
  0x60   :  { %205 = vperm.xlu1 %4310, %v4674_v3   ;;  %3339 = vmatpush1.bf16.msra.mxu1 %v3338_v60  ;;  %v3284_v3 = vpack.c.bf16 %v327_v21, %v319_v20  ;;  %v342_v43 = vld [vmem:[#allocation4 + $0x3c0] sm:$0xff]  ;;  %v3352_v45 = vpack.c.bf16 %v345_v36, %v337_v35  ;;  %v344_v46 = vld [vmem:[#allocation4 + $0x3d0] sm:$0xff]  ;;  %v351_v47 = vld [vmem:[#allocation4 + $0x408] sm:$0xff] }
  0x61   :  { %3277 = vmatprep.subr.bf16.mxu0 %v3276_v4  ;;  %3341 = vmatprep.subr.bf16.mxu1 %v3340_v5  ;;  %v359_v48 = vld [vmem:[#allocation4 + $0x448] sm:$0xff]  ;;  %v353_v49 = vld [vmem:[#allocation4 + $0x418] sm:$0xff]  ;;  %v3290_v51 = vpack.c.bf16 %v342_v43, %v334_v42  ;;  %v3354_v52 = vpack.c.bf16 %v344_v46, %v336_v44  ;;  %v350_v54 = vld [vmem:[#allocation4 + $0x400] sm:$0xff] }
  0x62   :  { %v361_v50 = vld [vmem:[#allocation4 + $0x458] sm:$0xff]  ;;  %v3292_v53 = vpack.c.bf16 %v359_v48, %v351_v47  ;;  %v358_v56 = vld [vmem:[#allocation4 + $0x440] sm:$0xff]  ;;  %v352_v57 = vld [vmem:[#allocation4 + $0x410] sm:$0xff] }
  0x63   :  { %3279 = vmatpush1.bf16.msra.mxu0 %v3278_v12  ;;  %v3356_v58 = vpack.c.bf16 %v361_v50, %v353_v49  ;;  %v360_v59 = vld [vmem:[#allocation4 + $0x450] sm:$0xff]  ;;  %v367_v60 = vld [vmem:[#allocation4 + $0x488] sm:$0xff]  ;;  %v369_v62 = vld [vmem:[#allocation4 + $0x498] sm:$0xff]  ;;  %v3294_v4 = vpack.c.bf16 %v358_v56, %v350_v54 }
  0x64   :  { %3343 = vmatpush1.bf16.msra.mxu1 %v3342_v13  ;;  %3281 = vmatprep.subr.bf16.mxu0 %v3280_v14  ;;  %v375_v61 = vld [vmem:[#allocation4 + $0x4c8] sm:$0xff]  ;;  %v377_v63 = vld [vmem:[#allocation4 + $0x4d8] sm:$0xff]  ;;  %v3358_v5 = vpack.c.bf16 %v360_v59, %v352_v57  ;;  %v366_v7 = vld [vmem:[#allocation4 + $0x480] sm:$0xff] }
  0x65   :  { %3345 = vmatprep.subr.bf16.mxu1 %v3344_v18  ;;  %4312 = vset.pattern.permute.xlu1 %v4574_v24  ;;  %v3296_v6 = vpack.c.bf16 %v375_v61, %v367_v60  ;;  %v374_v8 = vld [vmem:[#allocation4 + $0x4c0] sm:$0xff]  ;;  %v368_v9 = vld [vmem:[#allocation4 + $0x490] sm:$0xff]  ;;  %v3360_v10 = vpack.c.bf16 %v377_v63, %v369_v62  ;;  %v383_v13 = vld [vmem:[#allocation4 + $0x508] sm:$0xff] }
  0x66   :  { %v376_v12 = vld [vmem:[#allocation4 + $0x4d0] sm:$0xff]  ;;  %v391_v14 = vld [vmem:[#allocation4 + $0x548] sm:$0xff]  ;;  %v385_v15 = vld [vmem:[#allocation4 + $0x518] sm:$0xff]  ;;  %v3298_v17 = vpack.c.bf16 %v374_v8, %v366_v7 }
  0x67   :  { %3283 = vmatpush1.bf16.msra.mxu0 %v3282_v26  ;;  %v393_v16 = vld [vmem:[#allocation4 + $0x558] sm:$0xff]  ;;  %v3362_v18 = vpack.c.bf16 %v376_v12, %v368_v9  ;;  %v3300_v19 = vpack.c.bf16 %v391_v14, %v383_v13  ;;  %v382_v20 = vld [vmem:[#allocation4 + $0x500] sm:$0xff]  ;;  %v384_v22 = vld [vmem:[#allocation4 + $0x510] sm:$0xff] }
  0x68   :  { %3347 = vmatpush1.bf16.msra.mxu1 %v3346_v27  ;;  %3285 = vmatprep.subr.bf16.mxu0 %v3284_v3  ;;  %v390_v21 = vld [vmem:[#allocation4 + $0x540] sm:$0xff]  ;;  %v3364_v25 = vpack.c.bf16 %v393_v16, %v385_v15  ;;  %v392_v26 = vld [vmem:[#allocation4 + $0x550] sm:$0xff]  ;;  %v399_v27 = vld [vmem:[#allocation4 + $0x588] sm:$0xff] }
  0x69   :  { %3349 = vmatprep.subr.bf16.mxu1 %v3348_v31  ;;  %v407_v3 = vld [vmem:[#allocation4 + $0x5c8] sm:$0xff]  ;;  %v401_v28 = vld [vmem:[#allocation4 + $0x598] sm:$0xff]  ;;  %v3302_v30 = vpack.c.bf16 %v390_v21, %v382_v20  ;;  %v3366_v31 = vpack.c.bf16 %v392_v26, %v384_v22  ;;  %v398_v33 = vld [vmem:[#allocation4 + $0x580] sm:$0xff] }
  0x6a   :  { %v409_v29 = vld [vmem:[#allocation4 + $0x5d8] sm:$0xff]  ;;  %v3304_v32 = vpack.c.bf16 %v407_v3, %v399_v27  ;;  %v406_v34 = vld [vmem:[#allocation4 + $0x5c0] sm:$0xff]  ;;  %v400_v35 = vld [vmem:[#allocation4 + $0x590] sm:$0xff] }
  0x6b   :  { %3287 = vmatpush1.bf16.msra.mxu0 %v3286_v37  ;;  %v3368_v36 = vpack.c.bf16 %v409_v29, %v401_v28  ;;  %v408_v37 = vld [vmem:[#allocation4 + $0x5d0] sm:$0xff]  ;;  %v417_v42 = vld [vmem:[#allocation4 + $0x618] sm:$0xff]  ;;  %v3306_v44 = vpack.c.bf16 %v406_v34, %v398_v33  ;;  %v414_v47 = vld [vmem:[#allocation4 + $0x600] sm:$0xff] }
  0x6c   :  { %3351 = vmatpush1.bf16.msra.mxu1 %v3350_v38  ;;  %3289 = vmatprep.subr.bf16.mxu0 %v3288_v41  ;;  %v415_v38 = vld [vmem:[#allocation4 + $0x608] sm:$0xff]  ;;  %v425_v43 = vld [vmem:[#allocation4 + $0x658] sm:$0xff]  ;;  %v422_v48 = vld [vmem:[#allocation4 + $0x640] sm:$0xff] }
  0x6d   :  { %3353 = vmatprep.subr.bf16.mxu1 %v3352_v45  ;;  %v423_v41 = vld [vmem:[#allocation4 + $0x648] sm:$0xff]  ;;  %v3370_v45 = vpack.c.bf16 %v408_v37, %v400_v35  ;;  %v416_v49 = vld [vmem:[#allocation4 + $0x610] sm:$0xff]  ;;  %v3372_v50 = vpack.c.bf16 %v425_v43, %v417_v42  ;;  %v433_v54 = vld [vmem:[#allocation4 + $0x698] sm:$0xff]  ;;  %v3310_v57 = vpack.c.bf16 %v422_v48, %v414_v47  ;;  %v96_v42 = vlaneseq }
  0x6e   :  { %v3308_v46 = vpack.c.bf16 %v423_v41, %v415_v38  ;;  %v441_v56 = vld [vmem:[#allocation4 + $0x6d8] sm:$0xff]  ;;  %v430_v60 = vld [vmem:[#allocation4 + $0x680] sm:$0xff]  ;;  %v432_v62 = vld [vmem:[#allocation4 + $0x690] sm:$0xff] }
  0x6f   :  { %3291 = vmatpush1.bf16.msra.mxu0 %v3290_v51  ;;  %v424_v51 = vld [vmem:[#allocation4 + $0x650] sm:$0xff]  ;;  %v438_v61 = vld [vmem:[#allocation4 + $0x6c0] sm:$0xff]  ;;  %v3376_v63 = vpack.c.bf16 %v441_v56, %v433_v54  ;;  %v449_v7 = vld [vmem:[#allocation4 + $0x718] sm:$0xff]  ;;  %v97_v43 = vshrl.u32 %v96_v42, 7 }
  0x70   :  { %3355 = vmatpush1.bf16.msra.mxu1 %v3354_v52  ;;  %3293 = vmatprep.subr.bf16.mxu0 %v3292_v53  ;;  %v431_v52 = vld [vmem:[#allocation4 + $0x688] sm:$0xff]  ;;  %v457_v8 = vld [vmem:[#allocation4 + $0x758] sm:$0xff]  ;;  %v3314_v9 = vpack.c.bf16 %v438_v61, %v430_v60  ;;  %v446_v13 = vld [vmem:[#allocation4 + $0x700] sm:$0xff] }
  0x71   :  { %3357 = vmatprep.subr.bf16.mxu1 %v3356_v58  ;;  %v439_v53 = vld [vmem:[#allocation4 + $0x6c8] sm:$0xff]  ;;  %v3374_v58 = vpack.c.bf16 %v424_v51, %v416_v49  ;;  %v454_v14 = vld [vmem:[#allocation4 + $0x740] sm:$0xff]  ;;  %v448_v15 = vld [vmem:[#allocation4 + $0x710] sm:$0xff]  ;;  %v3380_v16 = vpack.c.bf16 %v457_v8, %v449_v7 }
  0x72   :  { %v3312_v59 = vpack.c.bf16 %v439_v53, %v431_v52  ;;  %v465_v20 = vld [vmem:[#allocation4 + $0x798] sm:$0xff]  ;;  %v3318_v22 = vpack.c.bf16 %v454_v14, %v446_v13  ;;  %v462_v27 = vld [vmem:[#allocation4 + $0x780] sm:$0xff]  ;;  %v464_v28 = vld [vmem:[#allocation4 + $0x790] sm:$0xff]  ;;  %v4712_v52 = vsub.s32 4, %v97_v43 }
  0x73   :  { %3295 = vmatpush1.bf16.msra.mxu0 %v3294_v4  ;;  %v440_v4 = vld [vmem:[#allocation4 + $0x6d0] sm:$0xff]  ;;  %v473_v21 = vld [vmem:[#allocation4 + $0x7d8] sm:$0xff]  ;;  %v470_v3 = vld [vmem:[#allocation4 + $0x7c0] sm:$0xff] }
  0x74   :  { %3359 = vmatpush1.bf16.msra.mxu1 %v3358_v5  ;;  %3297 = vmatprep.subr.bf16.mxu0 %v3296_v6  ;;  %v447_v5 = vld [vmem:[#allocation4 + $0x708] sm:$0xff]  ;;  %v3384_v29 = vpack.c.bf16 %v473_v21, %v465_v20  ;;  %v229_v33 = vld [vmem:[#allocation4 + $0x38] sm:$0xff]  ;;  %v3322_v35 = vpack.c.bf16 %v470_v3, %v462_v27  ;;  %v163_v61 = vrot.slane %v4572_v2, %v4712_v52  ;;  %v226_v21 = vld [vmem:[#allocation4 + $0x20] sm:$0xff] }
  0x75   :  { %3361 = vmatprep.subr.bf16.mxu1 %v3360_v10  ;;  %v455_v6 = vld [vmem:[#allocation4 + $0x748] sm:$0xff]  ;;  %v3378_v10 = vpack.c.bf16 %v440_v4, %v432_v62  ;;  %v237_v34 = vld [vmem:[#allocation4 + $0x78] sm:$0xff]  ;;  %v236_v27 = vld [vmem:[#allocation4 + $0x70] sm:$0xff] }
  0x76   :  { %v3316_v12 = vpack.c.bf16 %v455_v6, %v447_v5  ;;  %v3452_v38 = vpack.c.bf16 %v237_v34, %v229_v33  ;;  %v868_v41 = vld [vmem:[#allocation6 + $0x8] sm:$0xff]  ;;  %v4724_v5 = vsub.s32 6, %v97_v43  ;;  %v4734_v34 = vld [vmem:[#allocation2 + $0x8] sm:$0xff] }
  0x77   :  { %3299 = vmatpush1.bf16.msra.mxu0 %v3298_v17  ;;  %v456_v17 = vld [vmem:[#allocation4 + $0x750] sm:$0xff]  ;;  %889 = vperm.xlu1 %4312, %v868_v41   ;;  %v259_v42 = vld [vmem:[#allocation4 + $0x128] sm:$0xff] }
  0x78   :  { %3363 = vmatpush1.bf16.msra.mxu1 %v3362_v18  ;;  %3301 = vmatprep.subr.bf16.mxu0 %v3300_v19  ;;  %v463_v18 = vld [vmem:[#allocation4 + $0x788] sm:$0xff]  ;;  %v195_v14 = vrot.slane %v4572_v2, %v4724_v5 }
  0x79   :  { %3365 = vmatprep.subr.bf16.mxu1 %v3364_v25  ;;  %v471_v19 = vld [vmem:[#allocation4 + $0x7c8] sm:$0xff]  ;;  %v3382_v25 = vpack.c.bf16 %v456_v17, %v448_v15  ;;  %873 = vperm.xlu0 %4311, %v868_v41   ;;  %v4728_v15 = vsub.s32 7, %v97_v43 }
  0x7a   :  { %v3320_v26 = vpack.c.bf16 %v471_v19, %v463_v18 }
  0x7b   :  { %3303 = vmatpush1.bf16.msra.mxu0 %v3302_v30  ;;  %v472_v30 = vld [vmem:[#allocation4 + $0x7d0] sm:$0xff]  ;;  %4313 = vset.pattern.permute.xlu1 %v4570_v0  ;;  %v211_v20 = vrot.slane %v4572_v2, %v4728_v15 }
  0x7c   :  { %3367 = vmatpush1.bf16.msra.mxu1 %v3366_v31  ;;  %3305 = vmatprep.subr.bf16.mxu0 %v3304_v32  ;;  %v227_v31 = vld [vmem:[#allocation4 + $0x28] sm:$0xff] }
  0x7d   :  { %3369 = vmatprep.subr.bf16.mxu1 %v3368_v36  ;;  %v235_v32 = vld [vmem:[#allocation4 + $0x68] sm:$0xff]  ;;  %v3386_v36 = vpack.c.bf16 %v472_v30, %v464_v28  ;;  %4314 = vset.pattern.permute.xlu0 %v4573_v23 }
  0x7e   :  { %v3388_v37 = vpack.c.bf16 %v235_v32, %v227_v31  ;;  %905 = vperm.xlu1 %4313, %v868_v41   ;;  %921 = vperm.xlu0 %4314, %v868_v41   ;;  %v251_v30 = vld [vmem:[#allocation4 + $0xe8] sm:$0xff]  ;;  %v245_v31 = vld [vmem:[#allocation4 + $0xb8] sm:$0xff] }
  0x7f   :  { %3307 = vmatpush1.bf16.msra.mxu0 %v3306_v44  ;;  %v4700_v44 = vsub.s32 0, %v97_v43  ;;  %v253_v32 = vld [vmem:[#allocation4 + $0xf8] sm:$0xff] }
  0x80   :  { %3371 = vmatpush1.bf16.msra.mxu1 %v3370_v45  ;;  %3309 = vmatprep.subr.bf16.mxu0 %v3308_v46  ;;  %v4702_v45 = vsub.s32 1, %v97_v43  ;;  %v4704_v46 = vsub.s32 2, %v97_v43 }
  0x81   :  { %3373 = vmatprep.subr.bf16.mxu1 %v3372_v50  ;;  %v99_v49 = vrot.slane %v4572_v2, %v4700_v44  ;;  %v4708_v50 = vsub.s32 3, %v97_v43 }
  0x82   :  { %4315 = vset.pattern.permute.xlu1 %v4575_v39  ;;  %4317 = vset.pattern.permute.xlu0 %v4577_v55  ;;  %v115_v51 = vrot.slane %v4572_v2, %v4702_v45  ;;  %v131_v53 = vrot.slane %v4572_v2, %v4704_v46 }
  0x83   :  { %3311 = vmatpush1.bf16.msra.mxu0 %v3310_v57  ;;  %937 = vperm.xlu1 %4315, %v868_v41   ;;  %v4716_v57 = vsub.s32 5, %v97_v43 }
  0x84   :  { %3375 = vmatpush1.bf16.msra.mxu1 %v3374_v58  ;;  %3313 = vmatprep.subr.bf16.mxu0 %v3312_v59  ;;  %v147_v59 = vrot.slane %v4572_v2, %v4708_v50 }
  0x85   :  { %3377 = vmatprep.subr.bf16.mxu1 %v3376_v63  ;;  %969 = vperm.xlu0 %4317, %v868_v41   ;;  %v179_v4 = vrot.slane %v4572_v2, %v4716_v57  ;;  %v244_v2 = vld [vmem:[#allocation4 + $0xb0] sm:$0xff] }
  0x87   :  { %3315 = vmatpush1.bf16.msra.mxu0 %v3314_v9  ;;  %4316 = vset.pattern.permute.xlu1 %v4576_v40 }
  0x88   :  { %3379 = vmatpush1.bf16.msra.mxu1 %v3378_v10  ;;  %3317 = vmatprep.subr.bf16.mxu0 %v3316_v12 }
  0x89   :  { %3381 = vmatprep.subr.bf16.mxu1 %v3380_v16  ;;  %4320 = vset.pattern.permute.xlu0 %v4574_v24 }
  0x8a   :  { %953 = vperm.xlu1 %4316, %v868_v41  }
  0x8b   :  { %3319 = vmatpush1.bf16.msra.mxu0 %v3318_v22 }
  0x8c   :  { %3383 = vmatpush1.bf16.msra.mxu1 %v3382_v25  ;;  %3321 = vmatprep.subr.bf16.mxu0 %v3320_v26  ;;  %v234_v25 = vld [vmem:[#allocation4 + $0x60] sm:$0xff]  ;;  %v228_v26 = vld [vmem:[#allocation4 + $0x30] sm:$0xff] }
  0x8d   :  { %3385 = vmatprep.subr.bf16.mxu1 %v3384_v29  ;;  %v243_v29 = vld [vmem:[#allocation4 + $0xa8] sm:$0xff] }
  0x8e   :  { %4318 = vset.pattern.permute.xlu1 %v4578_v11  ;;  %v3392_v43 = vpack.c.bf16 %v251_v30, %v243_v29  ;;  %v292_v29 = vld [vmem:[#allocation4 + $0x230] sm:$0xff] }
  0x8f   :  { %3323 = vmatpush1.bf16.msra.mxu0 %v3322_v35  ;;  %985 = vperm.xlu1 %4318, %v868_v41   ;;  %v3390_v35 = vpack.c.bf16 %v234_v25, %v226_v21  ;;  %v252_v41 = vld [vmem:[#allocation4 + $0xf0] sm:$0xff]  ;;  %v301_v21 = vld [vmem:[#allocation4 + $0x278] sm:$0xff] }
  0x90   :  { %3387 = vmatpush1.bf16.msra.mxu1 %v3386_v36  ;;  %3389 = vmatprep.subr.bf16.mxu0 %v3388_v37  ;;  %v3454_v36 = vpack.c.bf16 %v236_v27, %v228_v26  ;;  %v242_v37 = vld [vmem:[#allocation4 + $0xa0] sm:$0xff]  ;;  %v300_v30 = vld [vmem:[#allocation4 + $0x270] sm:$0xff] }
  0x91   :  { %3453 = vmatprep.subr.bf16.mxu1 %v3452_v38  ;;  %v250_v38 = vld [vmem:[#allocation4 + $0xe0] sm:$0xff] }
  0x92   :  { %v290_v26 = vld [vmem:[#allocation4 + $0x220] sm:$0xff] }
  0x93   :  { %4319 = vset.pattern.permute.xlu1 %v4571_v1  ;;  %v298_v27 = vld [vmem:[#allocation4 + $0x260] sm:$0xff] }
  0xcb   :  { %v126_v47 = vpop.permute.xlu1 %125  ;;  %v94_v48 = vpop.permute.xlu0 %93 }
  0xcc   :  { %v104_v58 = vmul.f32 %v99_v49, %v94_v48  ;;  %v136_v62 = vmul.f32 %v131_v53, %v126_v47  ;;  %v3456_v47 = vpack.c.bf16 %v253_v32, %v245_v31  ;;  %v267_v48 = vld [vmem:[#allocation4 + $0x168] sm:$0xff]  ;;  %v261_v49 = vld [vmem:[#allocation4 + $0x138] sm:$0xff]  ;;  %v3394_v53 = vpack.c.bf16 %v250_v38, %v242_v37 }
  0xcd   :  { %v307_v31 = vld [vmem:[#allocation4 + $0x2a8] sm:$0xff]  ;;  %v3406_v37 = vpack.c.bf16 %v298_v27, %v290_v26  ;;  %v3470_v38 = vpack.c.bf16 %v300_v30, %v292_v29 }
  0xce   :  { %v315_v32 = vld [vmem:[#allocation4 + $0x2e8] sm:$0xff] }
  0xd0   :  { %v142_v54 = vpop.permute.xlu1 %141  ;;  %v110_v56 = vpop.permute.xlu0 %109 }
  0xd1   :  { %v120_v60 = vmul.f32 %v115_v51, %v110_v56  ;;  %v152_v6 = vmul.f32 %v147_v59, %v142_v54  ;;  %v269_v51 = vld [vmem:[#allocation4 + $0x178] sm:$0xff]  ;;  %v3458_v54 = vpack.c.bf16 %v252_v41, %v244_v2  ;;  %v258_v56 = vld [vmem:[#allocation4 + $0x120] sm:$0xff]  ;;  %v3396_v59 = vpack.c.bf16 %v267_v48, %v259_v42  ;;  %v316_v48 = vld [vmem:[#allocation4 + $0x2f0] sm:$0xff] }
  0xd2   :  { %v306_v2 = vld [vmem:[#allocation4 + $0x2a0] sm:$0xff]  ;;  %v3408_v42 = vpack.c.bf16 %v315_v32, %v307_v31  ;;  %v356_v31 = vld [vmem:[#allocation4 + $0x430] sm:$0xff] }
  0xd3   :  { %v122_v63 = vadd.f32 %v120_v60, %v104_v58  ;;  %v266_v58 = vld [vmem:[#allocation4 + $0x160] sm:$0xff]  ;;  %v3460_v60 = vpack.c.bf16 %v269_v51, %v261_v49  ;;  %v323_v49 = vld [vmem:[#allocation4 + $0x328] sm:$0xff]  ;;  %v364_v32 = vld [vmem:[#allocation4 + $0x470] sm:$0xff] }
  0xd4   :  { %v314_v41 = vld [vmem:[#allocation4 + $0x2e0] sm:$0xff]  ;;  %v331_v51 = vld [vmem:[#allocation4 + $0x368] sm:$0xff] }
  0xd5   :  { %v138_v7 = vadd.f32 %v136_v62, %v122_v63  ;;  %v158_v8 = vpop.permute.xlu1 %157  ;;  %v174_v9 = vpop.permute.xlu0 %173  ;;  %v268_v62 = vld [vmem:[#allocation4 + $0x170] sm:$0xff]  ;;  %v275_v63 = vld [vmem:[#allocation4 + $0x1a8] sm:$0xff] }
  0xd6   :  { %v168_v10 = vmul.f32 %v163_v61, %v158_v8  ;;  %v184_v13 = vmul.f32 %v179_v4, %v174_v9  ;;  %v260_v61 = vld [vmem:[#allocation4 + $0x130] sm:$0xff]  ;;  %v283_v4 = vld [vmem:[#allocation4 + $0x1e8] sm:$0xff]  ;;  %v3398_v8 = vpack.c.bf16 %v266_v58, %v258_v56  ;;  %v3410_v56 = vpack.c.bf16 %v314_v41, %v306_v2 }
  0xd7   :  { %v154_v12 = vadd.f32 %v152_v6, %v138_v7  ;;  %v277_v6 = vld [vmem:[#allocation4 + $0x1b8] sm:$0xff]  ;;  %v3462_v9 = vpack.c.bf16 %v268_v62, %v260_v61  ;;  %v3412_v61 = vpack.c.bf16 %v331_v51, %v323_v49  ;;  %v3486_v41 = vpack.c.bf16 %v364_v32, %v356_v31  ;;  %v372_v49 = vld [vmem:[#allocation4 + $0x4b0] sm:$0xff] }
  0xd8   :  { %v285_v7 = vld [vmem:[#allocation4 + $0x1f8] sm:$0xff]  ;;  %v380_v51 = vld [vmem:[#allocation4 + $0x4f0] sm:$0xff] }
  0xd9   :  { %v170_v16 = vadd.f32 %v168_v10, %v154_v12  ;;  %v274_v10 = vld [vmem:[#allocation4 + $0x1a0] sm:$0xff] }
  0xda   :  { %v190_v17 = vpop.permute.xlu1 %189  ;;  %v282_v12 = vld [vmem:[#allocation4 + $0x1e0] sm:$0xff] }
  0xdb   :  { %v186_v18 = vadd.f32 %v184_v13, %v170_v16  ;;  %v200_v19 = vmul.f32 %v195_v14, %v190_v17  ;;  %v3400_v13 = vpack.c.bf16 %v283_v4, %v275_v63  ;;  %v3464_v14 = vpack.c.bf16 %v285_v7, %v277_v6  ;;  %v276_v16 = vld [vmem:[#allocation4 + $0x1b0] sm:$0xff]  ;;  %v339_v6 = vld [vmem:[#allocation4 + $0x3a8] sm:$0xff] }
  0xdc   :  { %v284_v17 = vld [vmem:[#allocation4 + $0x1f0] sm:$0xff]  ;;  %v347_v7 = vld [vmem:[#allocation4 + $0x3e8] sm:$0xff] }
  0xdd   :  { %v202_v3 = vadd.f32 %v200_v19, %v186_v18  ;;  %v291_v18 = vld [vmem:[#allocation4 + $0x228] sm:$0xff]  ;;  %v3466_v25 = vpack.c.bf16 %v284_v17, %v276_v16  ;;  %v324_v63 = vld [vmem:[#allocation4 + $0x330] sm:$0xff]  ;;  %v3416_v16 = vpack.c.bf16 %v347_v7, %v339_v6 }
  0xde   :  { %v299_v19 = vld [vmem:[#allocation4 + $0x268] sm:$0xff]  ;;  %v332_v4 = vld [vmem:[#allocation4 + $0x370] sm:$0xff] }
  0xdf   :  { %v206_v22 = vpop.permute.xlu1 %205  ;;  %v388_v6 = vld [vmem:[#allocation4 + $0x530] sm:$0xff] }
  0xe0   :  { %v216_v28 = vmul.f32 %v211_v20, %v206_v22  ;;  %v293_v20 = vld [vmem:[#allocation4 + $0x238] sm:$0xff]  ;;  %v3402_v22 = vpack.c.bf16 %v282_v12, %v274_v10  ;;  %v3478_v12 = vpack.c.bf16 %v332_v4, %v324_v63  ;;  %v396_v7 = vld [vmem:[#allocation4 + $0x570] sm:$0xff] }
  0xe2   :  { %v4732_v33 = vadd.f32 %v216_v28, %v202_v3  ;;  %v3404_v3 = vpack.c.bf16 %v299_v19, %v291_v18  ;;  %v3468_v28 = vpack.c.bf16 %v301_v21, %v293_v20  ;;  %v340_v18 = vld [vmem:[#allocation4 + $0x3b0] sm:$0xff]  ;;  %v355_v20 = vld [vmem:[#allocation4 + $0x428] sm:$0xff] }
  0xe3   :  { %v348_v19 = vld [vmem:[#allocation4 + $0x3f0] sm:$0xff]  ;;  %v363_v21 = vld [vmem:[#allocation4 + $0x468] sm:$0xff] }
  0xe4   :  { %584 = vmatprep.mubr.f32.mxu0 %v4732_v33  ;;  %655 = vmatprep.mubr.f32.mxu1 %v4732_v33  ;;  %v3482_v27 = vpack.c.bf16 %v348_v19, %v340_v18  ;;  %v3420_v29 = vpack.c.bf16 %v363_v21, %v355_v20  ;;  %v404_v20 = vld [vmem:[#allocation4 + $0x5b0] sm:$0xff] }
  0xe5   :  { %585 = vmatmul.mubr.f32.vlgmr.msra.gmra.mrb[0].mxu0 %v4734_v34  ;;  %656 = vmatmul.mubr.f32.vlgmr.msra.gmra.mrb[0].mxu1 %v4734_v34  ;;  %v412_v21 = vld [vmem:[#allocation4 + $0x5f0] sm:$0xff] }
  0xe6   :  { %3391 = vmatpush1.bf16.msra.mxu0 %v3390_v35  ;;  %3455 = vmatpush1.bf16.msra.mxu1 %v3454_v36  ;;  %v309_v35 = vld [vmem:[#allocation4 + $0x2b8] sm:$0xff] }
  0xe7   :  { %726 = vmatprep.mubr.f32.mxu0 %v4732_v33  ;;  %797 = vmatprep.mubr.f32.mxu1 %v4732_v33  ;;  %v317_v36 = vld [vmem:[#allocation4 + $0x2f8] sm:$0xff] }
  0xe8   :  { %3393 = vmatprep.subr.bf16.mxu0 %v3392_v43  ;;  %3457 = vmatprep.subr.bf16.mxu1 %v3456_v47  ;;  %v3472_v43 = vpack.c.bf16 %v317_v36, %v309_v35  ;;  %v308_v47 = vld [vmem:[#allocation4 + $0x2b0] sm:$0xff]  ;;  %v371_v35 = vld [vmem:[#allocation4 + $0x4a8] sm:$0xff] }
  0xe9   :  { %v3474_v58 = vpack.c.bf16 %v316_v48, %v308_v47  ;;  %v379_v36 = vld [vmem:[#allocation4 + $0x4e8] sm:$0xff] }
  0xea   :  { %3395 = vmatpush1.bf16.msra.mxu0 %v3394_v53  ;;  %3459 = vmatpush1.bf16.msra.mxu1 %v3458_v54  ;;  %v325_v53 = vld [vmem:[#allocation4 + $0x338] sm:$0xff]  ;;  %v3424_v47 = vpack.c.bf16 %v379_v36, %v371_v35  ;;  %v420_v35 = vld [vmem:[#allocation4 + $0x630] sm:$0xff] }
  0xeb   :  { %3397 = vmatprep.subr.bf16.mxu0 %v3396_v59  ;;  %3461 = vmatprep.subr.bf16.mxu1 %v3460_v60  ;;  %v333_v54 = vld [vmem:[#allocation4 + $0x378] sm:$0xff]  ;;  %v322_v59 = vld [vmem:[#allocation4 + $0x320] sm:$0xff]  ;;  %v428_v36 = vld [vmem:[#allocation4 + $0x670] sm:$0xff] }
  0xec   :  { %v330_v60 = vld [vmem:[#allocation4 + $0x360] sm:$0xff]  ;;  %v3476_v62 = vpack.c.bf16 %v333_v54, %v325_v53  ;;  %v387_v53 = vld [vmem:[#allocation4 + $0x528] sm:$0xff] }
  0xed   :  { %v3414_v10 = vpack.c.bf16 %v330_v60, %v322_v59  ;;  %v395_v54 = vld [vmem:[#allocation4 + $0x568] sm:$0xff]  ;;  %v3490_v60 = vpack.c.bf16 %v380_v51, %v372_v49 }
  0xee   :  { %3399 = vmatpush1.bf16.msra.mxu0 %v3398_v8  ;;  %3463 = vmatpush1.bf16.msra.mxu1 %v3462_v9  ;;  %v341_v8 = vld [vmem:[#allocation4 + $0x3b8] sm:$0xff]  ;;  %v3428_v63 = vpack.c.bf16 %v395_v54, %v387_v53  ;;  %v436_v53 = vld [vmem:[#allocation4 + $0x6b0] sm:$0xff] }
  0xef   :  { %3401 = vmatprep.subr.bf16.mxu0 %v3400_v13  ;;  %3465 = vmatprep.subr.bf16.mxu1 %v3464_v14  ;;  %v349_v9 = vld [vmem:[#allocation4 + $0x3f8] sm:$0xff]  ;;  %v338_v13 = vld [vmem:[#allocation4 + $0x3a0] sm:$0xff]  ;;  %v444_v54 = vld [vmem:[#allocation4 + $0x6f0] sm:$0xff] }
  0xf0   :  { %v346_v14 = vld [vmem:[#allocation4 + $0x3e0] sm:$0xff]  ;;  %v3480_v17 = vpack.c.bf16 %v349_v9, %v341_v8  ;;  %v403_v8 = vld [vmem:[#allocation4 + $0x5a8] sm:$0xff] }
  0xf1   :  { %v3418_v26 = vpack.c.bf16 %v346_v14, %v338_v13  ;;  %v411_v9 = vld [vmem:[#allocation4 + $0x5e8] sm:$0xff]  ;;  %v3494_v14 = vpack.c.bf16 %v396_v7, %v388_v6 }
  0xf2   :  { %3403 = vmatpush1.bf16.msra.mxu0 %v3402_v22  ;;  %3467 = vmatpush1.bf16.msra.mxu1 %v3466_v25  ;;  %v357_v22 = vld [vmem:[#allocation4 + $0x438] sm:$0xff]  ;;  %v3432_v18 = vpack.c.bf16 %v411_v9, %v403_v8  ;;  %v452_v8 = vld [vmem:[#allocation4 + $0x730] sm:$0xff] }
  0xf3   :  { %3405 = vmatprep.subr.bf16.mxu0 %v3404_v3  ;;  %3469 = vmatprep.subr.bf16.mxu1 %v3468_v28  ;;  %v365_v25 = vld [vmem:[#allocation4 + $0x478] sm:$0xff]  ;;  %v354_v3 = vld [vmem:[#allocation4 + $0x420] sm:$0xff]  ;;  %v460_v9 = vld [vmem:[#allocation4 + $0x770] sm:$0xff] }
  0xf4   :  { %v362_v28 = vld [vmem:[#allocation4 + $0x460] sm:$0xff]  ;;  %v3484_v30 = vpack.c.bf16 %v365_v25, %v357_v22  ;;  %v419_v22 = vld [vmem:[#allocation4 + $0x628] sm:$0xff] }
  0xf5   :  { %v3422_v2 = vpack.c.bf16 %v362_v28, %v354_v3  ;;  %v427_v25 = vld [vmem:[#allocation4 + $0x668] sm:$0xff]  ;;  %v3498_v28 = vpack.c.bf16 %v412_v21, %v404_v20  ;;  %v474_v21 = vld [vmem:[#allocation4 + $0x7e0] sm:$0xff] }
  0xf6   :  { %3407 = vmatpush1.bf16.msra.mxu0 %v3406_v37  ;;  %3471 = vmatpush1.bf16.msra.mxu1 %v3470_v38  ;;  %v373_v37 = vld [vmem:[#allocation4 + $0x4b8] sm:$0xff]  ;;  %v3436_v31 = vpack.c.bf16 %v427_v25, %v419_v22  ;;  %v468_v22 = vld [vmem:[#allocation4 + $0x7b0] sm:$0xff] }
  0xf7   :  { %3409 = vmatprep.subr.bf16.mxu0 %v3408_v42  ;;  %3473 = vmatprep.subr.bf16.mxu1 %v3472_v43  ;;  %v381_v38 = vld [vmem:[#allocation4 + $0x4f8] sm:$0xff]  ;;  %v370_v42 = vld [vmem:[#allocation4 + $0x4a0] sm:$0xff]  ;;  %v476_v25 = vld [vmem:[#allocation4 + $0x7f0] sm:$0xff] }
  0xf8   :  { %v378_v43 = vld [vmem:[#allocation4 + $0x4e0] sm:$0xff]  ;;  %v3488_v48 = vpack.c.bf16 %v381_v38, %v373_v37  ;;  %v435_v37 = vld [vmem:[#allocation4 + $0x6a8] sm:$0xff] }
  0xf9   :  { %v3426_v59 = vpack.c.bf16 %v378_v43, %v370_v42  ;;  %v443_v38 = vld [vmem:[#allocation4 + $0x6e8] sm:$0xff]  ;;  %v3502_v43 = vpack.c.bf16 %v428_v36, %v420_v35  ;;  %v1010_v35 = vld [vmem:[#allocation4 + $0x40] sm:$0xff] }
  0xfa   :  { %3411 = vmatpush1.bf16.msra.mxu0 %v3410_v56  ;;  %3475 = vmatpush1.bf16.msra.mxu1 %v3474_v58  ;;  %v389_v56 = vld [vmem:[#allocation4 + $0x538] sm:$0xff]  ;;  %v3440_v49 = vpack.c.bf16 %v443_v38, %v435_v37  ;;  %v1004_v38 = vld [vmem:[#allocation4 + $0x10] sm:$0xff] }
  0xfb   :  { %3413 = vmatprep.subr.bf16.mxu0 %v3412_v61  ;;  %3477 = vmatprep.subr.bf16.mxu1 %v3476_v62  ;;  %v397_v58 = vld [vmem:[#allocation4 + $0x578] sm:$0xff]  ;;  %v386_v61 = vld [vmem:[#allocation4 + $0x520] sm:$0xff] }
  0xfc   :  { %v394_v62 = vld [vmem:[#allocation4 + $0x560] sm:$0xff]  ;;  %v3492_v4 = vpack.c.bf16 %v397_v58, %v389_v56  ;;  %v451_v56 = vld [vmem:[#allocation4 + $0x728] sm:$0xff] }
  0xfd   :  { %v3430_v13 = vpack.c.bf16 %v394_v62, %v386_v61  ;;  %v459_v58 = vld [vmem:[#allocation4 + $0x768] sm:$0xff]  ;;  %v3506_v62 = vpack.c.bf16 %v444_v54, %v436_v53 }
  0xfe   :  { %3415 = vmatpush1.bf16.msra.mxu0 %v3414_v10  ;;  %3479 = vmatpush1.bf16.msra.mxu1 %v3478_v12  ;;  %v405_v10 = vld [vmem:[#allocation4 + $0x5b8] sm:$0xff]  ;;  %v3444_v6 = vpack.c.bf16 %v459_v58, %v451_v56  ;;  %v1020_v56 = vld [vmem:[#allocation4 + $0x90] sm:$0xff] }
  0xff   :  { %3417 = vmatprep.subr.bf16.mxu0 %v3416_v16  ;;  %3481 = vmatprep.subr.bf16.mxu1 %v3480_v17  ;;  %v413_v12 = vld [vmem:[#allocation4 + $0x5f8] sm:$0xff]  ;;  %v402_v16 = vld [vmem:[#allocation4 + $0x5a0] sm:$0xff]  ;;  %v1028_v58 = vld [vmem:[#allocation4 + $0xd0] sm:$0xff] }
 0x100   :  { %v410_v17 = vld [vmem:[#allocation4 + $0x5e0] sm:$0xff]  ;;  %v3496_v19 = vpack.c.bf16 %v413_v12, %v405_v10  ;;  %v467_v10 = vld [vmem:[#allocation4 + $0x7a8] sm:$0xff] }
 0x101   :  { %v3434_v3 = vpack.c.bf16 %v410_v17, %v402_v16  ;;  %v475_v12 = vld [vmem:[#allocation4 + $0x7e8] sm:$0xff]  ;;  %v3510_v17 = vpack.c.bf16 %v460_v9, %v452_v8 }
 0x102   :  { %3419 = vmatpush1.bf16.msra.mxu0 %v3418_v26  ;;  %3483 = vmatpush1.bf16.msra.mxu1 %v3482_v27  ;;  %v421_v26 = vld [vmem:[#allocation4 + $0x638] sm:$0xff] }
 0x103   :  { %3421 = vmatprep.subr.bf16.mxu0 %v3420_v29  ;;  %3485 = vmatprep.subr.bf16.mxu1 %v3484_v30  ;;  %v429_v27 = vld [vmem:[#allocation4 + $0x678] sm:$0xff]  ;;  %v418_v29 = vld [vmem:[#allocation4 + $0x620] sm:$0xff] }
 0x104   :  { %v426_v30 = vld [vmem:[#allocation4 + $0x660] sm:$0xff]  ;;  %v3500_v32 = vpack.c.bf16 %v429_v27, %v421_v26  ;;  %v3514_v27 = vpack.c.bf16 %v476_v25, %v468_v22 }
 0x105   :  { %v3438_v42 = vpack.c.bf16 %v426_v30, %v418_v29  ;;  %v1005_v29 = vld [vmem:[#allocation4 + $0x18] sm:$0xff] }
 0x106   :  { %3423 = vmatpush1.bf16.msra.mxu0 %v3422_v2  ;;  %3487 = vmatpush1.bf16.msra.mxu1 %v3486_v41  ;;  %v437_v2 = vld [vmem:[#allocation4 + $0x6b8] sm:$0xff] }
 0x107   :  { %3425 = vmatprep.subr.bf16.mxu0 %v3424_v47  ;;  %3489 = vmatprep.subr.bf16.mxu1 %v3488_v48  ;;  %v445_v41 = vld [vmem:[#allocation4 + $0x6f8] sm:$0xff]  ;;  %v434_v47 = vld [vmem:[#allocation4 + $0x6a0] sm:$0xff] }
 0x108   :  { %v442_v48 = vld [vmem:[#allocation4 + $0x6e0] sm:$0xff]  ;;  %v3504_v51 = vpack.c.bf16 %v445_v41, %v437_v2  ;;  %v1012_v2 = vld [vmem:[#allocation4 + $0x50] sm:$0xff] }
 0x109   :  { %v3442_v61 = vpack.c.bf16 %v442_v48, %v434_v47  ;;  %v3582_v41 = vpack.c.bf16 %v1012_v2, %v1004_v38  ;;  %v1021_v47 = vld [vmem:[#allocation4 + $0x98] sm:$0xff]  ;;  %v1068_v2 = vld [vmem:[#allocation4 + $0x210] sm:$0xff] }
 0x10a   :  { %3427 = vmatpush1.bf16.msra.mxu0 %v3426_v59  ;;  %3491 = vmatpush1.bf16.msra.mxu1 %v3490_v60  ;;  %v453_v59 = vld [vmem:[#allocation4 + $0x738] sm:$0xff] }
 0x10b   :  { %3429 = vmatprep.subr.bf16.mxu0 %v3428_v63  ;;  %3493 = vmatprep.subr.bf16.mxu1 %v3492_v4  ;;  %v461_v60 = vld [vmem:[#allocation4 + $0x778] sm:$0xff]  ;;  %v450_v63 = vld [vmem:[#allocation4 + $0x720] sm:$0xff] }
 0x10c   :  { %v458_v4 = vld [vmem:[#allocation4 + $0x760] sm:$0xff]  ;;  %v3508_v7 = vpack.c.bf16 %v461_v60, %v453_v59  ;;  %v1029_v48 = vld [vmem:[#allocation4 + $0xd8] sm:$0xff]  ;;  %v3586_v59 = vpack.c.bf16 %v1028_v58, %v1020_v56  ;;  %v1035_v60 = vld [vmem:[#allocation4 + $0x108] sm:$0xff] }
 0x10d   :  { %v3446_v16 = vpack.c.bf16 %v458_v4, %v450_v63  ;;  %v3584_v53 = vpack.c.bf16 %v1029_v48, %v1021_v47  ;;  %v1045_v4 = vld [vmem:[#allocation4 + $0x158] sm:$0xff]  ;;  %v1091_v47 = vld [vmem:[#allocation4 + $0x2c8] sm:$0xff]  ;;  %v1084_v58 = vld [vmem:[#allocation4 + $0x290] sm:$0xff] }
 0x10e   :  { %3431 = vmatpush1.bf16.msra.mxu0 %v3430_v13  ;;  %3495 = vmatpush1.bf16.msra.mxu1 %v3494_v14  ;;  %v469_v13 = vld [vmem:[#allocation4 + $0x7b8] sm:$0xff] }
 0x10f   :  { %3433 = vmatprep.subr.bf16.mxu0 %v3432_v18  ;;  %3497 = vmatprep.subr.bf16.mxu1 %v3496_v19  ;;  %v477_v14 = vld [vmem:[#allocation4 + $0x7f8] sm:$0xff]  ;;  %v466_v18 = vld [vmem:[#allocation4 + $0x7a0] sm:$0xff]  ;;  %v3448_v19 = vpack.c.bf16 %v475_v12, %v467_v10  ;;  %v1036_v10 = vld [vmem:[#allocation4 + $0x110] sm:$0xff] }
 0x110   :  { %v3512_v20 = vpack.c.bf16 %v477_v14, %v469_v13  ;;  %v3450_v26 = vpack.c.bf16 %v474_v21, %v466_v18  ;;  %v1044_v12 = vld [vmem:[#allocation4 + $0x150] sm:$0xff]  ;;  %v1051_v14 = vld [vmem:[#allocation4 + $0x188] sm:$0xff]  ;;  %v1058_v21 = vld [vmem:[#allocation4 + $0x1c0] sm:$0xff] }
 0x111   :  { %v3590_v13 = vpack.c.bf16 %v1044_v12, %v1036_v10  ;;  %v1100_v12 = vld [vmem:[#allocation4 + $0x310] sm:$0xff] }
 0x112   :  { %3435 = vmatpush1.bf16.msra.mxu0 %v3434_v3  ;;  %3499 = vmatpush1.bf16.msra.mxu1 %v3498_v28  ;;  %v1003_v3 = vld [vmem:[#allocation4 + $0x8] sm:$0xff] }
 0x113   :  { %3437 = vmatprep.subr.bf16.mxu0 %v3436_v31  ;;  %3501 = vmatprep.subr.bf16.mxu1 %v3500_v32  ;;  %v1011_v28 = vld [vmem:[#allocation4 + $0x48] sm:$0xff]  ;;  %v1013_v31 = vld [vmem:[#allocation4 + $0x58] sm:$0xff]  ;;  %v1002_v32 = vld [vmem:[#allocation4] sm:$0xff] }
 0x114   :  { %v3516_v30 = vpack.c.bf16 %v1011_v28, %v1003_v3  ;;  %v3580_v36 = vpack.c.bf16 %v1013_v31, %v1005_v29  ;;  %v3518_v37 = vpack.c.bf16 %v1010_v35, %v1002_v32  ;;  %v1067_v28 = vld [vmem:[#allocation4 + $0x208] sm:$0xff]  ;;  %v1077_v32 = vld [vmem:[#allocation4 + $0x258] sm:$0xff]  ;;  %v1066_v35 = vld [vmem:[#allocation4 + $0x200] sm:$0xff] }
 0x115   :  { %v1075_v29 = vld [vmem:[#allocation4 + $0x248] sm:$0xff] }
 0x116   :  { %3439 = vmatpush1.bf16.msra.mxu0 %v3438_v42  ;;  %3503 = vmatpush1.bf16.msra.mxu1 %v3502_v43  ;;  %v1019_v42 = vld [vmem:[#allocation4 + $0x88] sm:$0xff]  ;;  %v3532_v31 = vpack.c.bf16 %v1075_v29, %v1067_v28 }
 0x117   :  { %3441 = vmatprep.subr.bf16.mxu0 %v3440_v49  ;;  %3505 = vmatprep.subr.bf16.mxu1 %v3504_v51  ;;  %v1027_v43 = vld [vmem:[#allocation4 + $0xc8] sm:$0xff]  ;;  %v1018_v49 = vld [vmem:[#allocation4 + $0x80] sm:$0xff] }
 0x118   :  { %v1026_v51 = vld [vmem:[#allocation4 + $0xc0] sm:$0xff]  ;;  %v1131_v29 = vld [vmem:[#allocation4 + $0x408] sm:$0xff] }
 0x119   :  { %v3522_v54 = vpack.c.bf16 %v1026_v51, %v1018_v49  ;;  %v1093_v49 = vld [vmem:[#allocation4 + $0x2d8] sm:$0xff]  ;;  %v1082_v51 = vld [vmem:[#allocation4 + $0x280] sm:$0xff] }
 0x11a   :  { %3443 = vmatpush1.bf16.msra.mxu0 %v3442_v61  ;;  %3507 = vmatpush1.bf16.msra.mxu1 %v3506_v62  ;;  %v1043_v61 = vld [vmem:[#allocation4 + $0x148] sm:$0xff]  ;;  %v1037_v62 = vld [vmem:[#allocation4 + $0x118] sm:$0xff] }
 0x11b   :  { %3445 = vmatprep.subr.bf16.mxu0 %v3444_v6  ;;  %3509 = vmatprep.subr.bf16.mxu1 %v3508_v7  ;;  %v3524_v63 = vpack.c.bf16 %v1043_v61, %v1035_v60  ;;  %v1034_v6 = vld [vmem:[#allocation4 + $0x100] sm:$0xff]  ;;  %v3588_v8 = vpack.c.bf16 %v1045_v4, %v1037_v62  ;;  %v1099_v61 = vld [vmem:[#allocation4 + $0x308] sm:$0xff] }
 0x11c   :  { %v1042_v7 = vld [vmem:[#allocation4 + $0x140] sm:$0xff]  ;;  %v1107_v62 = vld [vmem:[#allocation4 + $0x348] sm:$0xff] }
 0x11d   :  { %v3526_v9 = vpack.c.bf16 %v1042_v7, %v1034_v6  ;;  %v3540_v4 = vpack.c.bf16 %v1107_v62, %v1099_v61  ;;  %v1109_v6 = vld [vmem:[#allocation4 + $0x358] sm:$0xff]  ;;  %v1098_v7 = vld [vmem:[#allocation4 + $0x300] sm:$0xff]  ;;  %v1163_v62 = vld [vmem:[#allocation4 + $0x508] sm:$0xff] }
 0x11e   :  { %3447 = vmatpush1.bf16.msra.mxu0 %v3446_v16  ;;  %3511 = vmatpush1.bf16.msra.mxu1 %v3510_v17  ;;  %v1059_v16 = vld [vmem:[#allocation4 + $0x1c8] sm:$0xff]  ;;  %v1053_v17 = vld [vmem:[#allocation4 + $0x198] sm:$0xff] }
 0x11f   :  { %3449 = vmatprep.subr.bf16.mxu0 %v3448_v19  ;;  %3513 = vmatprep.subr.bf16.mxu1 %v3512_v20  ;;  %v3528_v18 = vpack.c.bf16 %v1059_v16, %v1051_v14  ;;  %v1061_v19 = vld [vmem:[#allocation4 + $0x1d8] sm:$0xff]  ;;  %v1050_v20 = vld [vmem:[#allocation4 + $0x180] sm:$0xff]  ;;  %v1115_v16 = vld [vmem:[#allocation4 + $0x388] sm:$0xff] }
 0x120   :  { %v3592_v22 = vpack.c.bf16 %v1061_v19, %v1053_v17  ;;  %v3530_v25 = vpack.c.bf16 %v1058_v21, %v1050_v20  ;;  %v1123_v17 = vld [vmem:[#allocation4 + $0x3c8] sm:$0xff]  ;;  %v1125_v20 = vld [vmem:[#allocation4 + $0x3d8] sm:$0xff]  ;;  %v1114_v21 = vld [vmem:[#allocation4 + $0x380] sm:$0xff] }
 0x121   :  { %v3544_v19 = vpack.c.bf16 %v1123_v17, %v1115_v16  ;;  %v1179_v17 = vld [vmem:[#allocation4 + $0x588] sm:$0xff] }
 0x122   :  { %3451 = vmatpush1.bf16.msra.mxu0 %v3450_v26  ;;  %3515 = vmatpush1.bf16.msra.mxu1 %v3514_v27  ;;  %v1052_v26 = vld [vmem:[#allocation4 + $0x190] sm:$0xff] }
 0x123   :  { %3517 = vmatprep.subr.bf16.mxu0 %v3516_v30  ;;  %3581 = vmatprep.subr.bf16.mxu1 %v3580_v36  ;;  %v1060_v27 = vld [vmem:[#allocation4 + $0x1d0] sm:$0xff]  ;;  %v1069_v30 = vld [vmem:[#allocation4 + $0x218] sm:$0xff]  ;;  %v1074_v36 = vld [vmem:[#allocation4 + $0x240] sm:$0xff] }
 0x124   :  { %v3594_v3 = vpack.c.bf16 %v1060_v27, %v1052_v26  ;;  %v3534_v38 = vpack.c.bf16 %v1074_v36, %v1066_v35  ;;  %v1116_v27 = vld [vmem:[#allocation4 + $0x390] sm:$0xff]  ;;  %v1141_v35 = vld [vmem:[#allocation4 + $0x458] sm:$0xff]  ;;  %v1130_v36 = vld [vmem:[#allocation4 + $0x400] sm:$0xff] }
 0x125   :  { %727 = vmatmul.mubr.f32.vlgmr.msra.gmra.mrb[2].mxu0 %v4734_v34  ;;  %798 = vmatmul.mubr.f32.vlgmr.msra.gmra.mrb[2].mxu1 %v4734_v34  ;;  %v3520_v34 = vpack.c.bf16 %v1027_v43, %v1019_v42  ;;  %v1083_v43 = vld [vmem:[#allocation4 + $0x288] sm:$0xff] }
 0x126   :  { %3519 = vmatpush1.bf16.msra.mxu0 %v3518_v37  ;;  %3583 = vmatpush1.bf16.msra.mxu1 %v3582_v41  ;;  %v3596_v37 = vpack.c.bf16 %v1077_v32, %v1069_v30  ;;  %v1076_v41 = vld [vmem:[#allocation4 + $0x250] sm:$0xff]  ;;  %v3536_v48 = vpack.c.bf16 %v1091_v47, %v1083_v43  ;;  %v1139_v30 = vld [vmem:[#allocation4 + $0x448] sm:$0xff] }
 0x127   :  { %3521 = vmatprep.subr.bf16.mxu0 %v3520_v34  ;;  %3585 = vmatprep.subr.bf16.mxu1 %v3584_v53  ;;  %v3598_v42 = vpack.c.bf16 %v1076_v41, %v1068_v2  ;;  %v1085_v34 = vld [vmem:[#allocation4 + $0x298] sm:$0xff]  ;;  %v1090_v53 = vld [vmem:[#allocation4 + $0x2c0] sm:$0xff]  ;;  %v3548_v32 = vpack.c.bf16 %v1139_v30, %v1131_v29  ;;  %v1132_v41 = vld [vmem:[#allocation4 + $0x410] sm:$0xff] }
 0x128   :  { %v3538_v56 = vpack.c.bf16 %v1090_v53, %v1082_v51  ;;  %v1147_v47 = vld [vmem:[#allocation4 + $0x488] sm:$0xff]  ;;  %v1157_v51 = vld [vmem:[#allocation4 + $0x4d8] sm:$0xff]  ;;  %v1146_v53 = vld [vmem:[#allocation4 + $0x480] sm:$0xff] }
 0x129   :  { %v1195_v30 = vld [vmem:[#allocation4 + $0x608] sm:$0xff] }
 0x12a   :  { %3523 = vmatpush1.bf16.msra.mxu0 %v3522_v54  ;;  %3587 = vmatpush1.bf16.msra.mxu1 %v3586_v59  ;;  %v3600_v54 = vpack.c.bf16 %v1093_v49, %v1085_v34  ;;  %v1092_v59 = vld [vmem:[#allocation4 + $0x2d0] sm:$0xff]  ;;  %v1155_v34 = vld [vmem:[#allocation4 + $0x4c8] sm:$0xff] }
 0x12b   :  { %3525 = vmatprep.subr.bf16.mxu0 %v3524_v63  ;;  %3589 = vmatprep.subr.bf16.mxu1 %v3588_v8  ;;  %v3602_v60 = vpack.c.bf16 %v1092_v59, %v1084_v58  ;;  %v1101_v63 = vld [vmem:[#allocation4 + $0x318] sm:$0xff]  ;;  %v1106_v8 = vld [vmem:[#allocation4 + $0x340] sm:$0xff]  ;;  %v3552_v49 = vpack.c.bf16 %v1155_v34, %v1147_v47  ;;  %v1148_v59 = vld [vmem:[#allocation4 + $0x490] sm:$0xff] }
 0x12c   :  { %v3542_v10 = vpack.c.bf16 %v1106_v8, %v1098_v7  ;;  %v1173_v7 = vld [vmem:[#allocation4 + $0x558] sm:$0xff]  ;;  %v1162_v8 = vld [vmem:[#allocation4 + $0x500] sm:$0xff] }
 0x12d   :  { %v4747_v47 = vld [vmem:[%s5045_s2] sm:$0xff] }
 0x12e   :  { %3527 = vmatpush1.bf16.msra.mxu0 %v3526_v9  ;;  %3591 = vmatpush1.bf16.msra.mxu1 %v3590_v13  ;;  %v3604_v9 = vpack.c.bf16 %v1109_v6, %v1101_v63  ;;  %v1108_v13 = vld [vmem:[#allocation4 + $0x350] sm:$0xff]  ;;  %v1171_v63 = vld [vmem:[#allocation4 + $0x548] sm:$0xff] }
 0x12f   :  { %3529 = vmatprep.subr.bf16.mxu0 %v3528_v18  ;;  %3593 = vmatprep.subr.bf16.mxu1 %v3592_v22  ;;  %v3606_v14 = vpack.c.bf16 %v1108_v13, %v1100_v12  ;;  %v1117_v18 = vld [vmem:[#allocation4 + $0x398] sm:$0xff]  ;;  %v1122_v22 = vld [vmem:[#allocation4 + $0x3c0] sm:$0xff]  ;;  %v3556_v6 = vpack.c.bf16 %v1171_v63, %v1163_v62  ;;  %v1164_v13 = vld [vmem:[#allocation4 + $0x510] sm:$0xff]  ;;  %v483_v63 = vrot.slane %v4747_v47, %v4700_v44 }
 0x130   :  { %v3546_v26 = vpack.c.bf16 %v1122_v22, %v1114_v21  ;;  %v1189_v21 = vld [vmem:[#allocation4 + $0x5d8] sm:$0xff]  ;;  %v1178_v22 = vld [vmem:[#allocation4 + $0x580] sm:$0xff]  ;;  %v1220_v62 = vld [vmem:[#allocation4 + $0x6d0] sm:$0xff] }
 0x132   :  { %3531 = vmatpush1.bf16.msra.mxu0 %v3530_v25  ;;  %3595 = vmatpush1.bf16.msra.mxu1 %v3594_v3  ;;  %v3608_v25 = vpack.c.bf16 %v1125_v20, %v1117_v18  ;;  %v1124_v3 = vld [vmem:[#allocation4 + $0x3d0] sm:$0xff]  ;;  %v1187_v18 = vld [vmem:[#allocation4 + $0x5c8] sm:$0xff] }
 0x133   :  { %3533 = vmatprep.subr.bf16.mxu0 %v3532_v31  ;;  %3597 = vmatprep.subr.bf16.mxu1 %v3596_v37  ;;  %v3610_v28 = vpack.c.bf16 %v1124_v3, %v1116_v27  ;;  %v1133_v31 = vld [vmem:[#allocation4 + $0x418] sm:$0xff]  ;;  %v1138_v37 = vld [vmem:[#allocation4 + $0x440] sm:$0xff]  ;;  %v3560_v20 = vpack.c.bf16 %v1187_v18, %v1179_v17  ;;  %v1180_v3 = vld [vmem:[#allocation4 + $0x590] sm:$0xff] }
 0x134   :  { %v3550_v2 = vpack.c.bf16 %v1138_v37, %v1130_v36  ;;  %v1205_v36 = vld [vmem:[#allocation4 + $0x658] sm:$0xff]  ;;  %v1194_v37 = vld [vmem:[#allocation4 + $0x600] sm:$0xff] }
 0x136   :  { %3535 = vmatpush1.bf16.msra.mxu0 %v3534_v38  ;;  %3599 = vmatpush1.bf16.msra.mxu1 %v3598_v42  ;;  %v3612_v38 = vpack.c.bf16 %v1141_v35, %v1133_v31  ;;  %v1140_v42 = vld [vmem:[#allocation4 + $0x450] sm:$0xff]  ;;  %v1203_v31 = vld [vmem:[#allocation4 + $0x648] sm:$0xff] }
 0x137   :  { %3537 = vmatprep.subr.bf16.mxu0 %v3536_v48  ;;  %3601 = vmatprep.subr.bf16.mxu1 %v3600_v54  ;;  %v3614_v43 = vpack.c.bf16 %v1140_v42, %v1132_v41  ;;  %v1149_v48 = vld [vmem:[#allocation4 + $0x498] sm:$0xff]  ;;  %v1154_v54 = vld [vmem:[#allocation4 + $0x4c0] sm:$0xff]  ;;  %v3564_v35 = vpack.c.bf16 %v1203_v31, %v1195_v30  ;;  %v1196_v42 = vld [vmem:[#allocation4 + $0x610] sm:$0xff] }
 0x138   :  { %v3554_v58 = vpack.c.bf16 %v1154_v54, %v1146_v53  ;;  %v1221_v54 = vld [vmem:[#allocation4 + $0x6d8] sm:$0xff] }
 0x139   :  { %v1253_v31 = vld [vmem:[#allocation4 + $0x7d8] sm:$0xff] }
 0x13a   :  { %3539 = vmatpush1.bf16.msra.mxu0 %v3538_v56  ;;  %3603 = vmatpush1.bf16.msra.mxu1 %v3602_v60  ;;  %v3616_v56 = vpack.c.bf16 %v1157_v51, %v1149_v48  ;;  %v1156_v60 = vld [vmem:[#allocation4 + $0x4d0] sm:$0xff]  ;;  %v1211_v48 = vld [vmem:[#allocation4 + $0x688] sm:$0xff]  ;;  %v1213_v51 = vld [vmem:[#allocation4 + $0x698] sm:$0xff] }
 0x13b   :  { %3541 = vmatprep.subr.bf16.mxu0 %v3540_v4  ;;  %3605 = vmatprep.subr.bf16.mxu1 %v3604_v9  ;;  %v3618_v61 = vpack.c.bf16 %v1156_v60, %v1148_v59  ;;  %v1165_v4 = vld [vmem:[#allocation4 + $0x518] sm:$0xff]  ;;  %v1170_v9 = vld [vmem:[#allocation4 + $0x540] sm:$0xff]  ;;  %v3632_v59 = vpack.c.bf16 %v1221_v54, %v1213_v51 }
 0x13c   :  { %v3558_v12 = vpack.c.bf16 %v1170_v9, %v1162_v8  ;;  %v1229_v8 = vld [vmem:[#allocation4 + $0x718] sm:$0xff] }
 0x13e   :  { %3543 = vmatpush1.bf16.msra.mxu0 %v3542_v10  ;;  %3607 = vmatpush1.bf16.msra.mxu1 %v3606_v14  ;;  %v3620_v10 = vpack.c.bf16 %v1173_v7, %v1165_v4  ;;  %v1172_v14 = vld [vmem:[#allocation4 + $0x550] sm:$0xff]  ;;  %v1235_v7 = vld [vmem:[#allocation4 + $0x748] sm:$0xff] }
 0x13f   :  { %3545 = vmatprep.subr.bf16.mxu0 %v3544_v19  ;;  %3609 = vmatprep.subr.bf16.mxu1 %v3608_v25  ;;  %v3622_v16 = vpack.c.bf16 %v1172_v14, %v1164_v13  ;;  %v1181_v19 = vld [vmem:[#allocation4 + $0x598] sm:$0xff]  ;;  %v1186_v25 = vld [vmem:[#allocation4 + $0x5c0] sm:$0xff] }
 0x140   :  { %v3562_v27 = vpack.c.bf16 %v1186_v25, %v1178_v22  ;;  %v1234_v13 = vld [vmem:[#allocation4 + $0x740] sm:$0xff] }
 0x142   :  { %3547 = vmatpush1.bf16.msra.mxu0 %v3546_v26  ;;  %3611 = vmatpush1.bf16.msra.mxu1 %v3610_v28  ;;  %v3624_v26 = vpack.c.bf16 %v1189_v21, %v1181_v19  ;;  %v1188_v28 = vld [vmem:[#allocation4 + $0x5d0] sm:$0xff] }
 0x143   :  { %3549 = vmatprep.subr.bf16.mxu0 %v3548_v32  ;;  %3613 = vmatprep.subr.bf16.mxu1 %v3612_v38  ;;  %v3626_v29 = vpack.c.bf16 %v1188_v28, %v1180_v3  ;;  %v1197_v32 = vld [vmem:[#allocation4 + $0x618] sm:$0xff]  ;;  %v1202_v38 = vld [vmem:[#allocation4 + $0x640] sm:$0xff]  ;;  %v1228_v19 = vld [vmem:[#allocation4 + $0x710] sm:$0xff] }
 0x144   :  { %v3566_v41 = vpack.c.bf16 %v1202_v38, %v1194_v37  ;;  %v1251_v3 = vld [vmem:[#allocation4 + $0x7c8] sm:$0xff]  ;;  %v1245_v28 = vld [vmem:[#allocation4 + $0x798] sm:$0xff]  ;;  %v1244_v38 = vld [vmem:[#allocation4 + $0x790] sm:$0xff] }
 0x146   :  { %3551 = vmatpush1.bf16.msra.mxu0 %v3550_v2  ;;  %3615 = vmatpush1.bf16.msra.mxu1 %v3614_v43  ;;  %v3628_v2 = vpack.c.bf16 %v1205_v36, %v1197_v32  ;;  %v1204_v43 = vld [vmem:[#allocation4 + $0x650] sm:$0xff]  ;;  %v1242_v32 = vld [vmem:[#allocation4 + $0x780] sm:$0xff]  ;;  %v3640_v36 = vpack.c.bf16 %v1253_v31, %v1245_v28 }
 0x147   :  { %3553 = vmatprep.subr.bf16.mxu0 %v3552_v49  ;;  %3617 = vmatprep.subr.bf16.mxu1 %v3616_v56  ;;  %v3630_v34 = vpack.c.bf16 %v1204_v43, %v1196_v42  ;;  %v1219_v49 = vld [vmem:[#allocation4 + $0x6c8] sm:$0xff]  ;;  %v1210_v56 = vld [vmem:[#allocation4 + $0x680] sm:$0xff] }
 0x148   :  { %v3568_v53 = vpack.c.bf16 %v1219_v49, %v1211_v48  ;;  %v1007_v42 = vld [vmem:[#allocation4 + $0x28] sm:$0xff]  ;;  %v1017_v49 = vld [vmem:[#allocation4 + $0x78] sm:$0xff] }
 0x149   :  { %v1015_v43 = vld [vmem:[#allocation4 + $0x68] sm:$0xff] }
 0x14a   :  { %3555 = vmatpush1.bf16.msra.mxu0 %v3554_v58  ;;  %3619 = vmatpush1.bf16.msra.mxu1 %v3618_v61  ;;  %v1218_v58 = vld [vmem:[#allocation4 + $0x6c0] sm:$0xff]  ;;  %v1212_v61 = vld [vmem:[#allocation4 + $0x690] sm:$0xff]  ;;  %v3644_v48 = vpack.c.bf16 %v1015_v43, %v1007_v42 }
 0x14b   :  { %3557 = vmatprep.subr.bf16.mxu0 %v3556_v6  ;;  %3621 = vmatprep.subr.bf16.mxu1 %v3620_v10  ;;  %v3570_v60 = vpack.c.bf16 %v1218_v58, %v1210_v56  ;;  %v3634_v4 = vpack.c.bf16 %v1220_v62, %v1212_v61  ;;  %v1227_v6 = vld [vmem:[#allocation4 + $0x708] sm:$0xff]  ;;  %v1237_v10 = vld [vmem:[#allocation4 + $0x758] sm:$0xff]  ;;  %v495_v62 = vrot.slane %v4747_v47, %v4708_v50 }
 0x14c   :  { %v3572_v9 = vpack.c.bf16 %v1235_v7, %v1227_v6  ;;  %v3636_v17 = vpack.c.bf16 %v1237_v10, %v1229_v8  ;;  %v507_v7 = vrot.slane %v4747_v47, %v4724_v5  ;;  %v503_v8 = vrot.slane %v4747_v47, %v4716_v57 }
 0x14e   :  { %3559 = vmatpush1.bf16.msra.mxu0 %v3558_v12  ;;  %3623 = vmatpush1.bf16.msra.mxu1 %v3622_v16  ;;  %v1226_v12 = vld [vmem:[#allocation4 + $0x700] sm:$0xff] }
 0x14f   :  { %3561 = vmatprep.subr.bf16.mxu0 %v3560_v20  ;;  %3625 = vmatprep.subr.bf16.mxu1 %v3624_v26  ;;  %v3574_v18 = vpack.c.bf16 %v1234_v13, %v1226_v12  ;;  %v1236_v20 = vld [vmem:[#allocation4 + $0x750] sm:$0xff] }
 0x150   :  { %v3638_v26 = vpack.c.bf16 %v1236_v20, %v1228_v19  ;;  %v487_v20 = vrot.slane %v4747_v47, %v4702_v45 }
 0x152   :  { %3563 = vmatpush1.bf16.msra.mxu0 %v3562_v27  ;;  %3627 = vmatpush1.bf16.msra.mxu1 %v3626_v29  ;;  %v1243_v27 = vld [vmem:[#allocation4 + $0x788] sm:$0xff] }
 0x153   :  { %3565 = vmatprep.subr.bf16.mxu0 %v3564_v35  ;;  %3629 = vmatprep.subr.bf16.mxu1 %v3628_v2  ;;  %v3576_v30 = vpack.c.bf16 %v1251_v3, %v1243_v27  ;;  %v1250_v35 = vld [vmem:[#allocation4 + $0x7c0] sm:$0xff]  ;;  %v1252_v2 = vld [vmem:[#allocation4 + $0x7d0] sm:$0xff] }
 0x154   :  { %v3578_v37 = vpack.c.bf16 %v1250_v35, %v1242_v32  ;;  %v1648_v3 = vld [vmem:[#allocation6 + $0x10] sm:$0xff] }
 0x155   :  { %1653 = vperm.xlu1 %4319, %v1648_v3   ;;  %1669 = vperm.xlu0 %4320, %v1648_v3  }
 0x156   :  { %3567 = vmatpush1.bf16.msra.mxu0 %v3566_v41  ;;  %3631 = vmatpush1.bf16.msra.mxu1 %v3630_v34  ;;  %v3642_v41 = vpack.c.bf16 %v1252_v2, %v1244_v38  ;;  %v1009_v34 = vld [vmem:[#allocation4 + $0x38] sm:$0xff] }
 0x157   :  { %3569 = vmatprep.subr.bf16.mxu0 %v3568_v53  ;;  %3633 = vmatprep.subr.bf16.mxu1 %v3632_v59  ;;  %v3708_v51 = vpack.c.bf16 %v1017_v49, %v1009_v34  ;;  %v491_v53 = vrot.slane %v4747_v47, %v4704_v46  ;;  %v856_v49 = vld [vmem:[#allocation7 + $0x18] sm:$0xff] }
 0x159   :  { %4321 = vset.pattern.permute.xlu1 %v4570_v0  ;;  %4323 = vset.pattern.permute.xlu0 %v4575_v39 }
 0x15a   :  { %3571 = vmatpush1.bf16.msra.mxu0 %v3570_v60  ;;  %3635 = vmatpush1.bf16.msra.mxu1 %v3634_v4 }
 0x15b   :  { %3573 = vmatprep.subr.bf16.mxu0 %v3572_v9  ;;  %3637 = vmatprep.subr.bf16.mxu1 %v3636_v17  ;;  %v511_v9 = vrot.slane %v4747_v47, %v4728_v15 }
 0x15c   :  { %1685 = vperm.xlu1 %4321, %v1648_v3   ;;  %1717 = vperm.xlu0 %4323, %v1648_v3  }
 0x15e   :  { %3575 = vmatpush1.bf16.msra.mxu0 %v3574_v18  ;;  %3639 = vmatpush1.bf16.msra.mxu1 %v3638_v26 }
 0x15f   :  { %3577 = vmatprep.subr.bf16.mxu0 %v3576_v30  ;;  %3641 = vmatprep.subr.bf16.mxu1 %v3640_v36 }
 0x160   :  { %4322 = vset.pattern.permute.xlu1 %v4573_v23  ;;  %4326 = vset.pattern.permute.xlu0 %v4578_v11 }
 0x161   :  { %1701 = vperm.xlu1 %4322, %v1648_v3   ;;  %1765 = vperm.xlu0 %4326, %v1648_v3  }
 0x162   :  { %3579 = vmatpush1.bf16.msra.mxu0 %v3578_v37  ;;  %3643 = vmatpush1.bf16.msra.mxu1 %v3642_v41 }
 0x163   :  { %3645 = vmatprep.subr.bf16.mxu0 %v3644_v48  ;;  %3709 = vmatprep.subr.bf16.mxu1 %v3708_v51 }
 0x165   :  { %4324 = vset.pattern.permute.xlu1 %v4576_v40  ;;  %4329 = vset.pattern.permute.xlu0 %v4570_v0 }
 0x166   :  { %1733 = vperm.xlu1 %4324, %v1648_v3  }
 0x16a   :  { %4325 = vset.pattern.permute.xlu1 %v4577_v55 }
 0x16b   :  { %1749 = vperm.xlu1 %4325, %v1648_v3  }
 0x16f   :  { %4327 = vset.pattern.permute.xlu1 %v4571_v1 }
 0x1b8   :  { %v586_v14 = vpop.f32.mrb[0].mxu0  ;;  %v657_v16 = vpop.f32.mrb[0].mxu1 }
 0x1b9   :  { %v587_v21 = vadd.f32 %v586_v14, %v483_v63  ;;  %v659_v22 = vpop.f32.mrb[1].mxu1  ;;  %v4751_v25 = vpop.f32.mrb[1].mxu0  ;;  %v658_v54 = vadd.f32 %v657_v16, %v491_v53 }
 0x1ba   :  { %v660_v63 = vadd.f32 %v659_v22, %v495_v62  ;;  %v499_v22 = vrot.slane %v4747_v47, %v4712_v52  ;;  %v589_v27 = vadd.f32 %v4751_v25, %v487_v20 }
 0x1bb   :  { %v3222_v29 = vmul.f32 -1.442695, %v587_v21 }
 0x1bc   :  { %v3225_v4 = vmul.f32 -1.442695, %v660_v63 }
 0x1bd   :  { %4336 = vpow2.f32 %v3222_v29  ;;  %v3223_v29 = vmul.f32 -1.442695, %v589_v27 }
 0x1be   :  { %4338 = vtanh.f32 %v658_v54  ;;  %v855_v54 = vld [vmem:[#allocation7 + $0x10] sm:$0xff] }
 0x1c7   :  { %v4337_v56 = vpop.eup %4336 }
 0x1c8   :  { %v807_v58 = vadd.f32 1.0, %v4337_v56  ;;  %v4339_v59 = vpop.eup %4338 }
 0x1ca   :  { %4340 = vrcp.f32 %v807_v58 }
 0x1cb   :  { %4342 = vpow2.f32 %v3225_v4 }
 0x1d4   :  { %v4341_v60 = vpop.eup %4340 }
 0x1d5   :  { %v4755_v61 = vmul.f32 %v4341_v60, %v4339_v59  ;;  %v4343_v6 = vpop.eup %4342  ;;  %v4784_v60 = vpop.permute.xlu1 %889 }
 0x1d6   :  { %v831_v10 = vadd.f32 1.0, %v4343_v6 }
 0x1d8   :  { %4344 = vrcp.f32 %v831_v10  ;;  %v4788_v10 = vpop.permute.xlu0 %873 }
 0x1e2   :  { %v4345_v31 = vpop.eup %4344 }
 0x1f8   :  { %v728_v12 = vpop.f32.mrb[2].mxu0  ;;  %v799_v13 = vpop.f32.mrb[2].mxu1 }
 0x1f9   :  { %v800_v14 = vadd.f32 %v799_v13, %v507_v7  ;;  %v730_v16 = vpop.f32.mrb[3].mxu0  ;;  %v801_v17 = vpop.f32.mrb[3].mxu1  ;;  %v729_v28 = vadd.f32 %v728_v12, %v499_v22 }
 0x1fa   :  { %v731_v18 = vadd.f32 %v730_v16, %v503_v8  ;;  %v802_v19 = vadd.f32 %v801_v17, %v511_v9  ;;  %v4786_v7 = vpop.permute.xlu1 %905 }
 0x1fb   :  { %v3224_v21 = vmul.f32 -1.442695, %v800_v14  ;;  %v3226_v30 = vmul.f32 -1.442695, %v729_v28 }
 0x1fc   :  { %4346 = vtanh.f32 %v731_v18  ;;  %v3227_v26 = vmul.f32 -1.442695, %v802_v19 }
 0x1fd   :  { %4348 = vpow2.f32 %v3224_v21 }
 0x1fe   :  { %4350 = vpow2.f32 %v3227_v26  ;;  %v4796_v16 = vpop.permute.xlu1 %937  ;;  %v4803_v26 = vpop.permute.xlu0 %921 }
 0x1ff   :  { %4352 = vpow2.f32 %v3223_v29 }
 0x200   :  { %4354 = vpow2.f32 %v3226_v30 }
 0x202   :  { %v4807_v29 = vpop.permute.xlu1 %953 }
 0x206   :  { %v4347_v47 = vpop.eup %4346 }
 0x207   :  { %v847_v32 = vmul.f32 %v4347_v47, %v4345_v31  ;;  %v4349_v35 = vpop.eup %4348 }
 0x208   :  { %v4351_v25 = vpop.eup %4350  ;;  %v820_v36 = vadd.f32 1.0, %v4349_v35 }
 0x209   :  { %v844_v37 = vadd.f32 1.0, %v4351_v25  ;;  %v4353_v38 = vpop.eup %4352 }
 0x20a   :  { %4356 = vrcp.f32 %v820_v36  ;;  %v4355_v2 = vpop.eup %4354  ;;  %v813_v41 = vadd.f32 1.0, %v4353_v38  ;;  %v4813_v36 = vpop.permute.xlu0 %969 }
 0x20b   :  { %4358 = vrcp.f32 %v844_v37  ;;  %v837_v43 = vadd.f32 1.0, %v4355_v2  ;;  %v1006_v2 = vld [vmem:[#allocation4 + $0x20] sm:$0xff] }
 0x20c   :  { %4360 = vrcp.f32 %v813_v41  ;;  %v4816_v41 = vpop.permute.xlu1 %985 }
 0x20d   :  { %4362 = vrcp.f32 %v837_v43  ;;  %v1008_v43 = vld [vmem:[#allocation4 + $0x30] sm:$0xff] }
 0x214   :  { %v4357_v42 = vpop.eup %4356 }
 0x215   :  { %v4359_v34 = vpop.eup %4358  ;;  %v824_v48 = vmul.f32 %v4357_v42, %v4732_v33  ;;  %v1014_v42 = vld [vmem:[#allocation4 + $0x60] sm:$0xff] }
 0x216   :  { %v848_v51 = vmul.f32 %v4359_v34, %v4732_v33  ;;  %v4361_v33 = vpop.eup %4360  ;;  %v1016_v34 = vld [vmem:[#allocation4 + $0x70] sm:$0xff] }
 0x217   :  { %v825_v53 = vadd.f32 %v824_v48, %v4755_v61  ;;  %v4363_v62 = vpop.eup %4362 }
 0x218   :  { %v849_v0 = vadd.f32 %v848_v51, %v847_v32  ;;  %v1023_v51 = vld [vmem:[#allocation4 + $0xa8] sm:$0xff] }
 0x219   :  { %4364 = vtanh.f32 %v825_v53  ;;  %v858_v56 = vmul.f32 %v856_v49, %v825_v53  ;;  %v1031_v53 = vld [vmem:[#allocation4 + $0xe8] sm:$0xff] }
 0x21a   :  { %4366 = vtanh.f32 %v849_v0  ;;  %v857_v58 = vmul.f32 %v855_v54, %v849_v0  ;;  %v1033_v0 = vld [vmem:[#allocation4 + $0xf8] sm:$0xff] }
 0x21c   :  { %v859_v59 = vadd.f32 %v858_v56, %v857_v58  ;;  %v4819_v58 = vld [vmem:[#allocation2 + $0x10] sm:$0xff] }
 0x21e   :  { %3228 = vst [vmem:[%s5048_s5 + $0x10] sm:$0xff] %v859_v59  ;;  %v3646_v59 = vpack.c.bf16 %v1014_v42, %v1006_v2  ;;  %v1056_v2 = vld [vmem:[#allocation4 + $0x1b0] sm:$0xff] }
 0x21f   :  { %v1064_v42 = vld [vmem:[#allocation4 + $0x1f0] sm:$0xff] }
 0x223   :  { %v4365_v63 = vpop.eup %4364 }
 0x224   :  { %v4367_v61 = vpop.eup %4366  ;;  %v827_v4 = vmul.f32 %v4365_v63, %v4361_v33  ;;  %v3710_v33 = vpack.c.bf16 %v1016_v34, %v1008_v43  ;;  %v1030_v63 = vld [vmem:[#allocation4 + $0xe0] sm:$0xff]  ;;  %v1071_v43 = vld [vmem:[#allocation4 + $0x228] sm:$0xff] }
 0x225   :  { %v851_v6 = vmul.f32 %v4367_v61, %v4363_v62  ;;  %v1022_v62 = vld [vmem:[#allocation4 + $0xa0] sm:$0xff]  ;;  %v1024_v61 = vld [vmem:[#allocation4 + $0xb0] sm:$0xff]  ;;  %v1079_v34 = vld [vmem:[#allocation4 + $0x268] sm:$0xff] }
 0x226   :  { %v864_v1 = vmul.f32 %v856_v49, %v827_v4  ;;  %v1032_v4 = vld [vmem:[#allocation4 + $0xf0] sm:$0xff] }
 0x227   :  { %v863_v8 = vmul.f32 %v855_v54, %v851_v6  ;;  %v1025_v54 = vld [vmem:[#allocation4 + $0xb8] sm:$0xff]  ;;  %v1039_v6 = vld [vmem:[#allocation4 + $0x128] sm:$0xff] }
 0x229   :  { %v865_v9 = vadd.f32 %v864_v1, %v863_v8  ;;  %v3648_v1 = vpack.c.bf16 %v1031_v53, %v1023_v51  ;;  %v3712_v8 = vpack.c.bf16 %v1033_v0, %v1025_v54  ;;  %v3722_v53 = vpack.c.bf16 %v1064_v42, %v1056_v2  ;;  %v1070_v54 = vld [vmem:[#allocation4 + $0x220] sm:$0xff]  ;;  %v1129_v2 = vld [vmem:[#allocation4 + $0x3f8] sm:$0xff] }
 0x22a   :  { %v1078_v0 = vld [vmem:[#allocation4 + $0x260] sm:$0xff] }
 0x22b   :  { %3229 = vst [vmem:[%s5048_s5 + $0x18] sm:$0xff] %v865_v9  ;;  %v899_v12 = vrot.slane %v865_v9, %v4702_v45  ;;  %v915_v13 = vrot.slane %v865_v9, %v4704_v46  ;;  %v883_v14 = vrot.slane %v865_v9, %v4700_v44  ;;  %v931_v19 = vrot.slane %v865_v9, %v4708_v50 }
 0x22c   :  { %v947_v21 = vrot.slane %v865_v9, %v4712_v52  ;;  %v963_v27 = vrot.slane %v865_v9, %v4716_v57  ;;  %v979_v47 = vrot.slane %v865_v9, %v4724_v5  ;;  %v995_v25 = vrot.slane %v865_v9, %v4728_v15  ;;  %v1047_v9 = vld [vmem:[#allocation4 + $0x168] sm:$0xff] }
 0x22d   :  { %v901_v17 = vmul.f32 %v899_v12, %v4784_v60  ;;  %v885_v18 = vmul.f32 %v883_v14, %v4788_v10  ;;  %v917_v20 = vmul.f32 %v915_v13, %v4786_v7  ;;  %v933_v28 = vmul.f32 %v931_v19, %v4803_v26  ;;  %v1041_v12 = vld [vmem:[#allocation4 + $0x138] sm:$0xff]  ;;  %v1046_v19 = vld [vmem:[#allocation4 + $0x160] sm:$0xff] }
 0x22e   :  { %v949_v30 = vmul.f32 %v947_v21, %v4796_v16  ;;  %v965_v32 = vmul.f32 %v963_v27, %v4807_v29  ;;  %v981_v38 = vmul.f32 %v979_v47, %v4813_v36  ;;  %v997_v48 = vmul.f32 %v995_v25, %v4816_v41  ;;  %v1049_v13 = vld [vmem:[#allocation4 + $0x178] sm:$0xff]  ;;  %v1048_v27 = vld [vmem:[#allocation4 + $0x170] sm:$0xff]  ;;  %v1062_v25 = vld [vmem:[#allocation4 + $0x1e0] sm:$0xff] }
 0x22f   :  { %v903_v22 = vadd.f32 %v901_v17, %v885_v18  ;;  %v3650_v14 = vpack.c.bf16 %v1030_v63, %v1022_v62  ;;  %v3714_v17 = vpack.c.bf16 %v1032_v4, %v1024_v61  ;;  %v1038_v18 = vld [vmem:[#allocation4 + $0x120] sm:$0xff]  ;;  %v3716_v21 = vpack.c.bf16 %v1049_v13, %v1041_v12  ;;  %v1080_v62 = vld [vmem:[#allocation4 + $0x270] sm:$0xff]  ;;  %v1087_v63 = vld [vmem:[#allocation4 + $0x2a8] sm:$0xff] }
 0x230   :  { %v3654_v47 = vpack.c.bf16 %v1046_v19, %v1038_v18  ;;  %v1095_v61 = vld [vmem:[#allocation4 + $0x2e8] sm:$0xff]  ;;  %v1089_v4 = vld [vmem:[#allocation4 + $0x2b8] sm:$0xff]  ;;  %v1094_v12 = vld [vmem:[#allocation4 + $0x2e0] sm:$0xff] }
 0x231   :  { %v919_v3 = vadd.f32 %v917_v20, %v903_v22  ;;  %v3652_v20 = vpack.c.bf16 %v1047_v9, %v1039_v6  ;;  %v1040_v22 = vld [vmem:[#allocation4 + $0x130] sm:$0xff]  ;;  %v1097_v6 = vld [vmem:[#allocation4 + $0x2f8] sm:$0xff]  ;;  %v1086_v9 = vld [vmem:[#allocation4 + $0x2a0] sm:$0xff]  ;;  %v3664_v13 = vpack.c.bf16 %v1095_v61, %v1087_v63 }
 0x232   :  { %v1096_v18 = vld [vmem:[#allocation4 + $0x2f0] sm:$0xff]  ;;  %v1103_v19 = vld [vmem:[#allocation4 + $0x328] sm:$0xff]  ;;  %v1134_v61 = vld [vmem:[#allocation4 + $0x420] sm:$0xff] }
 0x233   :  { %v935_v31 = vadd.f32 %v933_v28, %v919_v3  ;;  %v1055_v3 = vld [vmem:[#allocation4 + $0x1a8] sm:$0xff] }
 0x234   :  { %v1063_v28 = vld [vmem:[#allocation4 + $0x1e8] sm:$0xff] }
 0x235   :  { %v951_v35 = vadd.f32 %v949_v30, %v935_v31  ;;  %v1057_v30 = vld [vmem:[#allocation4 + $0x1b8] sm:$0xff] }
 0x236   :  { %v1065_v31 = vld [vmem:[#allocation4 + $0x1f8] sm:$0xff] }
 0x237   :  { %v967_v37 = vadd.f32 %v965_v32, %v951_v35  ;;  %v3718_v32 = vpack.c.bf16 %v1048_v27, %v1040_v22  ;;  %v1054_v35 = vld [vmem:[#allocation4 + $0x1a0] sm:$0xff]  ;;  %v1113_v22 = vld [vmem:[#allocation4 + $0x378] sm:$0xff]  ;;  %v3666_v27 = vpack.c.bf16 %v1094_v12, %v1086_v9  ;;  %v1144_v9 = vld [vmem:[#allocation4 + $0x470] sm:$0xff] }
 0x238   :  { %v3658_v51 = vpack.c.bf16 %v1062_v25, %v1054_v35  ;;  %v1112_v35 = vld [vmem:[#allocation4 + $0x370] sm:$0xff]  ;;  %v1119_v25 = vld [vmem:[#allocation4 + $0x3a8] sm:$0xff] }
 0x239   :  { %v983_v49 = vadd.f32 %v981_v38, %v967_v37  ;;  %v3656_v37 = vpack.c.bf16 %v1063_v28, %v1055_v3  ;;  %v3720_v38 = vpack.c.bf16 %v1065_v31, %v1057_v30  ;;  %v1102_v28 = vld [vmem:[#allocation4 + $0x320] sm:$0xff]  ;;  %v1151_v12 = vld [vmem:[#allocation4 + $0x4a8] sm:$0xff] }
 0x23a   :  { %v1110_v30 = vld [vmem:[#allocation4 + $0x360] sm:$0xff] }
 0x23b   :  { %v999_v56 = vadd.f32 %v997_v48, %v983_v49  ;;  %v1073_v48 = vld [vmem:[#allocation4 + $0x238] sm:$0xff]  ;;  %v3670_v42 = vpack.c.bf16 %v1110_v30, %v1102_v28  ;;  %v1160_v28 = vld [vmem:[#allocation4 + $0x4f0] sm:$0xff]  ;;  %v1167_v30 = vld [vmem:[#allocation4 + $0x528] sm:$0xff] }
 0x23c   :  { %v1081_v49 = vld [vmem:[#allocation4 + $0x278] sm:$0xff] }
 0x23d   :  { %1364 = vmatprep.mubr.f32.mxu0 %v999_v56  ;;  %1435 = vmatprep.mubr.f32.mxu1 %v999_v56 }
 0x23e   :  { %1365 = vmatmul.mubr.f32.vlgmr.msra.gmra.mrb[4].mxu0 %v4819_v58  ;;  %1436 = vmatmul.mubr.f32.vlgmr.msra.gmra.mrb[4].mxu1 %v4819_v58 }
 0x23f   :  { %3647 = vmatpush1.bf16.msra.mxu0 %v3646_v59  ;;  %3711 = vmatpush1.bf16.msra.mxu1 %v3710_v33  ;;  %v3724_v59 = vpack.c.bf16 %v1081_v49, %v1073_v48  ;;  %v1072_v33 = vld [vmem:[#allocation4 + $0x230] sm:$0xff]  ;;  %v1126_v48 = vld [vmem:[#allocation4 + $0x3e0] sm:$0xff] }
 0x240   :  { %1506 = vmatprep.mubr.f32.mxu0 %v999_v56  ;;  %1577 = vmatprep.mubr.f32.mxu1 %v999_v56  ;;  %v3660_v56 = vpack.c.bf16 %v1079_v34, %v1071_v43  ;;  %v1118_v34 = vld [vmem:[#allocation4 + $0x3a0] sm:$0xff] }
 0x241   :  { %3649 = vmatprep.subr.bf16.mxu0 %v3648_v1  ;;  %3713 = vmatprep.subr.bf16.mxu1 %v3712_v8  ;;  %v3662_v1 = vpack.c.bf16 %v1078_v0, %v1070_v54  ;;  %v3726_v8 = vpack.c.bf16 %v1080_v62, %v1072_v33  ;;  %v1128_v54 = vld [vmem:[#allocation4 + $0x3f0] sm:$0xff]  ;;  %v1135_v0 = vld [vmem:[#allocation4 + $0x428] sm:$0xff]  ;;  %v1145_v33 = vld [vmem:[#allocation4 + $0x478] sm:$0xff]  ;;  %v3674_v62 = vpack.c.bf16 %v1126_v48, %v1118_v34 }
 0x242   :  { %v1176_v34 = vld [vmem:[#allocation4 + $0x570] sm:$0xff]  ;;  %v1183_v48 = vld [vmem:[#allocation4 + $0x5a8] sm:$0xff] }
 0x243   :  { %3651 = vmatpush1.bf16.msra.mxu0 %v3650_v14  ;;  %3715 = vmatpush1.bf16.msra.mxu1 %v3714_v17  ;;  %v3728_v14 = vpack.c.bf16 %v1097_v6, %v1089_v4  ;;  %v1088_v17 = vld [vmem:[#allocation4 + $0x2b0] sm:$0xff]  ;;  %v1142_v4 = vld [vmem:[#allocation4 + $0x460] sm:$0xff] }
 0x244   :  { %3653 = vmatprep.subr.bf16.mxu0 %v3652_v20  ;;  %3717 = vmatprep.subr.bf16.mxu1 %v3716_v21  ;;  %v1111_v20 = vld [vmem:[#allocation4 + $0x368] sm:$0xff]  ;;  %v1105_v21 = vld [vmem:[#allocation4 + $0x338] sm:$0xff]  ;;  %v3730_v3 = vpack.c.bf16 %v1096_v18, %v1088_v17  ;;  %v3678_v18 = vpack.c.bf16 %v1142_v4, %v1134_v61  ;;  %v1192_v61 = vld [vmem:[#allocation4 + $0x5f0] sm:$0xff] }
 0x245   :  { %v3668_v31 = vpack.c.bf16 %v1111_v20, %v1103_v19  ;;  %v1161_v17 = vld [vmem:[#allocation4 + $0x4f8] sm:$0xff]  ;;  %v1150_v20 = vld [vmem:[#allocation4 + $0x4a0] sm:$0xff]  ;;  %v1199_v4 = vld [vmem:[#allocation4 + $0x628] sm:$0xff] }
 0x247   :  { %3655 = vmatpush1.bf16.msra.mxu0 %v3654_v47  ;;  %3719 = vmatpush1.bf16.msra.mxu1 %v3718_v32  ;;  %v3732_v47 = vpack.c.bf16 %v1113_v22, %v1105_v21  ;;  %v1104_v32 = vld [vmem:[#allocation4 + $0x330] sm:$0xff]  ;;  %v1158_v21 = vld [vmem:[#allocation4 + $0x4e0] sm:$0xff] }
 0x248   :  { %3657 = vmatprep.subr.bf16.mxu0 %v3656_v37  ;;  %3721 = vmatprep.subr.bf16.mxu1 %v3720_v38  ;;  %v1127_v37 = vld [vmem:[#allocation4 + $0x3e8] sm:$0xff]  ;;  %v1121_v38 = vld [vmem:[#allocation4 + $0x3b8] sm:$0xff]  ;;  %v3734_v43 = vpack.c.bf16 %v1112_v35, %v1104_v32  ;;  %v3682_v35 = vpack.c.bf16 %v1158_v21, %v1150_v20  ;;  %v1208_v20 = vld [vmem:[#allocation4 + $0x670] sm:$0xff] }
 0x249   :  { %v3672_v49 = vpack.c.bf16 %v1127_v37, %v1119_v25  ;;  %v1177_v32 = vld [vmem:[#allocation4 + $0x578] sm:$0xff]  ;;  %v1166_v37 = vld [vmem:[#allocation4 + $0x520] sm:$0xff]  ;;  %v1215_v21 = vld [vmem:[#allocation4 + $0x6a8] sm:$0xff] }
 0x24b   :  { %3659 = vmatpush1.bf16.msra.mxu0 %v3658_v51  ;;  %3723 = vmatpush1.bf16.msra.mxu1 %v3722_v53  ;;  %v3736_v51 = vpack.c.bf16 %v1129_v2, %v1121_v38  ;;  %v1120_v53 = vld [vmem:[#allocation4 + $0x3b0] sm:$0xff]  ;;  %v1174_v38 = vld [vmem:[#allocation4 + $0x560] sm:$0xff] }
 0x24c   :  { %3661 = vmatprep.subr.bf16.mxu0 %v3660_v56  ;;  %3725 = vmatprep.subr.bf16.mxu1 %v3724_v59  ;;  %v1143_v56 = vld [vmem:[#allocation4 + $0x468] sm:$0xff]  ;;  %v1137_v59 = vld [vmem:[#allocation4 + $0x438] sm:$0xff]  ;;  %v3738_v63 = vpack.c.bf16 %v1128_v54, %v1120_v53  ;;  %v3686_v54 = vpack.c.bf16 %v1174_v38, %v1166_v37  ;;  %v1224_v37 = vld [vmem:[#allocation4 + $0x6f0] sm:$0xff] }
 0x24d   :  { %v3676_v6 = vpack.c.bf16 %v1143_v56, %v1135_v0  ;;  %v1193_v53 = vld [vmem:[#allocation4 + $0x5f8] sm:$0xff]  ;;  %v1182_v56 = vld [vmem:[#allocation4 + $0x5a0] sm:$0xff]  ;;  %v1231_v38 = vld [vmem:[#allocation4 + $0x728] sm:$0xff] }
 0x24f   :  { %3663 = vmatpush1.bf16.msra.mxu0 %v3662_v1  ;;  %3727 = vmatpush1.bf16.msra.mxu1 %v3726_v8  ;;  %v3740_v1 = vpack.c.bf16 %v1145_v33, %v1137_v59  ;;  %v1136_v8 = vld [vmem:[#allocation4 + $0x430] sm:$0xff]  ;;  %v1190_v59 = vld [vmem:[#allocation4 + $0x5e0] sm:$0xff] }
 0x250   :  { %3665 = vmatprep.subr.bf16.mxu0 %v3664_v13  ;;  %3729 = vmatprep.subr.bf16.mxu1 %v3728_v14  ;;  %v1159_v13 = vld [vmem:[#allocation4 + $0x4e8] sm:$0xff]  ;;  %v1153_v14 = vld [vmem:[#allocation4 + $0x4b8] sm:$0xff]  ;;  %v3742_v19 = vpack.c.bf16 %v1144_v9, %v1136_v8  ;;  %v3690_v9 = vpack.c.bf16 %v1190_v59, %v1182_v56  ;;  %v1240_v56 = vld [vmem:[#allocation4 + $0x770] sm:$0xff] }
 0x251   :  { %v3680_v22 = vpack.c.bf16 %v1159_v13, %v1151_v12  ;;  %v1209_v8 = vld [vmem:[#allocation4 + $0x678] sm:$0xff]  ;;  %v1198_v13 = vld [vmem:[#allocation4 + $0x620] sm:$0xff]  ;;  %v1247_v59 = vld [vmem:[#allocation4 + $0x7a8] sm:$0xff] }
 0x253   :  { %3667 = vmatpush1.bf16.msra.mxu0 %v3666_v27  ;;  %3731 = vmatpush1.bf16.msra.mxu1 %v3730_v3  ;;  %v3744_v27 = vpack.c.bf16 %v1161_v17, %v1153_v14  ;;  %v1152_v3 = vld [vmem:[#allocation4 + $0x4b0] sm:$0xff]  ;;  %v1206_v14 = vld [vmem:[#allocation4 + $0x660] sm:$0xff] }
 0x254   :  { %3669 = vmatprep.subr.bf16.mxu0 %v3668_v31  ;;  %3733 = vmatprep.subr.bf16.mxu1 %v3732_v47  ;;  %v1175_v31 = vld [vmem:[#allocation4 + $0x568] sm:$0xff]  ;;  %v1169_v47 = vld [vmem:[#allocation4 + $0x538] sm:$0xff]  ;;  %v3746_v25 = vpack.c.bf16 %v1160_v28, %v1152_v3  ;;  %v3694_v28 = vpack.c.bf16 %v1206_v14, %v1198_v13  ;;  %v1256_v13 = vld [vmem:[#allocation4 + $0x7f0] sm:$0xff] }
 0x255   :  { %v3684_v2 = vpack.c.bf16 %v1175_v31, %v1167_v30  ;;  %v1225_v3 = vld [vmem:[#allocation4 + $0x6f8] sm:$0xff]  ;;  %v1214_v31 = vld [vmem:[#allocation4 + $0x6a0] sm:$0xff] }
 0x257   :  { %3671 = vmatpush1.bf16.msra.mxu0 %v3670_v42  ;;  %3735 = vmatpush1.bf16.msra.mxu1 %v3734_v43  ;;  %v3748_v42 = vpack.c.bf16 %v1177_v32, %v1169_v47  ;;  %v1168_v43 = vld [vmem:[#allocation4 + $0x530] sm:$0xff]  ;;  %v1222_v47 = vld [vmem:[#allocation4 + $0x6e0] sm:$0xff] }
 0x258   :  { %3673 = vmatprep.subr.bf16.mxu0 %v3672_v49  ;;  %3737 = vmatprep.subr.bf16.mxu1 %v3736_v51  ;;  %v1191_v49 = vld [vmem:[#allocation4 + $0x5e8] sm:$0xff]  ;;  %v1185_v51 = vld [vmem:[#allocation4 + $0x5b8] sm:$0xff]  ;;  %v3750_v0 = vpack.c.bf16 %v1176_v34, %v1168_v43  ;;  %v3698_v34 = vpack.c.bf16 %v1222_v47, %v1214_v31  ;;  %v1784_v31 = vld [vmem:[#allocation4 + $0x10] sm:$0xff] }
 0x259   :  { %v3688_v33 = vpack.c.bf16 %v1191_v49, %v1183_v48  ;;  %v1241_v43 = vld [vmem:[#allocation4 + $0x778] sm:$0xff]  ;;  %v1230_v49 = vld [vmem:[#allocation4 + $0x720] sm:$0xff]  ;;  %v1792_v47 = vld [vmem:[#allocation4 + $0x50] sm:$0xff] }
 0x25b   :  { %3675 = vmatpush1.bf16.msra.mxu0 %v3674_v62  ;;  %3739 = vmatpush1.bf16.msra.mxu1 %v3738_v63  ;;  %v3752_v62 = vpack.c.bf16 %v1193_v53, %v1185_v51  ;;  %v1184_v63 = vld [vmem:[#allocation4 + $0x5b0] sm:$0xff]  ;;  %v1238_v51 = vld [vmem:[#allocation4 + $0x760] sm:$0xff] }
 0x25c   :  { %3677 = vmatprep.subr.bf16.mxu0 %v3676_v6  ;;  %3741 = vmatprep.subr.bf16.mxu1 %v3740_v1  ;;  %v1207_v6 = vld [vmem:[#allocation4 + $0x668] sm:$0xff]  ;;  %v1201_v1 = vld [vmem:[#allocation4 + $0x638] sm:$0xff]  ;;  %v3754_v12 = vpack.c.bf16 %v1192_v61, %v1184_v63  ;;  %v3702_v61 = vpack.c.bf16 %v1238_v51, %v1230_v49  ;;  %v1808_v49 = vld [vmem:[#allocation4 + $0xd0] sm:$0xff] }
 0x25d   :  { %v3692_v17 = vpack.c.bf16 %v1207_v6, %v1199_v4  ;;  %v1257_v63 = vld [vmem:[#allocation4 + $0x7f8] sm:$0xff]  ;;  %v1246_v6 = vld [vmem:[#allocation4 + $0x7a0] sm:$0xff] }
 0x25f   :  { %3679 = vmatpush1.bf16.msra.mxu0 %v3678_v18  ;;  %3743 = vmatpush1.bf16.msra.mxu1 %v3742_v19  ;;  %v3756_v18 = vpack.c.bf16 %v1209_v8, %v1201_v1  ;;  %v1200_v19 = vld [vmem:[#allocation4 + $0x630] sm:$0xff] }
 0x260   :  { %3681 = vmatprep.subr.bf16.mxu0 %v3680_v22  ;;  %3745 = vmatprep.subr.bf16.mxu1 %v3744_v27  ;;  %v1223_v22 = vld [vmem:[#allocation4 + $0x6e8] sm:$0xff]  ;;  %v1217_v27 = vld [vmem:[#allocation4 + $0x6b8] sm:$0xff]  ;;  %v3758_v30 = vpack.c.bf16 %v1208_v20, %v1200_v19 }
 0x261   :  { %v3696_v32 = vpack.c.bf16 %v1223_v22, %v1215_v21  ;;  %v1791_v19 = vld [vmem:[#allocation4 + $0x48] sm:$0xff]  ;;  %v1785_v20 = vld [vmem:[#allocation4 + $0x18] sm:$0xff] }
 0x262   :  { %v1793_v22 = vld [vmem:[#allocation4 + $0x58] sm:$0xff] }
 0x263   :  { %3683 = vmatpush1.bf16.msra.mxu0 %v3682_v35  ;;  %3747 = vmatpush1.bf16.msra.mxu1 %v3746_v25  ;;  %v3760_v35 = vpack.c.bf16 %v1225_v3, %v1217_v27  ;;  %v1216_v25 = vld [vmem:[#allocation4 + $0x6b0] sm:$0xff]  ;;  %v1782_v27 = vld [vmem:[#allocation4] sm:$0xff] }
 0x264   :  { %3685 = vmatprep.subr.bf16.mxu0 %v3684_v2  ;;  %3749 = vmatprep.subr.bf16.mxu1 %v3748_v42  ;;  %v1239_v2 = vld [vmem:[#allocation4 + $0x768] sm:$0xff]  ;;  %v1233_v42 = vld [vmem:[#allocation4 + $0x738] sm:$0xff]  ;;  %v3762_v48 = vpack.c.bf16 %v1224_v37, %v1216_v25  ;;  %v1790_v3 = vld [vmem:[#allocation4 + $0x40] sm:$0xff] }
 0x265   :  { %v3700_v53 = vpack.c.bf16 %v1239_v2, %v1231_v38  ;;  %v1807_v25 = vld [vmem:[#allocation4 + $0xc8] sm:$0xff]  ;;  %v1801_v37 = vld [vmem:[#allocation4 + $0x98] sm:$0xff]  ;;  %v1798_v2 = vld [vmem:[#allocation4 + $0x80] sm:$0xff] }
 0x266   :  { %v1809_v38 = vld [vmem:[#allocation4 + $0xd8] sm:$0xff] }
 0x267   :  { %3687 = vmatpush1.bf16.msra.mxu0 %v3686_v54  ;;  %3751 = vmatpush1.bf16.msra.mxu1 %v3750_v0  ;;  %v3764_v54 = vpack.c.bf16 %v1241_v43, %v1233_v42  ;;  %v1232_v0 = vld [vmem:[#allocation4 + $0x730] sm:$0xff]  ;;  %v1806_v42 = vld [vmem:[#allocation4 + $0xc0] sm:$0xff]  ;;  %v3840_v43 = vpack.c.bf16 %v1809_v38, %v1801_v37 }
 0x268   :  { %3689 = vmatprep.subr.bf16.mxu0 %v3688_v33  ;;  %3753 = vmatprep.subr.bf16.mxu1 %v3752_v62  ;;  %v1255_v33 = vld [vmem:[#allocation4 + $0x7e8] sm:$0xff]  ;;  %v1249_v62 = vld [vmem:[#allocation4 + $0x7b8] sm:$0xff]  ;;  %v3766_v4 = vpack.c.bf16 %v1240_v56, %v1232_v0  ;;  %v1856_v38 = vld [vmem:[#allocation4 + $0x250] sm:$0xff] }
 0x269   :  { %v3704_v1 = vpack.c.bf16 %v1255_v33, %v1247_v59  ;;  %v3768_v8 = vpack.c.bf16 %v1257_v63, %v1249_v62  ;;  %v1817_v0 = vld [vmem:[#allocation4 + $0x118] sm:$0xff]  ;;  %v1814_v33 = vld [vmem:[#allocation4 + $0x100] sm:$0xff] }
 0x26a   :  { %v1825_v59 = vld [vmem:[#allocation4 + $0x158] sm:$0xff]  ;;  %v1822_v62 = vld [vmem:[#allocation4 + $0x140] sm:$0xff] }
 0x26b   :  { %3691 = vmatpush1.bf16.msra.mxu0 %v3690_v9  ;;  %3755 = vmatpush1.bf16.msra.mxu1 %v3754_v12  ;;  %v1254_v9 = vld [vmem:[#allocation4 + $0x7e0] sm:$0xff]  ;;  %v1248_v12 = vld [vmem:[#allocation4 + $0x7b0] sm:$0xff]  ;;  %v3844_v63 = vpack.c.bf16 %v1825_v59, %v1817_v0 }
 0x26c   :  { %3693 = vmatprep.subr.bf16.mxu0 %v3692_v17  ;;  %3757 = vmatprep.subr.bf16.mxu1 %v3756_v18  ;;  %v3706_v14 = vpack.c.bf16 %v1254_v9, %v1246_v6  ;;  %v3770_v17 = vpack.c.bf16 %v1256_v13, %v1248_v12  ;;  %v1783_v18 = vld [vmem:[#allocation4 + $0x8] sm:$0xff]  ;;  %v1824_v6 = vld [vmem:[#allocation4 + $0x150] sm:$0xff]  ;;  %v1833_v12 = vld [vmem:[#allocation4 + $0x198] sm:$0xff] }
 0x26d   :  { %v3772_v21 = vpack.c.bf16 %v1791_v19, %v1783_v18  ;;  %v1839_v9 = vld [vmem:[#allocation4 + $0x1c8] sm:$0xff]  ;;  %v1838_v18 = vld [vmem:[#allocation4 + $0x1c0] sm:$0xff]  ;;  %v1872_v59 = vld [vmem:[#allocation4 + $0x2d0] sm:$0xff] }
 0x26f   :  { %3695 = vmatpush1.bf16.msra.mxu0 %v3694_v28  ;;  %3759 = vmatpush1.bf16.msra.mxu1 %v3758_v30  ;;  %v3836_v28 = vpack.c.bf16 %v1793_v22, %v1785_v20  ;;  %v3774_v30 = vpack.c.bf16 %v1790_v3, %v1782_v27  ;;  %v1840_v22 = vld [vmem:[#allocation4 + $0x1d0] sm:$0xff]  ;;  %v1847_v3 = vld [vmem:[#allocation4 + $0x208] sm:$0xff] }
 0x270   :  { %3697 = vmatprep.subr.bf16.mxu0 %v3696_v32  ;;  %3761 = vmatprep.subr.bf16.mxu1 %v3760_v35  ;;  %v3838_v32 = vpack.c.bf16 %v1792_v47, %v1784_v31  ;;  %v1799_v35 = vld [vmem:[#allocation4 + $0x88] sm:$0xff]  ;;  %v1857_v47 = vld [vmem:[#allocation4 + $0x258] sm:$0xff] }
 0x273   :  { %3699 = vmatpush1.bf16.msra.mxu0 %v3698_v34  ;;  %3763 = vmatpush1.bf16.msra.mxu1 %v3762_v48  ;;  %v3778_v34 = vpack.c.bf16 %v1806_v42, %v1798_v2  ;;  %v1800_v48 = vld [vmem:[#allocation4 + $0x90] sm:$0xff]  ;;  %v1863_v42 = vld [vmem:[#allocation4 + $0x288] sm:$0xff] }
 0x274   :  { %3701 = vmatprep.subr.bf16.mxu0 %v3700_v53  ;;  %3765 = vmatprep.subr.bf16.mxu1 %v3764_v54  ;;  %v3842_v51 = vpack.c.bf16 %v1808_v49, %v1800_v48  ;;  %v1815_v53 = vld [vmem:[#allocation4 + $0x108] sm:$0xff]  ;;  %v1873_v49 = vld [vmem:[#allocation4 + $0x2d8] sm:$0xff] }
 0x275   :  { %v1823_v54 = vld [vmem:[#allocation4 + $0x148] sm:$0xff] }
 0x276   :  { %v3780_v56 = vpack.c.bf16 %v1823_v54, %v1815_v53  ;;  %v1870_v53 = vld [vmem:[#allocation4 + $0x2c0] sm:$0xff] }
 0x277   :  { %3703 = vmatpush1.bf16.msra.mxu0 %v3702_v61  ;;  %3767 = vmatpush1.bf16.msra.mxu1 %v3766_v4  ;;  %v3782_v61 = vpack.c.bf16 %v1822_v62, %v1814_v33  ;;  %v1816_v4 = vld [vmem:[#allocation4 + $0x110] sm:$0xff]  ;;  %v1879_v62 = vld [vmem:[#allocation4 + $0x308] sm:$0xff] }
 0x278   :  { %3705 = vmatprep.subr.bf16.mxu0 %v3704_v1  ;;  %3769 = vmatprep.subr.bf16.mxu1 %v3768_v8  ;;  %v3846_v1 = vpack.c.bf16 %v1824_v6, %v1816_v4  ;;  %v1831_v8 = vld [vmem:[#allocation4 + $0x188] sm:$0xff]  ;;  %v1889_v6 = vld [vmem:[#allocation4 + $0x358] sm:$0xff] }
 0x279   :  { %v3784_v13 = vpack.c.bf16 %v1839_v9, %v1831_v8  ;;  %v1886_v8 = vld [vmem:[#allocation4 + $0x340] sm:$0xff] }
 0x27b   :  { %3707 = vmatpush1.bf16.msra.mxu0 %v3706_v14  ;;  %3771 = vmatpush1.bf16.msra.mxu1 %v3770_v17  ;;  %v1841_v14 = vld [vmem:[#allocation4 + $0x1d8] sm:$0xff]  ;;  %v1830_v17 = vld [vmem:[#allocation4 + $0x180] sm:$0xff] }
 0x27c   :  { %3773 = vmatprep.subr.bf16.mxu0 %v3772_v21  ;;  %3837 = vmatprep.subr.bf16.mxu1 %v3836_v28  ;;  %v3848_v19 = vpack.c.bf16 %v1841_v14, %v1833_v12  ;;  %v3786_v20 = vpack.c.bf16 %v1838_v18, %v1830_v17  ;;  %v1832_v21 = vld [vmem:[#allocation4 + $0x190] sm:$0xff]  ;;  %v1855_v28 = vld [vmem:[#allocation4 + $0x248] sm:$0xff] }
 0x27d   :  { %v3850_v27 = vpack.c.bf16 %v1840_v22, %v1832_v21  ;;  %v3788_v31 = vpack.c.bf16 %v1855_v28, %v1847_v3  ;;  %v1888_v14 = vld [vmem:[#allocation4 + $0x350] sm:$0xff]  ;;  %v1895_v18 = vld [vmem:[#allocation4 + $0x388] sm:$0xff]  ;;  %v1905_v22 = vld [vmem:[#allocation4 + $0x3d8] sm:$0xff] }
 0x27e   :  { %1507 = vmatmul.mubr.f32.vlgmr.msra.gmra.mrb[6].mxu0 %v4819_v58  ;;  %1578 = vmatmul.mubr.f32.vlgmr.msra.gmra.mrb[6].mxu1 %v4819_v58  ;;  %v3776_v58 = vpack.c.bf16 %v1807_v25, %v1799_v35  ;;  %v1854_v35 = vld [vmem:[#allocation4 + $0x240] sm:$0xff] }
 0x27f   :  { %3775 = vmatpush1.bf16.msra.mxu0 %v3774_v30  ;;  %3839 = vmatpush1.bf16.msra.mxu1 %v3838_v32  ;;  %v1849_v30 = vld [vmem:[#allocation4 + $0x218] sm:$0xff]  ;;  %v1846_v32 = vld [vmem:[#allocation4 + $0x200] sm:$0xff] }
 0x280   :  { %3777 = vmatprep.subr.bf16.mxu0 %v3776_v58  ;;  %3841 = vmatprep.subr.bf16.mxu1 %v3840_v43  ;;  %v3852_v25 = vpack.c.bf16 %v1857_v47, %v1849_v30  ;;  %v3790_v37 = vpack.c.bf16 %v1854_v35, %v1846_v32  ;;  %v1848_v58 = vld [vmem:[#allocation4 + $0x210] sm:$0xff]  ;;  %v1871_v43 = vld [vmem:[#allocation4 + $0x2c8] sm:$0xff]  ;;  %v1902_v3 = vld [vmem:[#allocation4 + $0x3c0] sm:$0xff] }
 0x281   :  { %v3854_v2 = vpack.c.bf16 %v1856_v38, %v1848_v58  ;;  %v3792_v48 = vpack.c.bf16 %v1871_v43, %v1863_v42  ;;  %v1904_v47 = vld [vmem:[#allocation4 + $0x3d0] sm:$0xff]  ;;  %v1911_v35 = vld [vmem:[#allocation4 + $0x408] sm:$0xff]  ;;  %v1921_v38 = vld [vmem:[#allocation4 + $0x458] sm:$0xff] }
 0x282   :  { %v1918_v42 = vld [vmem:[#allocation4 + $0x440] sm:$0xff] }
 0x283   :  { %3779 = vmatpush1.bf16.msra.mxu0 %v3778_v34  ;;  %3843 = vmatpush1.bf16.msra.mxu1 %v3842_v51  ;;  %v1865_v34 = vld [vmem:[#allocation4 + $0x298] sm:$0xff]  ;;  %v1862_v51 = vld [vmem:[#allocation4 + $0x280] sm:$0xff] }
 0x284   :  { %3781 = vmatprep.subr.bf16.mxu0 %v3780_v56  ;;  %3845 = vmatprep.subr.bf16.mxu1 %v3844_v63  ;;  %v3856_v54 = vpack.c.bf16 %v1873_v49, %v1865_v34  ;;  %v3794_v0 = vpack.c.bf16 %v1870_v53, %v1862_v51  ;;  %v1864_v56 = vld [vmem:[#allocation4 + $0x290] sm:$0xff]  ;;  %v1887_v63 = vld [vmem:[#allocation4 + $0x348] sm:$0xff] }
 0x285   :  { %v3858_v33 = vpack.c.bf16 %v1872_v59, %v1864_v56  ;;  %v3796_v4 = vpack.c.bf16 %v1887_v63, %v1879_v62  ;;  %v1920_v49 = vld [vmem:[#allocation4 + $0x450] sm:$0xff]  ;;  %v1927_v53 = vld [vmem:[#allocation4 + $0x488] sm:$0xff]  ;;  %v1937_v59 = vld [vmem:[#allocation4 + $0x4d8] sm:$0xff] }
 0x286   :  { %v1934_v62 = vld [vmem:[#allocation4 + $0x4c0] sm:$0xff] }
 0x287   :  { %3783 = vmatpush1.bf16.msra.mxu0 %v3782_v61  ;;  %3847 = vmatpush1.bf16.msra.mxu1 %v3846_v1  ;;  %v1881_v61 = vld [vmem:[#allocation4 + $0x318] sm:$0xff]  ;;  %v1878_v1 = vld [vmem:[#allocation4 + $0x300] sm:$0xff] }
 0x288   :  { %3785 = vmatprep.subr.bf16.mxu0 %v3784_v13  ;;  %3849 = vmatprep.subr.bf16.mxu1 %v3848_v19  ;;  %v3860_v9 = vpack.c.bf16 %v1889_v6, %v1881_v61  ;;  %v3798_v12 = vpack.c.bf16 %v1886_v8, %v1878_v1  ;;  %v1880_v13 = vld [vmem:[#allocation4 + $0x310] sm:$0xff]  ;;  %v1903_v19 = vld [vmem:[#allocation4 + $0x3c8] sm:$0xff] }
 0x289   :  { %v3862_v17 = vpack.c.bf16 %v1888_v14, %v1880_v13  ;;  %v3800_v21 = vpack.c.bf16 %v1903_v19, %v1895_v18  ;;  %v1936_v6 = vld [vmem:[#allocation4 + $0x4d0] sm:$0xff]  ;;  %v1943_v8 = vld [vmem:[#allocation4 + $0x508] sm:$0xff]  ;;  %v1953_v14 = vld [vmem:[#allocation4 + $0x558] sm:$0xff] }
 0x28a   :  { %v1950_v18 = vld [vmem:[#allocation4 + $0x540] sm:$0xff] }
 0x28b   :  { %3787 = vmatpush1.bf16.msra.mxu0 %v3786_v20  ;;  %3851 = vmatpush1.bf16.msra.mxu1 %v3850_v27  ;;  %v1897_v20 = vld [vmem:[#allocation4 + $0x398] sm:$0xff]  ;;  %v1894_v27 = vld [vmem:[#allocation4 + $0x380] sm:$0xff] }
 0x28c   :  { %3789 = vmatprep.subr.bf16.mxu0 %v3788_v31  ;;  %3853 = vmatprep.subr.bf16.mxu1 %v3852_v25  ;;  %v3864_v28 = vpack.c.bf16 %v1905_v22, %v1897_v20  ;;  %v3802_v30 = vpack.c.bf16 %v1902_v3, %v1894_v27  ;;  %v1896_v31 = vld [vmem:[#allocation4 + $0x390] sm:$0xff]  ;;  %v1919_v25 = vld [vmem:[#allocation4 + $0x448] sm:$0xff] }
 0x28d   :  { %v3866_v32 = vpack.c.bf16 %v1904_v47, %v1896_v31  ;;  %v3804_v58 = vpack.c.bf16 %v1919_v25, %v1911_v35  ;;  %v1952_v22 = vld [vmem:[#allocation4 + $0x550] sm:$0xff]  ;;  %v1959_v3 = vld [vmem:[#allocation4 + $0x588] sm:$0xff]  ;;  %v1969_v47 = vld [vmem:[#allocation4 + $0x5d8] sm:$0xff] }
 0x28e   :  { %v1966_v35 = vld [vmem:[#allocation4 + $0x5c0] sm:$0xff] }
 0x28f   :  { %3791 = vmatpush1.bf16.msra.mxu0 %v3790_v37  ;;  %3855 = vmatpush1.bf16.msra.mxu1 %v3854_v2  ;;  %v1913_v37 = vld [vmem:[#allocation4 + $0x418] sm:$0xff]  ;;  %v1910_v2 = vld [vmem:[#allocation4 + $0x400] sm:$0xff] }
 0x290   :  { %3793 = vmatprep.subr.bf16.mxu0 %v3792_v48  ;;  %3857 = vmatprep.subr.bf16.mxu1 %v3856_v54  ;;  %v3868_v43 = vpack.c.bf16 %v1921_v38, %v1913_v37  ;;  %v3806_v34 = vpack.c.bf16 %v1918_v42, %v1910_v2  ;;  %v1912_v48 = vld [vmem:[#allocation4 + $0x410] sm:$0xff]  ;;  %v1935_v54 = vld [vmem:[#allocation4 + $0x4c8] sm:$0xff] }
 0x291   :  { %v3870_v51 = vpack.c.bf16 %v1920_v49, %v1912_v48  ;;  %v3808_v56 = vpack.c.bf16 %v1935_v54, %v1927_v53  ;;  %v1968_v38 = vld [vmem:[#allocation4 + $0x5d0] sm:$0xff]  ;;  %v1975_v42 = vld [vmem:[#allocation4 + $0x608] sm:$0xff]  ;;  %v1985_v49 = vld [vmem:[#allocation4 + $0x658] sm:$0xff] }
 0x292   :  { %v1982_v53 = vld [vmem:[#allocation4 + $0x640] sm:$0xff] }
 0x293   :  { %3795 = vmatpush1.bf16.msra.mxu0 %v3794_v0  ;;  %3859 = vmatpush1.bf16.msra.mxu1 %v3858_v33  ;;  %v1929_v0 = vld [vmem:[#allocation4 + $0x498] sm:$0xff]  ;;  %v1926_v33 = vld [vmem:[#allocation4 + $0x480] sm:$0xff] }
 0x294   :  { %3797 = vmatprep.subr.bf16.mxu0 %v3796_v4  ;;  %3861 = vmatprep.subr.bf16.mxu1 %v3860_v9  ;;  %v3872_v63 = vpack.c.bf16 %v1937_v59, %v1929_v0  ;;  %v3810_v61 = vpack.c.bf16 %v1934_v62, %v1926_v33  ;;  %v1928_v4 = vld [vmem:[#allocation4 + $0x490] sm:$0xff]  ;;  %v1951_v9 = vld [vmem:[#allocation4 + $0x548] sm:$0xff]  ;;  %v4828_v33 = vld [vmem:[%s5045_s2] sm:$0xff] }
 0x295   :  { %v3874_v1 = vpack.c.bf16 %v1936_v6, %v1928_v4  ;;  %v3812_v13 = vpack.c.bf16 %v1951_v9, %v1943_v8  ;;  %v1984_v59 = vld [vmem:[#allocation4 + $0x650] sm:$0xff]  ;;  %v1993_v4 = vld [vmem:[#allocation4 + $0x698] sm:$0xff]  ;;  %v1990_v8 = vld [vmem:[#allocation4 + $0x680] sm:$0xff] }
 0x296   :  { %v1998_v9 = vld [vmem:[#allocation4 + $0x6c0] sm:$0xff] }
 0x297   :  { %3799 = vmatpush1.bf16.msra.mxu0 %v3798_v12  ;;  %3863 = vmatpush1.bf16.msra.mxu1 %v3862_v17  ;;  %v1945_v12 = vld [vmem:[#allocation4 + $0x518] sm:$0xff]  ;;  %v1942_v17 = vld [vmem:[#allocation4 + $0x500] sm:$0xff] }
 0x298   :  { %3801 = vmatprep.subr.bf16.mxu0 %v3800_v21  ;;  %3865 = vmatprep.subr.bf16.mxu1 %v3864_v28  ;;  %v3876_v19 = vpack.c.bf16 %v1953_v14, %v1945_v12  ;;  %v3814_v20 = vpack.c.bf16 %v1950_v18, %v1942_v17  ;;  %v1944_v21 = vld [vmem:[#allocation4 + $0x510] sm:$0xff]  ;;  %v1967_v28 = vld [vmem:[#allocation4 + $0x5c8] sm:$0xff]  ;;  %v1263_v18 = vrot.slane %v4828_v33, %v4700_v44 }
 0x299   :  { %v3878_v27 = vpack.c.bf16 %v1952_v22, %v1944_v21  ;;  %v3816_v31 = vpack.c.bf16 %v1967_v28, %v1959_v3  ;;  %v1992_v14 = vld [vmem:[#allocation4 + $0x690] sm:$0xff]  ;;  %v2015_v21 = vld [vmem:[#allocation4 + $0x748] sm:$0xff]  ;;  %v2009_v22 = vld [vmem:[#allocation4 + $0x718] sm:$0xff] }
 0x29a   :  { %v2000_v17 = vld [vmem:[#allocation4 + $0x6d0] sm:$0xff]  ;;  %v2017_v3 = vld [vmem:[#allocation4 + $0x758] sm:$0xff]  ;;  %v2006_v28 = vld [vmem:[#allocation4 + $0x700] sm:$0xff] }
 0x29b   :  { %3803 = vmatpush1.bf16.msra.mxu0 %v3802_v30  ;;  %3867 = vmatpush1.bf16.msra.mxu1 %v3866_v32  ;;  %v1961_v30 = vld [vmem:[#allocation4 + $0x598] sm:$0xff]  ;;  %v1958_v32 = vld [vmem:[#allocation4 + $0x580] sm:$0xff] }
 0x29c   :  { %3805 = vmatprep.subr.bf16.mxu0 %v3804_v58  ;;  %3869 = vmatprep.subr.bf16.mxu1 %v3868_v43  ;;  %v3880_v25 = vpack.c.bf16 %v1969_v47, %v1961_v30  ;;  %v3818_v37 = vpack.c.bf16 %v1966_v35, %v1958_v32  ;;  %v1960_v58 = vld [vmem:[#allocation4 + $0x590] sm:$0xff]  ;;  %v1983_v43 = vld [vmem:[#allocation4 + $0x648] sm:$0xff]  ;;  %v2014_v30 = vld [vmem:[#allocation4 + $0x740] sm:$0xff]  ;;  %v3892_v32 = vpack.c.bf16 %v2017_v3, %v2009_v22 }
 0x29d   :  { %v3882_v2 = vpack.c.bf16 %v1968_v38, %v1960_v58  ;;  %v3820_v48 = vpack.c.bf16 %v1983_v43, %v1975_v42  ;;  %v3830_v35 = vpack.c.bf16 %v2014_v30, %v2006_v28  ;;  %v2023_v43 = vld [vmem:[#allocation4 + $0x788] sm:$0xff]  ;;  %v1275_v22 = vrot.slane %v4828_v33, %v4708_v50 }
 0x29e   :  { %v4843_v30 = vld [vmem:[%s5048_s5 + $0x10] sm:$0xff] }
 0x29f   :  { %3807 = vmatpush1.bf16.msra.mxu0 %v3806_v34  ;;  %3871 = vmatpush1.bf16.msra.mxu1 %v3870_v51  ;;  %v1977_v34 = vld [vmem:[#allocation4 + $0x618] sm:$0xff]  ;;  %v1974_v51 = vld [vmem:[#allocation4 + $0x600] sm:$0xff] }
 0x2a0   :  { %3809 = vmatprep.subr.bf16.mxu0 %v3808_v56  ;;  %3873 = vmatprep.subr.bf16.mxu1 %v3872_v63  ;;  %v3884_v54 = vpack.c.bf16 %v1985_v49, %v1977_v34  ;;  %v3822_v0 = vpack.c.bf16 %v1982_v53, %v1974_v51  ;;  %v1976_v56 = vld [vmem:[#allocation4 + $0x610] sm:$0xff]  ;;  %v1991_v63 = vld [vmem:[#allocation4 + $0x688] sm:$0xff]  ;;  %v2033_v53 = vld [vmem:[#allocation4 + $0x7d8] sm:$0xff] }
 0x2a1   :  { %v3886_v62 = vpack.c.bf16 %v1984_v59, %v1976_v56  ;;  %v2031_v34 = vld [vmem:[#allocation4 + $0x7c8] sm:$0xff] }
 0x2a2   :  { %v3832_v51 = vpack.c.bf16 %v2031_v34, %v2023_v43 }
 0x2a3   :  { %3811 = vmatpush1.bf16.msra.mxu0 %v3810_v61  ;;  %3875 = vmatpush1.bf16.msra.mxu1 %v3874_v1  ;;  %v1999_v61 = vld [vmem:[#allocation4 + $0x6c8] sm:$0xff]  ;;  %v2001_v1 = vld [vmem:[#allocation4 + $0x6d8] sm:$0xff] }
 0x2a4   :  { %3813 = vmatprep.subr.bf16.mxu0 %v3812_v13  ;;  %3877 = vmatprep.subr.bf16.mxu1 %v3876_v19  ;;  %v3824_v6 = vpack.c.bf16 %v1999_v61, %v1991_v63  ;;  %v3888_v12 = vpack.c.bf16 %v2001_v1, %v1993_v4  ;;  %v3826_v13 = vpack.c.bf16 %v1998_v9, %v1990_v8  ;;  %v2032_v63 = vld [vmem:[#allocation4 + $0x7d0] sm:$0xff]  ;;  %v1787_v4 = vld [vmem:[#allocation4 + $0x28] sm:$0xff]  ;;  %v1789_v1 = vld [vmem:[#allocation4 + $0x38] sm:$0xff] }
 0x2a5   :  { %v3890_v19 = vpack.c.bf16 %v2000_v17, %v1992_v14  ;;  %v1797_v9 = vld [vmem:[#allocation4 + $0x78] sm:$0xff] }
 0x2a7   :  { %3815 = vmatpush1.bf16.msra.mxu0 %v3814_v20  ;;  %3879 = vmatpush1.bf16.msra.mxu1 %v3878_v27  ;;  %v2007_v20 = vld [vmem:[#allocation4 + $0x708] sm:$0xff] }
 0x2a8   :  { %3817 = vmatprep.subr.bf16.mxu0 %v3816_v31  ;;  %3881 = vmatprep.subr.bf16.mxu1 %v3880_v25  ;;  %v3828_v27 = vpack.c.bf16 %v2015_v21, %v2007_v20  ;;  %v2008_v25 = vld [vmem:[#allocation4 + $0x710] sm:$0xff] }
 0x2ab   :  { %3819 = vmatpush1.bf16.msra.mxu0 %v3818_v37  ;;  %3883 = vmatpush1.bf16.msra.mxu1 %v3882_v2  ;;  %v2016_v37 = vld [vmem:[#allocation4 + $0x750] sm:$0xff] }
 0x2ac   :  { %3821 = vmatprep.subr.bf16.mxu0 %v3820_v48  ;;  %3885 = vmatprep.subr.bf16.mxu1 %v3884_v54  ;;  %v3894_v42 = vpack.c.bf16 %v2016_v37, %v2008_v25  ;;  %v2025_v48 = vld [vmem:[#allocation4 + $0x798] sm:$0xff]  ;;  %v2022_v54 = vld [vmem:[#allocation4 + $0x780] sm:$0xff]  ;;  %v1291_v25 = vrot.slane %v4828_v33, %v4728_v15 }
 0x2ad   :  { %v3896_v56 = vpack.c.bf16 %v2033_v53, %v2025_v48 }
 0x2af   :  { %3823 = vmatpush1.bf16.msra.mxu0 %v3822_v0  ;;  %3887 = vmatpush1.bf16.msra.mxu1 %v3886_v62  ;;  %v2030_v0 = vld [vmem:[#allocation4 + $0x7c0] sm:$0xff]  ;;  %v2024_v62 = vld [vmem:[#allocation4 + $0x790] sm:$0xff] }
 0x2b0   :  { %3825 = vmatprep.subr.bf16.mxu0 %v3824_v6  ;;  %3889 = vmatprep.subr.bf16.mxu1 %v3888_v12  ;;  %v3834_v59 = vpack.c.bf16 %v2030_v0, %v2022_v54  ;;  %v3898_v61 = vpack.c.bf16 %v2032_v63, %v2024_v62  ;;  %v1795_v6 = vld [vmem:[#allocation4 + $0x68] sm:$0xff]  ;;  %v3964_v12 = vpack.c.bf16 %v1797_v9, %v1789_v1 }
 0x2b1   :  { %v3900_v8 = vpack.c.bf16 %v1795_v6, %v1787_v4  ;;  %v1267_v0 = vrot.slane %v4828_v33, %v4702_v45  ;;  %v927_v63 = vrot.slane %v4843_v30, %v4708_v50  ;;  %v2428_v4 = vld [vmem:[#allocation6 + $0x18] sm:$0xff] }
 0x2b2   :  { %2433 = vperm.xlu1 %4327, %v2428_v4   ;;  %2465 = vperm.xlu0 %4329, %v2428_v4  }
 0x2b3   :  { %3827 = vmatpush1.bf16.msra.mxu0 %v3826_v13  ;;  %3891 = vmatpush1.bf16.msra.mxu1 %v3890_v19  ;;  %v1271_v13 = vrot.slane %v4828_v33, %v4704_v46 }
 0x2b4   :  { %3829 = vmatprep.subr.bf16.mxu0 %v3828_v27  ;;  %3893 = vmatprep.subr.bf16.mxu1 %v3892_v32  ;;  %v1287_v32 = vrot.slane %v4828_v33, %v4724_v5 }
 0x2b6   :  { %4328 = vset.pattern.permute.xlu1 %v4574_v24  ;;  %4332 = vset.pattern.permute.xlu0 %v4576_v40  ;;  %v975_v40 = vrot.slane %v4843_v30, %v4724_v5 }
 0x2b7   :  { %3831 = vmatpush1.bf16.msra.mxu0 %v3830_v35  ;;  %3895 = vmatpush1.bf16.msra.mxu1 %v3894_v42  ;;  %v1283_v35 = vrot.slane %v4828_v33, %v4716_v57 }
 0x2b8   :  { %3833 = vmatprep.subr.bf16.mxu0 %v3832_v51  ;;  %3897 = vmatprep.subr.bf16.mxu1 %v3896_v56  ;;  %v911_v51 = vrot.slane %v4843_v30, %v4704_v46 }
 0x2b9   :  { %2449 = vperm.xlu1 %4328, %v2428_v4   ;;  %2513 = vperm.xlu0 %4332, %v2428_v4  }
 0x2ba   :  { %v916_v62 = vmul.f32 %v911_v51, %v4786_v7 }
 0x2bb   :  { %3835 = vmatpush1.bf16.msra.mxu0 %v3834_v59  ;;  %3899 = vmatpush1.bf16.msra.mxu1 %v3898_v61 }
 0x2bc   :  { %3901 = vmatprep.subr.bf16.mxu0 %v3900_v8  ;;  %3965 = vmatprep.subr.bf16.mxu1 %v3964_v12  ;;  %v943_v8 = vrot.slane %v4843_v30, %v4712_v52 }
 0x2bd   :  { %4330 = vset.pattern.permute.xlu1 %v4573_v23  ;;  %4335 = vset.pattern.permute.xlu0 %v4578_v11 }
 0x2be   :  { %2481 = vperm.xlu1 %4330, %v2428_v4  }
 0x2c2   :  { %4331 = vset.pattern.permute.xlu1 %v4575_v39 }
 0x2c3   :  { %2497 = vperm.xlu1 %4331, %v2428_v4  }
 0x2c7   :  { %4333 = vset.pattern.permute.xlu1 %v4577_v55 }
 0x2c8   :  { %2529 = vperm.xlu1 %4333, %v2428_v4  }
 0x2cc   :  { %4334 = vset.pattern.permute.xlu1 %v4578_v11 }
 0x2cd   :  { %2545 = vperm.xlu1 %4334, %v2428_v4   ;;  %v4903_v4 = vpop.permute.xlu0 %1669 }
 0x311   :  { %v1366_v31 = vpop.f32.mrb[4].mxu0  ;;  %v1437_v47 = vpop.f32.mrb[4].mxu1 }
 0x312   :  { %v1367_v58 = vadd.f32 %v1366_v31, %v1263_v18  ;;  %v1439_v38 = vpop.f32.mrb[5].mxu1  ;;  %v4832_v2 = vpop.f32.mrb[5].mxu0  ;;  %v1438_v14 = vadd.f32 %v1437_v47, %v1271_v13  ;;  %v895_v31 = vrot.slane %v4843_v30, %v4702_v45  ;;  %v879_v47 = vrot.slane %v4843_v30, %v4700_v44 }
 0x313   :  { %v1440_v27 = vadd.f32 %v1439_v38, %v1275_v22  ;;  %v1369_v61 = vadd.f32 %v4832_v2, %v1267_v0 }
 0x314   :  { %v3232_v49 = vmul.f32 -1.442695, %v1367_v58  ;;  %v900_v58 = vmul.f32 %v895_v31, %v4784_v60  ;;  %v884_v38 = vmul.f32 %v879_v47, %v4788_v10  ;;  %v1279_v60 = vrot.slane %v4828_v33, %v4712_v52 }
 0x315   :  { %v3235_v3 = vmul.f32 -1.442695, %v1440_v27  ;;  %v932_v33 = vmul.f32 %v927_v63, %v4803_v26  ;;  %v3233_v9 = vmul.f32 -1.442695, %v1369_v61 }
 0x316   :  { %4368 = vpow2.f32 %v3232_v49  ;;  %v902_v59 = vadd.f32 %v900_v58, %v884_v38 }
 0x317   :  { %4370 = vtanh.f32 %v1438_v14  ;;  %v948_v14 = vmul.f32 %v943_v8, %v4796_v16 }
 0x318   :  { %v918_v6 = vadd.f32 %v916_v62, %v902_v59 }
 0x31a   :  { %v934_v12 = vadd.f32 %v932_v33, %v918_v6 }
 0x31c   :  { %v950_v26 = vadd.f32 %v948_v14, %v934_v12 }
 0x320   :  { %v4369_v17 = vpop.eup %4368 }
 0x321   :  { %v1587_v18 = vadd.f32 1.0, %v4369_v17  ;;  %v4371_v19 = vpop.eup %4370  ;;  %v959_v17 = vrot.slane %v4843_v30, %v4716_v57 }
 0x323   :  { %4372 = vrcp.f32 %v1587_v18  ;;  %v964_v24 = vmul.f32 %v959_v17, %v4807_v29  ;;  %v4914_v17 = vpop.permute.xlu0 %1717 }
 0x324   :  { %4374 = vpow2.f32 %v3235_v3  ;;  %v991_v3 = vrot.slane %v4843_v30, %v4728_v15  ;;  %v1636_v30 = vld [vmem:[#allocation7 + $0x28] sm:$0xff] }
 0x325   :  { %v966_v27 = vadd.f32 %v964_v24, %v950_v26 }
 0x326   :  { %v996_v29 = vmul.f32 %v991_v3, %v4816_v41  ;;  %v1786_v3 = vld [vmem:[#allocation4 + $0x20] sm:$0xff] }
 0x32d   :  { %v4373_v20 = vpop.eup %4372 }
 0x32e   :  { %v4836_v21 = vmul.f32 %v4373_v20, %v4371_v19  ;;  %v4375_v28 = vpop.eup %4374 }
 0x32f   :  { %v1611_v37 = vadd.f32 1.0, %v4375_v28  ;;  %v980_v28 = vmul.f32 %v975_v40, %v4813_v36  ;;  %v1635_v36 = vld [vmem:[#allocation7 + $0x20] sm:$0xff] }
 0x331   :  { %4376 = vrcp.f32 %v1611_v37  ;;  %v982_v23 = vadd.f32 %v980_v28, %v966_v27  ;;  %v4923_v28 = vpop.permute.xlu0 %1765 }
 0x33b   :  { %v4377_v13 = vpop.eup %4376 }
 0x351   :  { %v1508_v42 = vpop.f32.mrb[6].mxu0  ;;  %v1579_v43 = vpop.f32.mrb[6].mxu1 }
 0x352   :  { %v1580_v34 = vadd.f32 %v1579_v43, %v1287_v32  ;;  %v1510_v48 = vpop.f32.mrb[7].mxu0  ;;  %v1581_v49 = vpop.f32.mrb[7].mxu1  ;;  %v1509_v1 = vadd.f32 %v1508_v42, %v1279_v60  ;;  %v998_v32 = vadd.f32 %v996_v29, %v982_v23  ;;  %v1794_v23 = vld [vmem:[#allocation4 + $0x60] sm:$0xff] }
 0x353   :  { %v1511_v53 = vadd.f32 %v1510_v48, %v1283_v35  ;;  %v1582_v54 = vadd.f32 %v1581_v49, %v1291_v25  ;;  %v4891_v48 = vpop.permute.xlu1 %1653 }
 0x354   :  { %v3234_v56 = vmul.f32 -1.442695, %v1580_v34  ;;  %v3236_v7 = vmul.f32 -1.442695, %v1509_v1 }
 0x355   :  { %4378 = vtanh.f32 %v1511_v53  ;;  %v3237_v10 = vmul.f32 -1.442695, %v1582_v54 }
 0x356   :  { %4380 = vpow2.f32 %v3234_v56 }
 0x357   :  { %4382 = vpow2.f32 %v3237_v10  ;;  %v4893_v11 = vpop.permute.xlu1 %1685 }
 0x358   :  { %4384 = vpow2.f32 %v3233_v9 }
 0x359   :  { %4386 = vpow2.f32 %v3236_v7 }
 0x35b   :  { %v4895_v10 = vpop.permute.xlu1 %1701 }
 0x35f   :  { %v4379_v2 = vpop.eup %4378  ;;  %v4910_v7 = vpop.permute.xlu1 %1733 }
 0x360   :  { %v1627_v18 = vmul.f32 %v4379_v2, %v4377_v13  ;;  %v4381_v19 = vpop.eup %4380 }
 0x361   :  { %v4383_v20 = vpop.eup %4382  ;;  %v1600_v22 = vadd.f32 1.0, %v4381_v19 }
 0x362   :  { %v1624_v16 = vadd.f32 1.0, %v4383_v20  ;;  %v4385_v31 = vpop.eup %4384 }
 0x363   :  { %4388 = vrcp.f32 %v1600_v22  ;;  %v4387_v47 = vpop.eup %4386  ;;  %v1593_v35 = vadd.f32 1.0, %v4385_v31  ;;  %v4920_v40 = vpop.permute.xlu1 %1749  ;;  %v1788_v31 = vld [vmem:[#allocation4 + $0x30] sm:$0xff] }
 0x364   :  { %4390 = vrcp.f32 %v1624_v16  ;;  %v1617_v37 = vadd.f32 1.0, %v4387_v47  ;;  %v1796_v47 = vld [vmem:[#allocation4 + $0x70] sm:$0xff] }
 0x365   :  { %4392 = vrcp.f32 %v1593_v35  ;;  %v1803_v35 = vld [vmem:[#allocation4 + $0xa8] sm:$0xff] }
 0x366   :  { %4394 = vrcp.f32 %v1617_v37  ;;  %v1805_v37 = vld [vmem:[#allocation4 + $0xb8] sm:$0xff] }
 0x36d   :  { %v4389_v25 = vpop.eup %4388 }
 0x36e   :  { %v4391_v58 = vpop.eup %4390  ;;  %v1604_v38 = vmul.f32 %v4389_v25, %v998_v32  ;;  %v1811_v25 = vld [vmem:[#allocation4 + $0xe8] sm:$0xff] }
 0x36f   :  { %v1628_v42 = vmul.f32 %v4391_v58, %v998_v32  ;;  %v4393_v49 = vpop.eup %4392  ;;  %v1813_v58 = vld [vmem:[#allocation4 + $0xf8] sm:$0xff] }
 0x370   :  { %v1605_v39 = vadd.f32 %v1604_v38, %v4836_v21  ;;  %v4395_v51 = vpop.eup %4394 }
 0x371   :  { %v1629_v43 = vadd.f32 %v1628_v42, %v1627_v18  ;;  %v3902_v42 = vpack.c.bf16 %v1794_v23, %v1786_v3 }
 0x372   :  { %4396 = vtanh.f32 %v1605_v39  ;;  %v1638_v55 = vmul.f32 %v1636_v30, %v1605_v39  ;;  %v3966_v39 = vpack.c.bf16 %v1796_v47, %v1788_v31  ;;  %v1850_v31 = vld [vmem:[#allocation4 + $0x220] sm:$0xff] }
 0x373   :  { %4398 = vtanh.f32 %v1629_v43  ;;  %v1637_v41 = vmul.f32 %v1635_v36, %v1629_v43  ;;  %v1810_v43 = vld [vmem:[#allocation4 + $0xe0] sm:$0xff] }
 0x374   :  { %v1858_v47 = vld [vmem:[#allocation4 + $0x260] sm:$0xff] }
 0x375   :  { %v1639_v34 = vadd.f32 %v1638_v55, %v1637_v41  ;;  %v1804_v55 = vld [vmem:[#allocation4 + $0xb0] sm:$0xff] }
 0x376   :  { %v1812_v41 = vld [vmem:[#allocation4 + $0xf0] sm:$0xff] }
 0x377   :  { %3238 = vst [vmem:[%s5048_s5 + $0x20] sm:$0xff] %v1639_v34  ;;  %v1819_v34 = vld [vmem:[#allocation4 + $0x128] sm:$0xff] }
 0x37c   :  { %v4397_v21 = vpop.eup %4396 }
 0x37d   :  { %v4399_v53 = vpop.eup %4398  ;;  %v1607_v54 = vmul.f32 %v4397_v21, %v4393_v49  ;;  %v3904_v49 = vpack.c.bf16 %v1811_v25, %v1803_v35  ;;  %v1827_v21 = vld [vmem:[#allocation4 + $0x168] sm:$0xff]  ;;  %v1852_v35 = vld [vmem:[#allocation4 + $0x230] sm:$0xff] }
 0x37e   :  { %v1631_v0 = vmul.f32 %v4399_v53, %v4395_v51  ;;  %v3968_v51 = vpack.c.bf16 %v1813_v58, %v1805_v37  ;;  %v1821_v53 = vld [vmem:[#allocation4 + $0x138] sm:$0xff]  ;;  %v1860_v25 = vld [vmem:[#allocation4 + $0x270] sm:$0xff]  ;;  %v1867_v37 = vld [vmem:[#allocation4 + $0x2a8] sm:$0xff] }
 0x37f   :  { %v1644_v56 = vmul.f32 %v1636_v30, %v1607_v54  ;;  %v4926_v30 = vld [vmem:[#allocation2 + $0x18] sm:$0xff]  ;;  %v1829_v54 = vld [vmem:[#allocation4 + $0x178] sm:$0xff]  ;;  %v1875_v58 = vld [vmem:[#allocation4 + $0x2e8] sm:$0xff] }
 0x380   :  { %v1643_v59 = vmul.f32 %v1635_v36, %v1631_v0  ;;  %v1802_v36 = vld [vmem:[#allocation4 + $0xa0] sm:$0xff] }
 0x381   :  { %v3906_v0 = vpack.c.bf16 %v1810_v43, %v1802_v36  ;;  %v3982_v36 = vpack.c.bf16 %v1860_v25, %v1852_v35  ;;  %v1866_v43 = vld [vmem:[#allocation4 + $0x2a0] sm:$0xff]  ;;  %v1916_v25 = vld [vmem:[#allocation4 + $0x430] sm:$0xff] }
 0x382   :  { %v1645_v60 = vadd.f32 %v1644_v56, %v1643_v59  ;;  %v3970_v56 = vpack.c.bf16 %v1812_v41, %v1804_v55  ;;  %v1818_v59 = vld [vmem:[#allocation4 + $0x120] sm:$0xff]  ;;  %v3920_v41 = vpack.c.bf16 %v1875_v58, %v1867_v37  ;;  %v1924_v37 = vld [vmem:[#allocation4 + $0x470] sm:$0xff]  ;;  %v1931_v58 = vld [vmem:[#allocation4 + $0x4a8] sm:$0xff] }
 0x383   :  { %v1874_v55 = vld [vmem:[#allocation4 + $0x2e0] sm:$0xff] }
 0x384   :  { %3239 = vst [vmem:[%s5048_s5 + $0x28] sm:$0xff] %v1645_v60  ;;  %v1663_v62 = vrot.slane %v1645_v60, %v4700_v44  ;;  %v1695_v63 = vrot.slane %v1645_v60, %v4704_v46  ;;  %v1679_v61 = vrot.slane %v1645_v60, %v4702_v45  ;;  %v1711_v1 = vrot.slane %v1645_v60, %v4708_v50 }
 0x385   :  { %v1727_v12 = vrot.slane %v1645_v60, %v4712_v52  ;;  %v1743_v14 = vrot.slane %v1645_v60, %v4716_v57  ;;  %v1759_v26 = vrot.slane %v1645_v60, %v4724_v5  ;;  %v1775_v24 = vrot.slane %v1645_v60, %v4728_v15  ;;  %v1826_v60 = vld [vmem:[#allocation4 + $0x160] sm:$0xff] }
 0x386   :  { %v1665_v6 = vmul.f32 %v1663_v62, %v4891_v48  ;;  %v1681_v8 = vmul.f32 %v1679_v61, %v4903_v4  ;;  %v1697_v33 = vmul.f32 %v1695_v63, %v4893_v11  ;;  %v1713_v13 = vmul.f32 %v1711_v1, %v4895_v10  ;;  %v1820_v61 = vld [vmem:[#allocation4 + $0x130] sm:$0xff]  ;;  %v1835_v1 = vld [vmem:[#allocation4 + $0x1a8] sm:$0xff] }
 0x387   :  { %v1729_v19 = vmul.f32 %v1727_v12, %v4914_v17  ;;  %v1745_v20 = vmul.f32 %v1743_v14, %v4910_v7  ;;  %v1761_v27 = vmul.f32 %v1759_v26, %v4920_v40  ;;  %v1777_v32 = vmul.f32 %v1775_v24, %v4923_v28  ;;  %v1842_v14 = vld [vmem:[#allocation4 + $0x1e0] sm:$0xff]  ;;  %v1836_v26 = vld [vmem:[#allocation4 + $0x1b0] sm:$0xff]  ;;  %v1859_v24 = vld [vmem:[#allocation4 + $0x268] sm:$0xff] }
 0x388   :  { %v1683_v9 = vadd.f32 %v1681_v8, %v1665_v6  ;;  %v3908_v62 = vpack.c.bf16 %v1827_v21, %v1819_v34  ;;  %v3972_v63 = vpack.c.bf16 %v1829_v54, %v1821_v53  ;;  %v1828_v6 = vld [vmem:[#allocation4 + $0x170] sm:$0xff]  ;;  %v1843_v8 = vld [vmem:[#allocation4 + $0x1e8] sm:$0xff]  ;;  %v3910_v12 = vpack.c.bf16 %v1826_v60, %v1818_v59  ;;  %v1885_v54 = vld [vmem:[#allocation4 + $0x338] sm:$0xff] }
 0x389   :  { %v1883_v21 = vld [vmem:[#allocation4 + $0x328] sm:$0xff]  ;;  %v1882_v60 = vld [vmem:[#allocation4 + $0x320] sm:$0xff] }
 0x38a   :  { %v1699_v2 = vadd.f32 %v1697_v33, %v1683_v9  ;;  %v1837_v33 = vld [vmem:[#allocation4 + $0x1b8] sm:$0xff]  ;;  %v1891_v53 = vld [vmem:[#allocation4 + $0x368] sm:$0xff] }
 0x38b   :  { %v1845_v9 = vld [vmem:[#allocation4 + $0x1f8] sm:$0xff] }
 0x38c   :  { %v1715_v18 = vadd.f32 %v1713_v13, %v1699_v2  ;;  %v3974_v13 = vpack.c.bf16 %v1828_v6, %v1820_v61  ;;  %v1834_v2 = vld [vmem:[#allocation4 + $0x1a0] sm:$0xff]  ;;  %v1884_v6 = vld [vmem:[#allocation4 + $0x330] sm:$0xff] }
 0x38d   :  { %v3914_v3 = vpack.c.bf16 %v1842_v14, %v1834_v2  ;;  %v1898_v14 = vld [vmem:[#allocation4 + $0x3a0] sm:$0xff] }
 0x38e   :  { %v1731_v22 = vadd.f32 %v1729_v19, %v1715_v18  ;;  %v3912_v18 = vpack.c.bf16 %v1843_v8, %v1835_v1  ;;  %v3976_v19 = vpack.c.bf16 %v1845_v9, %v1837_v33  ;;  %v1892_v1 = vld [vmem:[#allocation4 + $0x370] sm:$0xff]  ;;  %v1899_v8 = vld [vmem:[#allocation4 + $0x3a8] sm:$0xff]  ;;  %v1901_v9 = vld [vmem:[#allocation4 + $0x3b8] sm:$0xff] }
 0x38f   :  { %v1907_v33 = vld [vmem:[#allocation4 + $0x3e8] sm:$0xff]  ;;  %v3990_v2 = vpack.c.bf16 %v1892_v1, %v1884_v6  ;;  %v1948_v1 = vld [vmem:[#allocation4 + $0x530] sm:$0xff] }
 0x390   :  { %v1747_v16 = vadd.f32 %v1745_v20, %v1731_v22  ;;  %v1844_v20 = vld [vmem:[#allocation4 + $0x1f0] sm:$0xff]  ;;  %v1851_v22 = vld [vmem:[#allocation4 + $0x228] sm:$0xff] }
 0x391   :  { %v3978_v23 = vpack.c.bf16 %v1844_v20, %v1836_v26  ;;  %v1900_v20 = vld [vmem:[#allocation4 + $0x3b0] sm:$0xff] }
 0x392   :  { %v1763_v29 = vadd.f32 %v1761_v27, %v1747_v16  ;;  %v1853_v16 = vld [vmem:[#allocation4 + $0x238] sm:$0xff] }
 0x393   :  { %v1861_v27 = vld [vmem:[#allocation4 + $0x278] sm:$0xff] }
 0x394   :  { %v1779_v38 = vadd.f32 %v1777_v32, %v1763_v29  ;;  %v3916_v29 = vpack.c.bf16 %v1859_v24, %v1851_v22  ;;  %v3980_v32 = vpack.c.bf16 %v1861_v27, %v1853_v16  ;;  %v1908_v22 = vld [vmem:[#allocation4 + $0x3f0] sm:$0xff]  ;;  %v1915_v24 = vld [vmem:[#allocation4 + $0x428] sm:$0xff]  ;;  %v1917_v27 = vld [vmem:[#allocation4 + $0x438] sm:$0xff] }
 0x395   :  { %v1923_v16 = vld [vmem:[#allocation4 + $0x468] sm:$0xff] }
 0x396   :  { %2144 = vmatprep.mubr.f32.mxu0 %v1779_v38  ;;  %2215 = vmatprep.mubr.f32.mxu1 %v1779_v38 }
 0x397   :  { %2145 = vmatmul.mubr.f32.vlgmr.msra.gmra.mrb[8].mxu0 %v4926_v30  ;;  %2216 = vmatmul.mubr.f32.vlgmr.msra.gmra.mrb[8].mxu1 %v4926_v30 }
 0x398   :  { %3903 = vmatpush1.bf16.msra.mxu0 %v3902_v42  ;;  %3967 = vmatpush1.bf16.msra.mxu1 %v3966_v39  ;;  %v1877_v42 = vld [vmem:[#allocation4 + $0x2f8] sm:$0xff]  ;;  %v3918_v39 = vpack.c.bf16 %v1858_v47, %v1850_v31  ;;  %v3994_v31 = vpack.c.bf16 %v1908_v22, %v1900_v20  ;;  %v1914_v47 = vld [vmem:[#allocation4 + $0x420] sm:$0xff]  ;;  %v1964_v22 = vld [vmem:[#allocation4 + $0x5b0] sm:$0xff] }
 0x399   :  { %2286 = vmatprep.mubr.f32.mxu0 %v1779_v38  ;;  %2357 = vmatprep.mubr.f32.mxu1 %v1779_v38  ;;  %v1869_v38 = vld [vmem:[#allocation4 + $0x2b8] sm:$0xff] }
 0x39a   :  { %3905 = vmatprep.subr.bf16.mxu0 %v3904_v49  ;;  %3969 = vmatprep.subr.bf16.mxu1 %v3968_v51  ;;  %v3984_v34 = vpack.c.bf16 %v1877_v42, %v1869_v38  ;;  %v1868_v49 = vld [vmem:[#allocation4 + $0x2b0] sm:$0xff]  ;;  %v1939_v38 = vld [vmem:[#allocation4 + $0x4e8] sm:$0xff]  ;;  %v1933_v42 = vld [vmem:[#allocation4 + $0x4b8] sm:$0xff] }
 0x39b   :  { %v1876_v51 = vld [vmem:[#allocation4 + $0x2f0] sm:$0xff] }
 0x39c   :  { %3907 = vmatpush1.bf16.msra.mxu0 %v3906_v0  ;;  %3971 = vmatpush1.bf16.msra.mxu1 %v3970_v56  ;;  %v1893_v0 = vld [vmem:[#allocation4 + $0x378] sm:$0xff]  ;;  %v3922_v56 = vpack.c.bf16 %v1874_v55, %v1866_v43  ;;  %v3986_v59 = vpack.c.bf16 %v1876_v51, %v1868_v49  ;;  %v3998_v43 = vpack.c.bf16 %v1924_v37, %v1916_v25  ;;  %v1930_v55 = vld [vmem:[#allocation4 + $0x4a0] sm:$0xff]  ;;  %v1932_v51 = vld [vmem:[#allocation4 + $0x4b0] sm:$0xff] }
 0x39d   :  { %3909 = vmatprep.subr.bf16.mxu0 %v3908_v62  ;;  %3973 = vmatprep.subr.bf16.mxu1 %v3972_v63  ;;  %v1890_v62 = vld [vmem:[#allocation4 + $0x360] sm:$0xff]  ;;  %v3924_v63 = vpack.c.bf16 %v1891_v53, %v1883_v21  ;;  %v3988_v61 = vpack.c.bf16 %v1893_v0, %v1885_v54  ;;  %v1940_v21 = vld [vmem:[#allocation4 + $0x4f0] sm:$0xff]  ;;  %v1947_v53 = vld [vmem:[#allocation4 + $0x528] sm:$0xff] }
 0x39e   :  { %v1955_v54 = vld [vmem:[#allocation4 + $0x568] sm:$0xff]  ;;  %v1949_v0 = vld [vmem:[#allocation4 + $0x538] sm:$0xff]  ;;  %v1980_v37 = vld [vmem:[#allocation4 + $0x630] sm:$0xff] }
 0x3a0   :  { %3911 = vmatpush1.bf16.msra.mxu0 %v3910_v12  ;;  %3975 = vmatpush1.bf16.msra.mxu1 %v3974_v13  ;;  %v1909_v12 = vld [vmem:[#allocation4 + $0x3f8] sm:$0xff]  ;;  %v3926_v13 = vpack.c.bf16 %v1890_v62, %v1882_v60  ;;  %v4002_v60 = vpack.c.bf16 %v1940_v21, %v1932_v51  ;;  %v1946_v62 = vld [vmem:[#allocation4 + $0x520] sm:$0xff]  ;;  %v1996_v21 = vld [vmem:[#allocation4 + $0x6b0] sm:$0xff] }
 0x3a1   :  { %3913 = vmatprep.subr.bf16.mxu0 %v3912_v18  ;;  %3977 = vmatprep.subr.bf16.mxu1 %v3976_v19  ;;  %v1906_v18 = vld [vmem:[#allocation4 + $0x3e0] sm:$0xff]  ;;  %v3928_v19 = vpack.c.bf16 %v1907_v33, %v1899_v8  ;;  %v3992_v26 = vpack.c.bf16 %v1909_v12, %v1901_v9  ;;  %v1956_v8 = vld [vmem:[#allocation4 + $0x570] sm:$0xff]  ;;  %v1963_v33 = vld [vmem:[#allocation4 + $0x5a8] sm:$0xff] }
 0x3a2   :  { %v1971_v9 = vld [vmem:[#allocation4 + $0x5e8] sm:$0xff]  ;;  %v1965_v12 = vld [vmem:[#allocation4 + $0x5b8] sm:$0xff] }
 0x3a4   :  { %3915 = vmatpush1.bf16.msra.mxu0 %v3914_v3  ;;  %3979 = vmatpush1.bf16.msra.mxu1 %v3978_v23  ;;  %v1925_v3 = vld [vmem:[#allocation4 + $0x478] sm:$0xff]  ;;  %v3930_v23 = vpack.c.bf16 %v1906_v18, %v1898_v14  ;;  %v4006_v14 = vpack.c.bf16 %v1956_v8, %v1948_v1  ;;  %v1962_v18 = vld [vmem:[#allocation4 + $0x5a0] sm:$0xff]  ;;  %v2012_v8 = vld [vmem:[#allocation4 + $0x730] sm:$0xff] }
 0x3a5   :  { %3917 = vmatprep.subr.bf16.mxu0 %v3916_v29  ;;  %3981 = vmatprep.subr.bf16.mxu1 %v3980_v32  ;;  %v1922_v29 = vld [vmem:[#allocation4 + $0x460] sm:$0xff]  ;;  %v3932_v32 = vpack.c.bf16 %v1923_v16, %v1915_v24  ;;  %v3996_v35 = vpack.c.bf16 %v1925_v3, %v1917_v27  ;;  %v1972_v24 = vld [vmem:[#allocation4 + $0x5f0] sm:$0xff]  ;;  %v1979_v16 = vld [vmem:[#allocation4 + $0x628] sm:$0xff] }
 0x3a6   :  { %v1987_v27 = vld [vmem:[#allocation4 + $0x668] sm:$0xff]  ;;  %v1981_v3 = vld [vmem:[#allocation4 + $0x638] sm:$0xff] }
 0x3a8   :  { %3919 = vmatpush1.bf16.msra.mxu0 %v3918_v39  ;;  %3983 = vmatpush1.bf16.msra.mxu1 %v3982_v36  ;;  %v1941_v39 = vld [vmem:[#allocation4 + $0x4f8] sm:$0xff]  ;;  %v3934_v36 = vpack.c.bf16 %v1922_v29, %v1914_v47  ;;  %v4010_v47 = vpack.c.bf16 %v1972_v24, %v1964_v22  ;;  %v1978_v29 = vld [vmem:[#allocation4 + $0x620] sm:$0xff]  ;;  %v2028_v24 = vld [vmem:[#allocation4 + $0x7b0] sm:$0xff] }
 0x3a9   :  { %3921 = vmatprep.subr.bf16.mxu0 %v3920_v41  ;;  %3985 = vmatprep.subr.bf16.mxu1 %v3984_v34  ;;  %v1938_v41 = vld [vmem:[#allocation4 + $0x4e0] sm:$0xff]  ;;  %v3936_v34 = vpack.c.bf16 %v1939_v38, %v1931_v58  ;;  %v4000_v49 = vpack.c.bf16 %v1941_v39, %v1933_v42  ;;  %v1988_v58 = vld [vmem:[#allocation4 + $0x670] sm:$0xff]  ;;  %v1995_v38 = vld [vmem:[#allocation4 + $0x6a8] sm:$0xff] }
 0x3aa   :  { %v2003_v42 = vld [vmem:[#allocation4 + $0x6e8] sm:$0xff]  ;;  %v1997_v39 = vld [vmem:[#allocation4 + $0x6b8] sm:$0xff]  ;;  %v2034_v22 = vld [vmem:[#allocation4 + $0x7e0] sm:$0xff] }
 0x3ac   :  { %3923 = vmatpush1.bf16.msra.mxu0 %v3922_v56  ;;  %3987 = vmatpush1.bf16.msra.mxu1 %v3986_v59  ;;  %v1957_v56 = vld [vmem:[#allocation4 + $0x578] sm:$0xff]  ;;  %v3938_v59 = vpack.c.bf16 %v1938_v41, %v1930_v55  ;;  %v4014_v55 = vpack.c.bf16 %v1988_v58, %v1980_v37  ;;  %v1994_v41 = vld [vmem:[#allocation4 + $0x6a0] sm:$0xff] }
 0x3ad   :  { %3925 = vmatprep.subr.bf16.mxu0 %v3924_v63  ;;  %3989 = vmatprep.subr.bf16.mxu1 %v3988_v61  ;;  %v1954_v63 = vld [vmem:[#allocation4 + $0x560] sm:$0xff]  ;;  %v3940_v61 = vpack.c.bf16 %v1955_v54, %v1947_v53  ;;  %v4004_v6 = vpack.c.bf16 %v1957_v56, %v1949_v0  ;;  %v2004_v53 = vld [vmem:[#allocation4 + $0x6f0] sm:$0xff]  ;;  %v2011_v54 = vld [vmem:[#allocation4 + $0x728] sm:$0xff] }
 0x3ae   :  { %v2019_v0 = vld [vmem:[#allocation4 + $0x768] sm:$0xff]  ;;  %v2013_v56 = vld [vmem:[#allocation4 + $0x738] sm:$0xff] }
 0x3b0   :  { %3927 = vmatpush1.bf16.msra.mxu0 %v3926_v13  ;;  %3991 = vmatpush1.bf16.msra.mxu1 %v3990_v2  ;;  %v1973_v13 = vld [vmem:[#allocation4 + $0x5f8] sm:$0xff]  ;;  %v3942_v2 = vpack.c.bf16 %v1954_v63, %v1946_v62  ;;  %v4018_v62 = vpack.c.bf16 %v2004_v53, %v1996_v21  ;;  %v2010_v63 = vld [vmem:[#allocation4 + $0x720] sm:$0xff]  ;;  %v2580_v53 = vld [vmem:[#allocation4 + $0x90] sm:$0xff] }
 0x3b1   :  { %3929 = vmatprep.subr.bf16.mxu0 %v3928_v19  ;;  %3993 = vmatprep.subr.bf16.mxu1 %v3992_v26  ;;  %v1970_v19 = vld [vmem:[#allocation4 + $0x5e0] sm:$0xff]  ;;  %v3944_v26 = vpack.c.bf16 %v1971_v9, %v1963_v33  ;;  %v4008_v20 = vpack.c.bf16 %v1973_v13, %v1965_v12  ;;  %v2020_v33 = vld [vmem:[#allocation4 + $0x770] sm:$0xff]  ;;  %v2027_v9 = vld [vmem:[#allocation4 + $0x7a8] sm:$0xff] }
 0x3b2   :  { %v2035_v12 = vld [vmem:[#allocation4 + $0x7e8] sm:$0xff]  ;;  %v2029_v13 = vld [vmem:[#allocation4 + $0x7b8] sm:$0xff] }
 0x3b4   :  { %3931 = vmatpush1.bf16.msra.mxu0 %v3930_v23  ;;  %3995 = vmatpush1.bf16.msra.mxu1 %v3994_v31  ;;  %v1989_v23 = vld [vmem:[#allocation4 + $0x678] sm:$0xff]  ;;  %v3946_v31 = vpack.c.bf16 %v1970_v19, %v1962_v18  ;;  %v4022_v18 = vpack.c.bf16 %v2020_v33, %v2012_v8  ;;  %v2026_v19 = vld [vmem:[#allocation4 + $0x7a0] sm:$0xff]  ;;  %v2596_v33 = vld [vmem:[#allocation4 + $0x110] sm:$0xff] }
 0x3b5   :  { %3933 = vmatprep.subr.bf16.mxu0 %v3932_v32  ;;  %3997 = vmatprep.subr.bf16.mxu1 %v3996_v35  ;;  %v1986_v32 = vld [vmem:[#allocation4 + $0x660] sm:$0xff]  ;;  %v3948_v35 = vpack.c.bf16 %v1987_v27, %v1979_v16  ;;  %v4012_v25 = vpack.c.bf16 %v1989_v23, %v1981_v3  ;;  %v2036_v16 = vld [vmem:[#allocation4 + $0x7f0] sm:$0xff]  ;;  %v3962_v27 = vpack.c.bf16 %v2034_v22, %v2026_v19  ;;  %v2563_v23 = vld [vmem:[#allocation4 + $0x8] sm:$0xff] }
 0x3b6   :  { %v4026_v3 = vpack.c.bf16 %v2036_v16, %v2028_v24  ;;  %v2621_v19 = vld [vmem:[#allocation4 + $0x1d8] sm:$0xff]  ;;  %v2612_v16 = vld [vmem:[#allocation4 + $0x190] sm:$0xff] }
 0x3b8   :  { %3935 = vmatpush1.bf16.msra.mxu0 %v3934_v36  ;;  %3999 = vmatpush1.bf16.msra.mxu1 %v3998_v43  ;;  %v2005_v36 = vld [vmem:[#allocation4 + $0x6f8] sm:$0xff]  ;;  %v3950_v43 = vpack.c.bf16 %v1986_v32, %v1978_v29 }
 0x3b9   :  { %3937 = vmatprep.subr.bf16.mxu0 %v3936_v34  ;;  %4001 = vmatprep.subr.bf16.mxu1 %v4000_v49  ;;  %v2002_v34 = vld [vmem:[#allocation4 + $0x6e0] sm:$0xff]  ;;  %v3952_v49 = vpack.c.bf16 %v2003_v42, %v1995_v38  ;;  %v4016_v51 = vpack.c.bf16 %v2005_v36, %v1997_v39  ;;  %v2573_v32 = vld [vmem:[#allocation4 + $0x58] sm:$0xff]  ;;  %v2564_v38 = vld [vmem:[#allocation4 + $0x10] sm:$0xff] }
 0x3ba   :  { %v2572_v42 = vld [vmem:[#allocation4 + $0x50] sm:$0xff]  ;;  %v2579_v36 = vld [vmem:[#allocation4 + $0x88] sm:$0xff] }
 0x3bb   :  { %v4094_v39 = vpack.c.bf16 %v2572_v42, %v2564_v38  ;;  %v2628_v38 = vld [vmem:[#allocation4 + $0x210] sm:$0xff] }
 0x3bc   :  { %3939 = vmatpush1.bf16.msra.mxu0 %v3938_v59  ;;  %4003 = vmatpush1.bf16.msra.mxu1 %v4002_v60  ;;  %v2021_v59 = vld [vmem:[#allocation4 + $0x778] sm:$0xff]  ;;  %v3954_v60 = vpack.c.bf16 %v2002_v34, %v1994_v41  ;;  %v2578_v34 = vld [vmem:[#allocation4 + $0x80] sm:$0xff]  ;;  %v2636_v42 = vld [vmem:[#allocation4 + $0x250] sm:$0xff] }
 0x3bd   :  { %3941 = vmatprep.subr.bf16.mxu0 %v3940_v61  ;;  %4005 = vmatprep.subr.bf16.mxu1 %v4004_v6  ;;  %v2018_v61 = vld [vmem:[#allocation4 + $0x760] sm:$0xff]  ;;  %v3956_v6 = vpack.c.bf16 %v2019_v0, %v2011_v54  ;;  %v4020_v1 = vpack.c.bf16 %v2021_v59, %v2013_v56  ;;  %v2589_v41 = vld [vmem:[#allocation4 + $0xd8] sm:$0xff]  ;;  %v2588_v54 = vld [vmem:[#allocation4 + $0xd0] sm:$0xff] }
 0x3be   :  { %v4098_v0 = vpack.c.bf16 %v2588_v54, %v2580_v53  ;;  %v2595_v56 = vld [vmem:[#allocation4 + $0x108] sm:$0xff]  ;;  %v2644_v53 = vld [vmem:[#allocation4 + $0x290] sm:$0xff] }
 0x3bf   :  { %v2603_v59 = vld [vmem:[#allocation4 + $0x148] sm:$0xff]  ;;  %v2652_v54 = vld [vmem:[#allocation4 + $0x2d0] sm:$0xff] }
 0x3c0   :  { %3943 = vmatpush1.bf16.msra.mxu0 %v3942_v2  ;;  %4007 = vmatpush1.bf16.msra.mxu1 %v4006_v14  ;;  %v2037_v2 = vld [vmem:[#allocation4 + $0x7f8] sm:$0xff]  ;;  %v3958_v14 = vpack.c.bf16 %v2018_v61, %v2010_v63  ;;  %v2594_v61 = vld [vmem:[#allocation4 + $0x100] sm:$0xff] }
 0x3c1   :  { %3945 = vmatprep.subr.bf16.mxu0 %v3944_v26  ;;  %4009 = vmatprep.subr.bf16.mxu1 %v4008_v20  ;;  %v3960_v26 = vpack.c.bf16 %v2035_v12, %v2027_v9  ;;  %v4024_v20 = vpack.c.bf16 %v2037_v2, %v2029_v13  ;;  %v2605_v63 = vld [vmem:[#allocation4 + $0x158] sm:$0xff]  ;;  %v2604_v9 = vld [vmem:[#allocation4 + $0x150] sm:$0xff]  ;;  %v2611_v13 = vld [vmem:[#allocation4 + $0x188] sm:$0xff] }
 0x3c2   :  { %v4102_v12 = vpack.c.bf16 %v2604_v9, %v2596_v33  ;;  %v2619_v2 = vld [vmem:[#allocation4 + $0x1c8] sm:$0xff]  ;;  %v2660_v33 = vld [vmem:[#allocation4 + $0x310] sm:$0xff] }
 0x3c3   :  { %v2668_v9 = vld [vmem:[#allocation4 + $0x350] sm:$0xff] }
 0x3c4   :  { %3947 = vmatpush1.bf16.msra.mxu0 %v3946_v31  ;;  %4011 = vmatpush1.bf16.msra.mxu1 %v4010_v47  ;;  %v2571_v31 = vld [vmem:[#allocation4 + $0x48] sm:$0xff]  ;;  %v2565_v47 = vld [vmem:[#allocation4 + $0x18] sm:$0xff] }
 0x3c5   :  { %3949 = vmatprep.subr.bf16.mxu0 %v3948_v35  ;;  %4013 = vmatprep.subr.bf16.mxu1 %v4012_v25  ;;  %v4028_v29 = vpack.c.bf16 %v2571_v31, %v2563_v23  ;;  %v2562_v35 = vld [vmem:[#allocation4] sm:$0xff]  ;;  %v4092_v37 = vpack.c.bf16 %v2573_v32, %v2565_v47  ;;  %v2627_v23 = vld [vmem:[#allocation4 + $0x208] sm:$0xff]  ;;  %v2629_v47 = vld [vmem:[#allocation4 + $0x218] sm:$0xff] }
 0x3c6   :  { %v2570_v25 = vld [vmem:[#allocation4 + $0x40] sm:$0xff]  ;;  %v2635_v31 = vld [vmem:[#allocation4 + $0x248] sm:$0xff]  ;;  %v2637_v32 = vld [vmem:[#allocation4 + $0x258] sm:$0xff] }
 0x3c7   :  { %v4030_v58 = vpack.c.bf16 %v2570_v25, %v2562_v35  ;;  %v2626_v35 = vld [vmem:[#allocation4 + $0x200] sm:$0xff] }
 0x3c8   :  { %3951 = vmatpush1.bf16.msra.mxu0 %v3950_v43  ;;  %4015 = vmatpush1.bf16.msra.mxu1 %v4014_v55  ;;  %v2587_v43 = vld [vmem:[#allocation4 + $0xc8] sm:$0xff]  ;;  %v2581_v55 = vld [vmem:[#allocation4 + $0x98] sm:$0xff]  ;;  %v2634_v25 = vld [vmem:[#allocation4 + $0x240] sm:$0xff] }
 0x3c9   :  { %3953 = vmatprep.subr.bf16.mxu0 %v3952_v49  ;;  %4017 = vmatprep.subr.bf16.mxu1 %v4016_v51  ;;  %v2586_v49 = vld [vmem:[#allocation4 + $0xc0] sm:$0xff]  ;;  %v4096_v51 = vpack.c.bf16 %v2589_v41, %v2581_v55  ;;  %v2645_v55 = vld [vmem:[#allocation4 + $0x298] sm:$0xff] }
 0x3ca   :  { %v4034_v21 = vpack.c.bf16 %v2586_v49, %v2578_v34  ;;  %v2653_v41 = vld [vmem:[#allocation4 + $0x2d8] sm:$0xff]  ;;  %v2642_v34 = vld [vmem:[#allocation4 + $0x280] sm:$0xff] }
 0x3cb   :  { %v2650_v49 = vld [vmem:[#allocation4 + $0x2c0] sm:$0xff] }
 0x3cc   :  { %3955 = vmatpush1.bf16.msra.mxu0 %v3954_v60  ;;  %4019 = vmatpush1.bf16.msra.mxu1 %v4018_v62  ;;  %v2597_v60 = vld [vmem:[#allocation4 + $0x118] sm:$0xff]  ;;  %v4036_v62 = vpack.c.bf16 %v2603_v59, %v2595_v56  ;;  %v2659_v56 = vld [vmem:[#allocation4 + $0x308] sm:$0xff] }
 0x3cd   :  { %3957 = vmatprep.subr.bf16.mxu0 %v3956_v6  ;;  %4021 = vmatprep.subr.bf16.mxu1 %v4020_v1  ;;  %v2602_v6 = vld [vmem:[#allocation4 + $0x140] sm:$0xff]  ;;  %v4100_v1 = vpack.c.bf16 %v2605_v63, %v2597_v60  ;;  %v2667_v59 = vld [vmem:[#allocation4 + $0x348] sm:$0xff]  ;;  %v2661_v60 = vld [vmem:[#allocation4 + $0x318] sm:$0xff] }
 0x3ce   :  { %v4038_v8 = vpack.c.bf16 %v2602_v6, %v2594_v61  ;;  %v2669_v63 = vld [vmem:[#allocation4 + $0x358] sm:$0xff]  ;;  %v2658_v61 = vld [vmem:[#allocation4 + $0x300] sm:$0xff] }
 0x3cf   :  { %v2666_v6 = vld [vmem:[#allocation4 + $0x340] sm:$0xff] }
 0x3d0   :  { %3959 = vmatpush1.bf16.msra.mxu0 %v3958_v14  ;;  %4023 = vmatpush1.bf16.msra.mxu1 %v4022_v18  ;;  %v2613_v14 = vld [vmem:[#allocation4 + $0x198] sm:$0xff]  ;;  %v4040_v18 = vpack.c.bf16 %v2619_v2, %v2611_v13  ;;  %v2675_v13 = vld [vmem:[#allocation4 + $0x388] sm:$0xff] }
 0x3d1   :  { %3961 = vmatprep.subr.bf16.mxu0 %v3960_v26  ;;  %4025 = vmatprep.subr.bf16.mxu1 %v4024_v20  ;;  %v2610_v26 = vld [vmem:[#allocation4 + $0x180] sm:$0xff]  ;;  %v4104_v22 = vpack.c.bf16 %v2621_v19, %v2613_v14  ;;  %v2683_v2 = vld [vmem:[#allocation4 + $0x3c8] sm:$0xff]  ;;  %v2677_v14 = vld [vmem:[#allocation4 + $0x398] sm:$0xff] }
 0x3d2   :  { %v2618_v20 = vld [vmem:[#allocation4 + $0x1c0] sm:$0xff]  ;;  %v2685_v19 = vld [vmem:[#allocation4 + $0x3d8] sm:$0xff] }
 0x3d3   :  { %v4042_v24 = vpack.c.bf16 %v2618_v20, %v2610_v26  ;;  %v2674_v26 = vld [vmem:[#allocation4 + $0x380] sm:$0xff] }
 0x3d4   :  { %3963 = vmatpush1.bf16.msra.mxu0 %v3962_v27  ;;  %4027 = vmatpush1.bf16.msra.mxu1 %v4026_v3  ;;  %v2620_v27 = vld [vmem:[#allocation4 + $0x1d0] sm:$0xff]  ;;  %v2682_v20 = vld [vmem:[#allocation4 + $0x3c0] sm:$0xff] }
 0x3d5   :  { %4029 = vmatprep.subr.bf16.mxu0 %v4028_v29  ;;  %4093 = vmatprep.subr.bf16.mxu1 %v4092_v37  ;;  %v4106_v3 = vpack.c.bf16 %v2620_v27, %v2612_v16  ;;  %v4044_v29 = vpack.c.bf16 %v2635_v31, %v2627_v23  ;;  %v4108_v37 = vpack.c.bf16 %v2637_v32, %v2629_v47  ;;  %v2676_v16 = vld [vmem:[#allocation4 + $0x390] sm:$0xff]  ;;  %v2691_v23 = vld [vmem:[#allocation4 + $0x408] sm:$0xff]  ;;  %v2693_v47 = vld [vmem:[#allocation4 + $0x418] sm:$0xff] }
 0x3d6   :  { %v2684_v27 = vld [vmem:[#allocation4 + $0x3d0] sm:$0xff]  ;;  %v2699_v31 = vld [vmem:[#allocation4 + $0x448] sm:$0xff]  ;;  %v2701_v32 = vld [vmem:[#allocation4 + $0x458] sm:$0xff] }
 0x3d7   :  { %2287 = vmatmul.mubr.f32.vlgmr.msra.gmra.mrb[10].mxu0 %v4926_v30  ;;  %2358 = vmatmul.mubr.f32.vlgmr.msra.gmra.mrb[10].mxu1 %v4926_v30  ;;  %v4032_v30 = vpack.c.bf16 %v2587_v43, %v2579_v36  ;;  %v2643_v36 = vld [vmem:[#allocation4 + $0x288] sm:$0xff] }
 0x3d8   :  { %4031 = vmatpush1.bf16.msra.mxu0 %v4030_v58  ;;  %4095 = vmatpush1.bf16.msra.mxu1 %v4094_v39  ;;  %v4046_v58 = vpack.c.bf16 %v2634_v25, %v2626_v35  ;;  %v4110_v39 = vpack.c.bf16 %v2636_v42, %v2628_v38  ;;  %v2651_v43 = vld [vmem:[#allocation4 + $0x2c8] sm:$0xff]  ;;  %v2690_v35 = vld [vmem:[#allocation4 + $0x400] sm:$0xff]  ;;  %v2692_v38 = vld [vmem:[#allocation4 + $0x410] sm:$0xff] }
 0x3d9   :  { %4033 = vmatprep.subr.bf16.mxu0 %v4032_v30  ;;  %4097 = vmatprep.subr.bf16.mxu1 %v4096_v51  ;;  %v4048_v30 = vpack.c.bf16 %v2651_v43, %v2643_v36  ;;  %v4112_v51 = vpack.c.bf16 %v2653_v41, %v2645_v55  ;;  %v2698_v25 = vld [vmem:[#allocation4 + $0x440] sm:$0xff]  ;;  %v2700_v42 = vld [vmem:[#allocation4 + $0x450] sm:$0xff]  ;;  %v2707_v36 = vld [vmem:[#allocation4 + $0x488] sm:$0xff] }
 0x3da   :  { %v2715_v43 = vld [vmem:[#allocation4 + $0x4c8] sm:$0xff]  ;;  %v2709_v55 = vld [vmem:[#allocation4 + $0x498] sm:$0xff] }
 0x3db   :  { %v2717_v41 = vld [vmem:[#allocation4 + $0x4d8] sm:$0xff] }
 0x3dc   :  { %4035 = vmatpush1.bf16.msra.mxu0 %v4034_v21  ;;  %4099 = vmatpush1.bf16.msra.mxu1 %v4098_v0  ;;  %v4050_v21 = vpack.c.bf16 %v2650_v49, %v2642_v34  ;;  %v4114_v0 = vpack.c.bf16 %v2652_v54, %v2644_v53  ;;  %v2706_v34 = vld [vmem:[#allocation4 + $0x480] sm:$0xff]  ;;  %v2708_v53 = vld [vmem:[#allocation4 + $0x490] sm:$0xff] }
 0x3dd   :  { %4037 = vmatprep.subr.bf16.mxu0 %v4036_v62  ;;  %4101 = vmatprep.subr.bf16.mxu1 %v4100_v1  ;;  %v4052_v62 = vpack.c.bf16 %v2667_v59, %v2659_v56  ;;  %v4116_v1 = vpack.c.bf16 %v2669_v63, %v2661_v60  ;;  %v2714_v49 = vld [vmem:[#allocation4 + $0x4c0] sm:$0xff]  ;;  %v2716_v54 = vld [vmem:[#allocation4 + $0x4d0] sm:$0xff]  ;;  %v2723_v56 = vld [vmem:[#allocation4 + $0x508] sm:$0xff] }
 0x3de   :  { %v2731_v59 = vld [vmem:[#allocation4 + $0x548] sm:$0xff]  ;;  %v2725_v60 = vld [vmem:[#allocation4 + $0x518] sm:$0xff] }
 0x3df   :  { %v2733_v63 = vld [vmem:[#allocation4 + $0x558] sm:$0xff] }
 0x3e0   :  { %4039 = vmatpush1.bf16.msra.mxu0 %v4038_v8  ;;  %4103 = vmatpush1.bf16.msra.mxu1 %v4102_v12  ;;  %v4054_v8 = vpack.c.bf16 %v2666_v6, %v2658_v61  ;;  %v4118_v12 = vpack.c.bf16 %v2668_v9, %v2660_v33  ;;  %v2722_v61 = vld [vmem:[#allocation4 + $0x500] sm:$0xff]  ;;  %v2724_v33 = vld [vmem:[#allocation4 + $0x510] sm:$0xff] }
 0x3e1   :  { %4041 = vmatprep.subr.bf16.mxu0 %v4040_v18  ;;  %4105 = vmatprep.subr.bf16.mxu1 %v4104_v22  ;;  %v4056_v18 = vpack.c.bf16 %v2683_v2, %v2675_v13  ;;  %v4120_v22 = vpack.c.bf16 %v2685_v19, %v2677_v14  ;;  %v2730_v6 = vld [vmem:[#allocation4 + $0x540] sm:$0xff]  ;;  %v2732_v9 = vld [vmem:[#allocation4 + $0x550] sm:$0xff]  ;;  %v2739_v13 = vld [vmem:[#allocation4 + $0x588] sm:$0xff] }
 0x3e2   :  { %v2747_v2 = vld [vmem:[#allocation4 + $0x5c8] sm:$0xff]  ;;  %v2741_v14 = vld [vmem:[#allocation4 + $0x598] sm:$0xff] }
 0x3e3   :  { %v2749_v19 = vld [vmem:[#allocation4 + $0x5d8] sm:$0xff] }
 0x3e4   :  { %4043 = vmatpush1.bf16.msra.mxu0 %v4042_v24  ;;  %4107 = vmatpush1.bf16.msra.mxu1 %v4106_v3  ;;  %v4058_v24 = vpack.c.bf16 %v2682_v20, %v2674_v26  ;;  %v4122_v3 = vpack.c.bf16 %v2684_v27, %v2676_v16  ;;  %v2738_v26 = vld [vmem:[#allocation4 + $0x580] sm:$0xff]  ;;  %v2740_v16 = vld [vmem:[#allocation4 + $0x590] sm:$0xff] }
 0x3e5   :  { %4045 = vmatprep.subr.bf16.mxu0 %v4044_v29  ;;  %4109 = vmatprep.subr.bf16.mxu1 %v4108_v37  ;;  %v4060_v29 = vpack.c.bf16 %v2699_v31, %v2691_v23  ;;  %v4124_v37 = vpack.c.bf16 %v2701_v32, %v2693_v47  ;;  %v2746_v20 = vld [vmem:[#allocation4 + $0x5c0] sm:$0xff]  ;;  %v2748_v27 = vld [vmem:[#allocation4 + $0x5d0] sm:$0xff]  ;;  %v2755_v23 = vld [vmem:[#allocation4 + $0x608] sm:$0xff] }
 0x3e6   :  { %v2763_v31 = vld [vmem:[#allocation4 + $0x648] sm:$0xff]  ;;  %v2757_v47 = vld [vmem:[#allocation4 + $0x618] sm:$0xff] }
 0x3e7   :  { %v2765_v32 = vld [vmem:[#allocation4 + $0x658] sm:$0xff] }
 0x3e8   :  { %4047 = vmatpush1.bf16.msra.mxu0 %v4046_v58  ;;  %4111 = vmatpush1.bf16.msra.mxu1 %v4110_v39  ;;  %v4062_v58 = vpack.c.bf16 %v2698_v25, %v2690_v35  ;;  %v4126_v39 = vpack.c.bf16 %v2700_v42, %v2692_v38  ;;  %v2754_v35 = vld [vmem:[#allocation4 + $0x600] sm:$0xff]  ;;  %v2756_v38 = vld [vmem:[#allocation4 + $0x610] sm:$0xff] }
 0x3e9   :  { %4049 = vmatprep.subr.bf16.mxu0 %v4048_v30  ;;  %4113 = vmatprep.subr.bf16.mxu1 %v4112_v51  ;;  %v4064_v30 = vpack.c.bf16 %v2715_v43, %v2707_v36  ;;  %v4128_v51 = vpack.c.bf16 %v2717_v41, %v2709_v55  ;;  %v2762_v25 = vld [vmem:[#allocation4 + $0x640] sm:$0xff]  ;;  %v2764_v42 = vld [vmem:[#allocation4 + $0x650] sm:$0xff]  ;;  %v2771_v43 = vld [vmem:[#allocation4 + $0x688] sm:$0xff] }
 0x3ea   :  { %v4142_v36 = vpack.c.bf16 %v2764_v42, %v2756_v38  ;;  %v2779_v55 = vld [vmem:[#allocation4 + $0x6c8] sm:$0xff]  ;;  %v2569_v42 = vld [vmem:[#allocation4 + $0x38] sm:$0xff] }
 0x3eb   :  { %v4080_v41 = vpack.c.bf16 %v2779_v55, %v2771_v43  ;;  %v2575_v38 = vld [vmem:[#allocation4 + $0x68] sm:$0xff]  ;;  %v2577_v43 = vld [vmem:[#allocation4 + $0x78] sm:$0xff] }
 0x3ec   :  { %4051 = vmatpush1.bf16.msra.mxu0 %v4050_v21  ;;  %4115 = vmatpush1.bf16.msra.mxu1 %v4114_v0  ;;  %v4066_v21 = vpack.c.bf16 %v2714_v49, %v2706_v34  ;;  %v4130_v0 = vpack.c.bf16 %v2716_v54, %v2708_v53  ;;  %v2781_v34 = vld [vmem:[#allocation4 + $0x6d8] sm:$0xff]  ;;  %v2770_v49 = vld [vmem:[#allocation4 + $0x680] sm:$0xff]  ;;  %v2772_v54 = vld [vmem:[#allocation4 + $0x690] sm:$0xff]  ;;  %v4220_v55 = vpack.c.bf16 %v2577_v43, %v2569_v42 }
 0x3ed   :  { %4053 = vmatprep.subr.bf16.mxu0 %v4052_v62  ;;  %4117 = vmatprep.subr.bf16.mxu1 %v4116_v1  ;;  %v4068_v62 = vpack.c.bf16 %v2731_v59, %v2723_v56  ;;  %v4132_v1 = vpack.c.bf16 %v2733_v63, %v2725_v60  ;;  %v2787_v60 = vld [vmem:[#allocation4 + $0x708] sm:$0xff]  ;;  %v2789_v63 = vld [vmem:[#allocation4 + $0x718] sm:$0xff] }
 0x3f0   :  { %4055 = vmatpush1.bf16.msra.mxu0 %v4054_v8  ;;  %4119 = vmatpush1.bf16.msra.mxu1 %v4118_v12  ;;  %v4070_v8 = vpack.c.bf16 %v2730_v6, %v2722_v61  ;;  %v4134_v12 = vpack.c.bf16 %v2732_v9, %v2724_v33  ;;  %v2797_v6 = vld [vmem:[#allocation4 + $0x758] sm:$0xff] }
 0x3f1   :  { %4057 = vmatprep.subr.bf16.mxu0 %v4056_v18  ;;  %4121 = vmatprep.subr.bf16.mxu1 %v4120_v22  ;;  %v4072_v18 = vpack.c.bf16 %v2747_v2, %v2739_v13  ;;  %v4136_v22 = vpack.c.bf16 %v2749_v19, %v2741_v14  ;;  %v2788_v2 = vld [vmem:[#allocation4 + $0x710] sm:$0xff] }
 0x3f2   :  { %v2796_v14 = vld [vmem:[#allocation4 + $0x750] sm:$0xff] }
 0x3f4   :  { %4059 = vmatpush1.bf16.msra.mxu0 %v4058_v24  ;;  %4123 = vmatpush1.bf16.msra.mxu1 %v4122_v3  ;;  %v4074_v24 = vpack.c.bf16 %v2746_v20, %v2738_v26  ;;  %v4138_v3 = vpack.c.bf16 %v2748_v27, %v2740_v16  ;;  %v4150_v20 = vpack.c.bf16 %v2796_v14, %v2788_v2  ;;  %v2805_v16 = vld [vmem:[#allocation4 + $0x798] sm:$0xff] }
 0x3f5   :  { %4061 = vmatprep.subr.bf16.mxu0 %v4060_v29  ;;  %4125 = vmatprep.subr.bf16.mxu1 %v4124_v37  ;;  %v4076_v29 = vpack.c.bf16 %v2763_v31, %v2755_v23  ;;  %v4140_v37 = vpack.c.bf16 %v2765_v32, %v2757_v47  ;;  %v2813_v23 = vld [vmem:[#allocation4 + $0x7d8] sm:$0xff]  ;;  %v2802_v31 = vld [vmem:[#allocation4 + $0x780] sm:$0xff] }
 0x3f6   :  { %v2810_v47 = vld [vmem:[#allocation4 + $0x7c0] sm:$0xff] }
 0x3f7   :  { %v4090_v32 = vpack.c.bf16 %v2810_v47, %v2802_v31 }
 0x3f8   :  { %4063 = vmatpush1.bf16.msra.mxu0 %v4062_v58  ;;  %4127 = vmatpush1.bf16.msra.mxu1 %v4126_v39  ;;  %v4078_v58 = vpack.c.bf16 %v2762_v25, %v2754_v35  ;;  %v4935_v39 = vld [vmem:[%s5045_s2] sm:$0xff]  ;;  %v2804_v35 = vld [vmem:[#allocation4 + $0x790] sm:$0xff] }
 0x3f9   :  { %4065 = vmatprep.subr.bf16.mxu0 %v4064_v30  ;;  %4129 = vmatprep.subr.bf16.mxu1 %v4128_v51  ;;  %v2773_v30 = vld [vmem:[#allocation4 + $0x698] sm:$0xff]  ;;  %v2778_v51 = vld [vmem:[#allocation4 + $0x6c0] sm:$0xff]  ;;  %v2043_v56 = vrot.slane %v4935_v39, %v4700_v44  ;;  %v2812_v25 = vld [vmem:[#allocation4 + $0x7d0] sm:$0xff] }
 0x3fa   :  { %v4082_v53 = vpack.c.bf16 %v2778_v51, %v2770_v49 }
 0x3fc   :  { %4067 = vmatpush1.bf16.msra.mxu0 %v4066_v21  ;;  %4131 = vmatpush1.bf16.msra.mxu1 %v4130_v0  ;;  %v4144_v21 = vpack.c.bf16 %v2781_v34, %v2773_v30  ;;  %v2780_v0 = vld [vmem:[#allocation4 + $0x6d0] sm:$0xff]  ;;  %v2051_v30 = vrot.slane %v4935_v39, %v4704_v46 }
 0x3fd   :  { %4069 = vmatprep.subr.bf16.mxu0 %v4068_v62  ;;  %4133 = vmatprep.subr.bf16.mxu1 %v4132_v1  ;;  %v4146_v59 = vpack.c.bf16 %v2780_v0, %v2772_v54  ;;  %v2795_v62 = vld [vmem:[#allocation4 + $0x748] sm:$0xff]  ;;  %v2786_v1 = vld [vmem:[#allocation4 + $0x700] sm:$0xff]  ;;  %v2055_v54 = vrot.slane %v4935_v39, %v4708_v50 }
 0x3fe   :  { %v4084_v61 = vpack.c.bf16 %v2795_v62, %v2787_v60  ;;  %v4465_v60 = vld [vmem:[%s5048_s5 + $0x20] sm:$0xff] }
 0x3ff   :  { %v1659_v62 = vrot.slane %v4465_v60, %v4700_v44 }
 0x400   :  { %4071 = vmatpush1.bf16.msra.mxu0 %v4070_v8  ;;  %4135 = vmatpush1.bf16.msra.mxu1 %v4134_v12  ;;  %v2794_v8 = vld [vmem:[#allocation4 + $0x740] sm:$0xff]  ;;  %v4148_v12 = vpack.c.bf16 %v2797_v6, %v2789_v63  ;;  %v1675_v63 = vrot.slane %v4465_v60, %v4702_v45  ;;  %v2063_v6 = vrot.slane %v4935_v39, %v4716_v57 }
 0x401   :  { %4073 = vmatprep.subr.bf16.mxu0 %v4072_v18  ;;  %4137 = vmatprep.subr.bf16.mxu1 %v4136_v22  ;;  %v4086_v13 = vpack.c.bf16 %v2794_v8, %v2786_v1  ;;  %v2803_v22 = vld [vmem:[#allocation4 + $0x788] sm:$0xff]  ;;  %v2071_v1 = vrot.slane %v4935_v39, %v4728_v15 }
 0x404   :  { %4075 = vmatpush1.bf16.msra.mxu0 %v4074_v24  ;;  %4139 = vmatpush1.bf16.msra.mxu1 %v4138_v3  ;;  %v2811_v24 = vld [vmem:[#allocation4 + $0x7c8] sm:$0xff] }
 0x405   :  { %4077 = vmatprep.subr.bf16.mxu0 %v4076_v29  ;;  %4141 = vmatprep.subr.bf16.mxu1 %v4140_v37  ;;  %v4088_v3 = vpack.c.bf16 %v2811_v24, %v2803_v22  ;;  %v4152_v29 = vpack.c.bf16 %v2813_v23, %v2805_v16  ;;  %v4154_v37 = vpack.c.bf16 %v2812_v25, %v2804_v35 }
 0x406   :  { %v2047_v24 = vrot.slane %v4935_v39, %v4702_v45  ;;  %v1707_v23 = vrot.slane %v4465_v60, %v4708_v50  ;;  %v1723_v25 = vrot.slane %v4465_v60, %v4712_v52 }
 0x408   :  { %4079 = vmatpush1.bf16.msra.mxu0 %v4078_v58  ;;  %4143 = vmatpush1.bf16.msra.mxu1 %v4142_v36  ;;  %v2567_v58 = vld [vmem:[#allocation4 + $0x28] sm:$0xff]  ;;  %v1712_v35 = vmul.f32 %v1707_v23, %v4895_v10 }
 0x409   :  { %4081 = vmatprep.subr.bf16.mxu0 %v4080_v41  ;;  %4145 = vmatprep.subr.bf16.mxu1 %v4144_v21  ;;  %v4156_v36 = vpack.c.bf16 %v2575_v38, %v2567_v58 }
 0x40c   :  { %4083 = vmatpush1.bf16.msra.mxu0 %v4082_v53  ;;  %4147 = vmatpush1.bf16.msra.mxu1 %v4146_v59 }
 0x40d   :  { %4085 = vmatprep.subr.bf16.mxu0 %v4084_v61  ;;  %4149 = vmatprep.subr.bf16.mxu1 %v4148_v12  ;;  %v2067_v61 = vrot.slane %v4935_v39, %v4724_v5 }
 0x410   :  { %4087 = vmatpush1.bf16.msra.mxu0 %v4086_v13  ;;  %4151 = vmatpush1.bf16.msra.mxu1 %v4150_v20 }
 0x411   :  { %4089 = vmatprep.subr.bf16.mxu0 %v4088_v3  ;;  %4153 = vmatprep.subr.bf16.mxu1 %v4152_v29 }
 0x414   :  { %4091 = vmatpush1.bf16.msra.mxu0 %v4090_v32  ;;  %4155 = vmatpush1.bf16.msra.mxu1 %v4154_v37  ;;  %v4968_v32 = vpop.permute.xlu1 %2433 }
 0x415   :  { %4157 = vmatprep.subr.bf16.mxu0 %v4156_v36  ;;  %4221 = vmatprep.subr.bf16.mxu1 %v4220_v55  ;;  %v1728_v36 = vmul.f32 %v1723_v25, %v4914_v17 }
 0x418   :  { %v4974_v43 = vpop.permute.xlu1 %2449 }
 0x46a   :  { %v2146_v33 = vpop.f32.mrb[8].mxu0  ;;  %v2217_v9 = vpop.f32.mrb[8].mxu1 }
 0x46b   :  { %v2147_v18 = vadd.f32 %v2146_v33, %v2043_v56  ;;  %v2219_v19 = vpop.f32.mrb[9].mxu1  ;;  %v4939_v26 = vpop.f32.mrb[9].mxu0  ;;  %v2218_v41 = vadd.f32 %v2217_v9, %v2051_v30  ;;  %v1664_v33 = vmul.f32 %v1659_v62, %v4891_v48  ;;  %v1680_v9 = vmul.f32 %v1675_v63, %v4903_v4 }
 0x46c   :  { %v2220_v0 = vadd.f32 %v2219_v19, %v2055_v54  ;;  %v1691_v19 = vrot.slane %v4465_v60, %v4704_v46  ;;  %v2059_v48 = vrot.slane %v4935_v39, %v4712_v52  ;;  %v2149_v31 = vadd.f32 %v4939_v26, %v2047_v24  ;;  %v4978_v54 = vpop.permute.xlu1 %2481 }
 0x46d   :  { %v3242_v27 = vmul.f32 -1.442695, %v2147_v18 }
 0x46e   :  { %v3245_v56 = vmul.f32 -1.442695, %v2220_v0  ;;  %v1696_v3 = vmul.f32 %v1691_v19, %v4893_v11  ;;  %v3243_v37 = vmul.f32 -1.442695, %v2149_v31  ;;  %v1739_v11 = vrot.slane %v4465_v60, %v4716_v57 }
 0x46f   :  { %4400 = vpow2.f32 %v3242_v27  ;;  %v1682_v27 = vadd.f32 %v1680_v9, %v1664_v33  ;;  %v1771_v0 = vrot.slane %v4465_v60, %v4728_v15 }
 0x470   :  { %4402 = vtanh.f32 %v2218_v41 }
 0x471   :  { %v1698_v47 = vadd.f32 %v1696_v3, %v1682_v27  ;;  %v1776_v63 = vmul.f32 %v1771_v0, %v4923_v28 }
 0x473   :  { %v1714_v39 = vadd.f32 %v1712_v35, %v1698_v47 }
 0x475   :  { %v1730_v30 = vadd.f32 %v1728_v36, %v1714_v39 }
 0x479   :  { %v4401_v34 = vpop.eup %4400 }
 0x47a   :  { %v2367_v49 = vadd.f32 1.0, %v4401_v34  ;;  %v4403_v51 = vpop.eup %4402  ;;  %v1744_v34 = vmul.f32 %v1739_v11, %v4910_v7 }
 0x47c   :  { %4404 = vrcp.f32 %v2367_v49  ;;  %v1755_v49 = vrot.slane %v4465_v60, %v4724_v5 }
 0x47d   :  { %4406 = vpow2.f32 %v3245_v56 }
 0x47e   :  { %v1760_v17 = vmul.f32 %v1755_v49, %v4920_v40 }
 0x486   :  { %v4405_v21 = vpop.eup %4404 }
 0x487   :  { %v4943_v53 = vmul.f32 %v4405_v21, %v4403_v51  ;;  %v4407_v59 = vpop.eup %4406  ;;  %v1746_v21 = vadd.f32 %v1744_v34, %v1730_v30 }
 0x488   :  { %v2391_v8 = vadd.f32 1.0, %v4407_v59 }
 0x489   :  { %v1762_v56 = vadd.f32 %v1760_v17, %v1746_v21 }
 0x48a   :  { %4408 = vrcp.f32 %v2391_v8 }
 0x48b   :  { %v1778_v7 = vadd.f32 %v1776_v63, %v1762_v56 }
 0x494   :  { %v4409_v38 = vpop.eup %4408 }
 0x4aa   :  { %v2288_v12 = vpop.f32.mrb[10].mxu0  ;;  %v2359_v13 = vpop.f32.mrb[10].mxu1 }
 0x4ab   :  { %v2360_v2 = vadd.f32 %v2359_v13, %v2067_v61  ;;  %v2290_v14 = vpop.f32.mrb[11].mxu0  ;;  %v2361_v18 = vpop.f32.mrb[11].mxu1  ;;  %v2289_v29 = vadd.f32 %v2288_v12, %v2059_v48  ;;  %v2416_v12 = vld [vmem:[#allocation7 + $0x38] sm:$0xff] }
 0x4ac   :  { %v2291_v20 = vadd.f32 %v2290_v14, %v2063_v6  ;;  %v2362_v22 = vadd.f32 %v2361_v18, %v2071_v1  ;;  %v4983_v61 = vpop.permute.xlu1 %2497  ;;  %v2466_v18 = vpop.permute.xlu0 %2465 }
 0x4ad   :  { %v3244_v16 = vmul.f32 -1.442695, %v2360_v2  ;;  %v3246_v58 = vmul.f32 -1.442695, %v2289_v29  ;;  %v2415_v2 = vld [vmem:[#allocation7 + $0x30] sm:$0xff] }
 0x4ae   :  { %4410 = vtanh.f32 %v2291_v20  ;;  %v3247_v4 = vmul.f32 -1.442695, %v2362_v22 }
 0x4af   :  { %4412 = vpow2.f32 %v3244_v16 }
 0x4b0   :  { %4414 = vpow2.f32 %v3247_v4  ;;  %v2530_v14 = vpop.permute.xlu1 %2529 }
 0x4b1   :  { %4416 = vpow2.f32 %v3243_v37 }
 0x4b2   :  { %4418 = vpow2.f32 %v3246_v58 }
 0x4b4   :  { %v2546_v16 = vpop.permute.xlu1 %2545 }
 0x4b8   :  { %v4411_v42 = vpop.eup %4410 }
 0x4b9   :  { %v2407_v26 = vmul.f32 %v4411_v42, %v4409_v38  ;;  %v4413_v55 = vpop.eup %4412 }
 0x4ba   :  { %v4415_v41 = vpop.eup %4414  ;;  %v2380_v10 = vadd.f32 1.0, %v4413_v55 }
 0x4bb   :  { %v2404_v51 = vadd.f32 1.0, %v4415_v41  ;;  %v4417_v59 = vpop.eup %4416 }
 0x4bc   :  { %4420 = vrcp.f32 %v2380_v10  ;;  %v4419_v62 = vpop.eup %4418  ;;  %v2373_v6 = vadd.f32 1.0, %v4417_v59 }
 0x4bd   :  { %4422 = vrcp.f32 %v2404_v51  ;;  %v2397_v8 = vadd.f32 1.0, %v4419_v62 }
 0x4be   :  { %4424 = vrcp.f32 %v2373_v6 }
 0x4bf   :  { %4426 = vrcp.f32 %v2397_v8 }
 0x4c6   :  { %v4421_v1 = vpop.eup %4420 }
 0x4c7   :  { %v4423_v33 = vpop.eup %4422  ;;  %v2384_v9 = vmul.f32 %v4421_v1, %v1778_v7 }
 0x4c8   :  { %v2408_v13 = vmul.f32 %v4423_v33, %v1778_v7  ;;  %v4425_v47 = vpop.eup %4424 }
 0x4c9   :  { %v2385_v40 = vadd.f32 %v2384_v9, %v4943_v53  ;;  %v2514_v53 = vpop.permute.xlu0 %2513  ;;  %v4427_v25 = vpop.eup %4426 }
 0x4ca   :  { %v2409_v60 = vadd.f32 %v2408_v13, %v2407_v26 }
 0x4cb   :  { %4428 = vtanh.f32 %v2385_v40  ;;  %v2418_v28 = vmul.f32 %v2416_v12, %v2385_v40 }
 0x4cc   :  { %4430 = vtanh.f32 %v2409_v60  ;;  %v2417_v19 = vmul.f32 %v2415_v2, %v2409_v60 }
 0x4ce   :  { %v2419_v20 = vadd.f32 %v2418_v28, %v2417_v19 }
 0x4d0   :  { %3248 = vst [vmem:[%s5048_s5 + $0x30] sm:$0xff] %v2419_v20  ;;  %v2439_v22 = vrot.slane %v2419_v20, %v4700_v44  ;;  %v2455_v24 = vrot.slane %v2419_v20, %v4702_v45  ;;  %v2471_v27 = vrot.slane %v2419_v20, %v4704_v46  ;;  %v2551_v48 = vrot.slane %v2419_v20, %v4728_v15 }
 0x4d1   :  { %v2519_v4 = vrot.slane %v2419_v20, %v4716_v57  ;;  %v2487_v31 = vrot.slane %v2419_v20, %v4708_v50  ;;  %v2503_v39 = vrot.slane %v2419_v20, %v4712_v52  ;;  %v2535_v21 = vrot.slane %v2419_v20, %v4724_v5 }
 0x4d2   :  { %v2444_v3 = vmul.f32 %v2439_v22, %v4968_v32  ;;  %v2460_v23 = vmul.f32 %v2455_v24, %v4974_v43  ;;  %v2556_v29 = vmul.f32 %v2551_v48, %v2546_v16  ;;  %v2476_v58 = vmul.f32 %v2471_v27, %v2466_v18  ;;  %v2574_v27 = vld [vmem:[#allocation4 + $0x60] sm:$0xff]  ;;  %v2568_v48 = vld [vmem:[#allocation4 + $0x30] sm:$0xff] }
 0x4d3   :  { %v2524_v35 = vmul.f32 %v2519_v4, %v2514_v53  ;;  %v2492_v36 = vmul.f32 %v2487_v31, %v4978_v54  ;;  %v2508_v41 = vmul.f32 %v2503_v39, %v4983_v61  ;;  %v2540_v6 = vmul.f32 %v2535_v21, %v2530_v14  ;;  %v2591_v31 = vld [vmem:[#allocation4 + $0xe8] sm:$0xff]  ;;  %v2582_v39 = vld [vmem:[#allocation4 + $0xa0] sm:$0xff]  ;;  %v2608_v21 = vld [vmem:[#allocation4 + $0x170] sm:$0xff] }
 0x4d4   :  { %v2462_v37 = vadd.f32 %v2460_v23, %v2444_v3  ;;  %v2583_v23 = vld [vmem:[#allocation4 + $0xa8] sm:$0xff] }
 0x4d5   :  { %v4429_v38 = vpop.eup %4428 }
 0x4d6   :  { %v4431_v42 = vpop.eup %4430  ;;  %v2387_v11 = vmul.f32 %v4429_v38, %v4425_v47  ;;  %v2478_v26 = vadd.f32 %v2476_v58, %v2462_v37  ;;  %v2585_v47 = vld [vmem:[#allocation4 + $0xb8] sm:$0xff]  ;;  %v2590_v58 = vld [vmem:[#allocation4 + $0xe0] sm:$0xff]  ;;  %v2599_v38 = vld [vmem:[#allocation4 + $0x128] sm:$0xff] }
 0x4d7   :  { %v2411_v55 = vmul.f32 %v4431_v42, %v4427_v25  ;;  %v4160_v42 = vpack.c.bf16 %v2591_v31, %v2583_v23  ;;  %v2646_v31 = vld [vmem:[#allocation4 + $0x2a0] sm:$0xff] }
 0x4d8   :  { %v2424_v30 = vmul.f32 %v2416_v12, %v2387_v11  ;;  %v2494_v10 = vadd.f32 %v2492_v36, %v2478_v26  ;;  %v2601_v36 = vld [vmem:[#allocation4 + $0x138] sm:$0xff] }
 0x4d9   :  { %v2423_v34 = vmul.f32 %v2415_v2, %v2411_v55  ;;  %v2609_v26 = vld [vmem:[#allocation4 + $0x178] sm:$0xff]  ;;  %v4162_v55 = vpack.c.bf16 %v2590_v58, %v2582_v39  ;;  %v2663_v39 = vld [vmem:[#allocation4 + $0x328] sm:$0xff] }
 0x4da   :  { %v2510_v49 = vadd.f32 %v2508_v41, %v2494_v10  ;;  %v2598_v41 = vld [vmem:[#allocation4 + $0x120] sm:$0xff]  ;;  %v2671_v58 = vld [vmem:[#allocation4 + $0x368] sm:$0xff] }
 0x4db   :  { %v2425_v51 = vadd.f32 %v2424_v30, %v2423_v34  ;;  %v2606_v10 = vld [vmem:[#allocation4 + $0x160] sm:$0xff] }
 0x4dc   :  { %v2526_v17 = vadd.f32 %v2524_v35, %v2510_v49  ;;  %v5018_v35 = vld [vmem:[#allocation2 + $0x20] sm:$0xff]  ;;  %v4228_v49 = vpack.c.bf16 %v2609_v26, %v2601_v36  ;;  %v4180_v36 = vpack.c.bf16 %v2671_v58, %v2663_v39  ;;  %v2726_v39 = vld [vmem:[#allocation4 + $0x520] sm:$0xff] }
 0x4dd   :  { %3249 = vst [vmem:[%s5048_s5 + $0x38] sm:$0xff] %v2425_v51  ;;  %v2443_v0 = vrot.slane %v2425_v51, %v4700_v44  ;;  %v2459_v56 = vrot.slane %v2425_v51, %v4702_v45  ;;  %v2475_v59 = vrot.slane %v2425_v51, %v4704_v46  ;;  %v2491_v7 = vrot.slane %v2425_v51, %v4708_v50  ;;  %v2734_v58 = vld [vmem:[#allocation4 + $0x560] sm:$0xff] }
 0x4de   :  { %v2507_v8 = vrot.slane %v2425_v51, %v4712_v52  ;;  %v2542_v9 = vadd.f32 %v2540_v6, %v2526_v17  ;;  %v2523_v40 = vrot.slane %v2425_v51, %v4716_v57  ;;  %v2555_v28 = vrot.slane %v2425_v51, %v4728_v15  ;;  %v2615_v17 = vld [vmem:[#allocation4 + $0x1a8] sm:$0xff]  ;;  %v2622_v6 = vld [vmem:[#allocation4 + $0x1e0] sm:$0xff] }
 0x4df   :  { %v2445_v62 = vmul.f32 %v2443_v0, %v4968_v32  ;;  %v2461_v63 = vmul.f32 %v2459_v56, %v4974_v43  ;;  %v2477_v33 = vmul.f32 %v2475_v59, %v2466_v18  ;;  %v2493_v12 = vmul.f32 %v2491_v7, %v4978_v54  ;;  %v2566_v18 = vld [vmem:[#allocation4 + $0x20] sm:$0xff]  ;;  %v2576_v54 = vld [vmem:[#allocation4 + $0x70] sm:$0xff]  ;;  %v2623_v0 = vld [vmem:[#allocation4 + $0x1e8] sm:$0xff] }
 0x4e0   :  { %v5013_v2 = vadd.f32 %v2556_v29, %v2542_v9  ;;  %v2509_v60 = vmul.f32 %v2507_v8, %v4983_v61  ;;  %v2539_v32 = vrot.slane %v2425_v51, %v4724_v5  ;;  %v2525_v20 = vmul.f32 %v2523_v40, %v2514_v53  ;;  %v2593_v29 = vld [vmem:[#allocation4 + $0xf8] sm:$0xff]  ;;  %v2584_v53 = vld [vmem:[#allocation4 + $0xb0] sm:$0xff]  ;;  %v2614_v7 = vld [vmem:[#allocation4 + $0x1a0] sm:$0xff] }
 0x4e1   :  { %v2463_v1 = vadd.f32 %v2461_v63, %v2445_v62  ;;  %v2557_v4 = vmul.f32 %v2555_v28, %v2546_v16  ;;  %v4158_v25 = vpack.c.bf16 %v2574_v27, %v2566_v18  ;;  %v4222_v37 = vpack.c.bf16 %v2576_v54, %v2568_v48  ;;  %v2607_v16 = vld [vmem:[#allocation4 + $0x168] sm:$0xff]  ;;  %v2600_v51 = vld [vmem:[#allocation4 + $0x130] sm:$0xff]  ;;  %v2617_v56 = vld [vmem:[#allocation4 + $0x1b8] sm:$0xff] }
 0x4e2   :  { %v2541_v22 = vmul.f32 %v2539_v32, %v2530_v14  ;;  %v2592_v14 = vld [vmem:[#allocation4 + $0xf0] sm:$0xff]  ;;  %v4224_v11 = vpack.c.bf16 %v2593_v29, %v2585_v47  ;;  %v4164_v34 = vpack.c.bf16 %v2607_v16, %v2599_v38  ;;  %v2625_v59 = vld [vmem:[#allocation4 + $0x1f8] sm:$0xff]  ;;  %v4166_v62 = vpack.c.bf16 %v2606_v10, %v2598_v41  ;;  %v2630_v28 = vld [vmem:[#allocation4 + $0x220] sm:$0xff] }
 0x4e3   :  { %v2479_v13 = vadd.f32 %v2477_v33, %v2463_v1  ;;  %v4226_v30 = vpack.c.bf16 %v2592_v14, %v2584_v53  ;;  %v4230_v63 = vpack.c.bf16 %v2608_v21, %v2600_v51  ;;  %v4168_v1 = vpack.c.bf16 %v2623_v0, %v2615_v17  ;;  %v2616_v33 = vld [vmem:[#allocation4 + $0x1b0] sm:$0xff]  ;;  %v2633_v40 = vld [vmem:[#allocation4 + $0x238] sm:$0xff]  ;;  %v2647_v27 = vld [vmem:[#allocation4 + $0x2a8] sm:$0xff] }
 0x4e4   :  { %v4232_v8 = vpack.c.bf16 %v2625_v59, %v2617_v56  ;;  %v2624_v9 = vld [vmem:[#allocation4 + $0x1f0] sm:$0xff]  ;;  %v4170_v32 = vpack.c.bf16 %v2622_v6, %v2614_v7  ;;  %v2655_v48 = vld [vmem:[#allocation4 + $0x2e8] sm:$0xff]  ;;  %v2649_v54 = vld [vmem:[#allocation4 + $0x2b8] sm:$0xff] }
 0x4e5   :  { %v2495_v43 = vadd.f32 %v2493_v12, %v2479_v13  ;;  %v2631_v12 = vld [vmem:[#allocation4 + $0x228] sm:$0xff]  ;;  %v2640_v18 = vld [vmem:[#allocation4 + $0x270] sm:$0xff]  ;;  %v2654_v47 = vld [vmem:[#allocation4 + $0x2e0] sm:$0xff]  ;;  %v4176_v29 = vpack.c.bf16 %v2655_v48, %v2647_v27 }
 0x4e6   :  { %v2639_v13 = vld [vmem:[#allocation4 + $0x268] sm:$0xff]  ;;  %v2665_v53 = vld [vmem:[#allocation4 + $0x338] sm:$0xff]  ;;  %v4178_v38 = vpack.c.bf16 %v2654_v47, %v2646_v31  ;;  %v2670_v16 = vld [vmem:[#allocation4 + $0x360] sm:$0xff] }
 0x4e7   :  { %v2511_v19 = vadd.f32 %v2509_v60, %v2495_v43  ;;  %v2641_v60 = vld [vmem:[#allocation4 + $0x278] sm:$0xff]  ;;  %v4234_v43 = vpack.c.bf16 %v2624_v9, %v2616_v33  ;;  %v2679_v41 = vld [vmem:[#allocation4 + $0x3a8] sm:$0xff]  ;;  %v2678_v17 = vld [vmem:[#allocation4 + $0x3a0] sm:$0xff] }
 0x4e8   :  { %v2673_v14 = vld [vmem:[#allocation4 + $0x378] sm:$0xff]  ;;  %v2687_v10 = vld [vmem:[#allocation4 + $0x3e8] sm:$0xff]  ;;  %v2686_v0 = vld [vmem:[#allocation4 + $0x3e0] sm:$0xff] }
 0x4e9   :  { %v2527_v24 = vadd.f32 %v2525_v20, %v2511_v19  ;;  %v2638_v19 = vld [vmem:[#allocation4 + $0x260] sm:$0xff]  ;;  %v4172_v20 = vpack.c.bf16 %v2639_v13, %v2631_v12  ;;  %v4244_v26 = vpack.c.bf16 %v2673_v14, %v2665_v53  ;;  %v4184_v56 = vpack.c.bf16 %v2687_v10, %v2679_v41  ;;  %v2695_v7 = vld [vmem:[#allocation4 + $0x428] sm:$0xff] }
 0x4ea   :  { %v2703_v6 = vld [vmem:[#allocation4 + $0x468] sm:$0xff]  ;;  %v4186_v33 = vpack.c.bf16 %v2686_v0, %v2678_v17  ;;  %v2694_v12 = vld [vmem:[#allocation4 + $0x420] sm:$0xff] }
 0x4eb   :  { %v2543_v3 = vadd.f32 %v2541_v22, %v2527_v24  ;;  %v4236_v22 = vpack.c.bf16 %v2641_v60, %v2633_v40  ;;  %v2632_v24 = vld [vmem:[#allocation4 + $0x230] sm:$0xff]  ;;  %v2702_v13 = vld [vmem:[#allocation4 + $0x460] sm:$0xff]  ;;  %v4188_v40 = vpack.c.bf16 %v2703_v6, %v2695_v7  ;;  %v2727_v31 = vld [vmem:[#allocation4 + $0x528] sm:$0xff] }
 0x4ec   :  { %v4238_v23 = vpack.c.bf16 %v2640_v18, %v2632_v24  ;;  %v4190_v24 = vpack.c.bf16 %v2702_v13, %v2694_v12  ;;  %v2710_v27 = vld [vmem:[#allocation4 + $0x4a0] sm:$0xff]  ;;  %v2735_v47 = vld [vmem:[#allocation4 + $0x568] sm:$0xff] }
 0x4ed   :  { %v2559_v61 = vadd.f32 %v2557_v4, %v2543_v3  ;;  %v2657_v4 = vld [vmem:[#allocation4 + $0x2f8] sm:$0xff]  ;;  %v4174_v3 = vpack.c.bf16 %v2638_v19, %v2630_v28  ;;  %v2711_v28 = vld [vmem:[#allocation4 + $0x4a8] sm:$0xff]  ;;  %v2718_v48 = vld [vmem:[#allocation4 + $0x4e0] sm:$0xff]  ;;  %v4196_v53 = vpack.c.bf16 %v2735_v47, %v2727_v31 }
 0x4ee   :  { %v2719_v19 = vld [vmem:[#allocation4 + $0x4e8] sm:$0xff]  ;;  %v2742_v41 = vld [vmem:[#allocation4 + $0x5a0] sm:$0xff] }
 0x4ef   :  { %2924 = vmatprep.mubr.f32.mxu0 %v2559_v61  ;;  %2995 = vmatprep.mubr.f32.mxu1 %v2559_v61  ;;  %v2750_v10 = vld [vmem:[#allocation4 + $0x5e0] sm:$0xff]  ;;  %v2759_v17 = vld [vmem:[#allocation4 + $0x628] sm:$0xff] }
 0x4f0   :  { %2925 = vmatmul.mubr.f32.vlgmr.msra.gmra.mrb[12].mxu0 %v5018_v35  ;;  %2996 = vmatmul.mubr.f32.vlgmr.msra.gmra.mrb[12].mxu1 %v5018_v35  ;;  %v2767_v0 = vld [vmem:[#allocation4 + $0x668] sm:$0xff]  ;;  %v2758_v7 = vld [vmem:[#allocation4 + $0x620] sm:$0xff] }
 0x4f1   :  { %4159 = vmatpush1.bf16.msra.mxu0 %v4158_v25  ;;  %4223 = vmatpush1.bf16.msra.mxu1 %v4222_v37  ;;  %v2648_v25 = vld [vmem:[#allocation4 + $0x2b0] sm:$0xff]  ;;  %v2766_v6 = vld [vmem:[#allocation4 + $0x660] sm:$0xff]  ;;  %v2775_v12 = vld [vmem:[#allocation4 + $0x6a8] sm:$0xff] }
 0x4f2   :  { %3066 = vmatprep.mubr.f32.mxu0 %v2559_v61  ;;  %3137 = vmatprep.mubr.f32.mxu1 %v2559_v61  ;;  %v4240_v61 = vpack.c.bf16 %v2657_v4, %v2649_v54  ;;  %v2656_v37 = vld [vmem:[#allocation4 + $0x2f0] sm:$0xff]  ;;  %v4192_v54 = vpack.c.bf16 %v2719_v19, %v2711_v28  ;;  %v2783_v13 = vld [vmem:[#allocation4 + $0x6e8] sm:$0xff]  ;;  %v2774_v28 = vld [vmem:[#allocation4 + $0x6a0] sm:$0xff] }
 0x4f3   :  { %4161 = vmatprep.subr.bf16.mxu0 %v4160_v42  ;;  %4225 = vmatprep.subr.bf16.mxu1 %v4224_v11  ;;  %v4242_v42 = vpack.c.bf16 %v2656_v37, %v2648_v25  ;;  %v2662_v11 = vld [vmem:[#allocation4 + $0x320] sm:$0xff]  ;;  %v4194_v25 = vpack.c.bf16 %v2718_v48, %v2710_v27  ;;  %v2791_v27 = vld [vmem:[#allocation4 + $0x728] sm:$0xff] }
 0x4f4   :  { %v4182_v51 = vpack.c.bf16 %v2670_v16, %v2662_v11  ;;  %v2743_v11 = vld [vmem:[#allocation4 + $0x5a8] sm:$0xff]  ;;  %v2782_v19 = vld [vmem:[#allocation4 + $0x6e0] sm:$0xff] }
 0x4f5   :  { %4163 = vmatpush1.bf16.msra.mxu0 %v4162_v55  ;;  %4227 = vmatpush1.bf16.msra.mxu1 %v4226_v30  ;;  %v2664_v55 = vld [vmem:[#allocation4 + $0x330] sm:$0xff]  ;;  %v2751_v16 = vld [vmem:[#allocation4 + $0x5e8] sm:$0xff]  ;;  %v2790_v31 = vld [vmem:[#allocation4 + $0x720] sm:$0xff] }
 0x4f6   :  { %4165 = vmatprep.subr.bf16.mxu0 %v4164_v34  ;;  %4229 = vmatprep.subr.bf16.mxu1 %v4228_v49  ;;  %v2672_v30 = vld [vmem:[#allocation4 + $0x370] sm:$0xff]  ;;  %v2681_v34 = vld [vmem:[#allocation4 + $0x3b8] sm:$0xff]  ;;  %v2799_v48 = vld [vmem:[#allocation4 + $0x768] sm:$0xff] }
 0x4f7   :  { %v2689_v49 = vld [vmem:[#allocation4 + $0x3f8] sm:$0xff]  ;;  %v4246_v21 = vpack.c.bf16 %v2672_v30, %v2664_v55  ;;  %v4198_v55 = vpack.c.bf16 %v2734_v58, %v2726_v39  ;;  %v2798_v47 = vld [vmem:[#allocation4 + $0x760] sm:$0xff]  ;;  %v2807_v39 = vld [vmem:[#allocation4 + $0x7a8] sm:$0xff] }
 0x4f8   :  { %v4248_v59 = vpack.c.bf16 %v2689_v49, %v2681_v34  ;;  %v4200_v34 = vpack.c.bf16 %v2751_v16, %v2743_v11  ;;  %v2815_v58 = vld [vmem:[#allocation4 + $0x7e8] sm:$0xff]  ;;  %v2806_v11 = vld [vmem:[#allocation4 + $0x7a0] sm:$0xff] }
 0x4f9   :  { %4167 = vmatpush1.bf16.msra.mxu0 %v4166_v62  ;;  %4231 = vmatpush1.bf16.msra.mxu1 %v4230_v63  ;;  %v2680_v62 = vld [vmem:[#allocation4 + $0x3b0] sm:$0xff]  ;;  %v4216_v16 = vpack.c.bf16 %v2815_v58, %v2807_v39 }
 0x4fa   :  { %4169 = vmatprep.subr.bf16.mxu0 %v4168_v1  ;;  %4233 = vmatprep.subr.bf16.mxu1 %v4232_v8  ;;  %v2688_v63 = vld [vmem:[#allocation4 + $0x3f0] sm:$0xff]  ;;  %v2697_v1 = vld [vmem:[#allocation4 + $0x438] sm:$0xff] }
 0x4fb   :  { %v2705_v8 = vld [vmem:[#allocation4 + $0x478] sm:$0xff]  ;;  %v4250_v9 = vpack.c.bf16 %v2688_v63, %v2680_v62  ;;  %v4202_v62 = vpack.c.bf16 %v2750_v10, %v2742_v41 }
 0x4fc   :  { %v4252_v60 = vpack.c.bf16 %v2705_v8, %v2697_v1  ;;  %v4204_v1 = vpack.c.bf16 %v2767_v0, %v2759_v17 }
 0x4fd   :  { %4171 = vmatpush1.bf16.msra.mxu0 %v4170_v32  ;;  %4235 = vmatpush1.bf16.msra.mxu1 %v4234_v43  ;;  %v2696_v32 = vld [vmem:[#allocation4 + $0x430] sm:$0xff] }
 0x4fe   :  { %4173 = vmatprep.subr.bf16.mxu0 %v4172_v20  ;;  %4237 = vmatprep.subr.bf16.mxu1 %v4236_v22  ;;  %v2704_v43 = vld [vmem:[#allocation4 + $0x470] sm:$0xff]  ;;  %v2713_v20 = vld [vmem:[#allocation4 + $0x4b8] sm:$0xff] }
 0x4ff   :  { %v2721_v22 = vld [vmem:[#allocation4 + $0x4f8] sm:$0xff]  ;;  %v4254_v18 = vpack.c.bf16 %v2704_v43, %v2696_v32  ;;  %v4206_v32 = vpack.c.bf16 %v2766_v6, %v2758_v7 }
 0x500   :  { %v4256_v4 = vpack.c.bf16 %v2721_v22, %v2713_v20  ;;  %v4208_v20 = vpack.c.bf16 %v2783_v13, %v2775_v12 }
 0x501   :  { %4175 = vmatpush1.bf16.msra.mxu0 %v4174_v3  ;;  %4239 = vmatpush1.bf16.msra.mxu1 %v4238_v23  ;;  %v2712_v3 = vld [vmem:[#allocation4 + $0x4b0] sm:$0xff] }
 0x502   :  { %4177 = vmatprep.subr.bf16.mxu0 %v4176_v29  ;;  %4241 = vmatprep.subr.bf16.mxu1 %v4240_v61  ;;  %v2720_v23 = vld [vmem:[#allocation4 + $0x4f0] sm:$0xff]  ;;  %v2729_v29 = vld [vmem:[#allocation4 + $0x538] sm:$0xff] }
 0x503   :  { %v2737_v61 = vld [vmem:[#allocation4 + $0x578] sm:$0xff]  ;;  %v4258_v37 = vpack.c.bf16 %v2720_v23, %v2712_v3  ;;  %v4210_v3 = vpack.c.bf16 %v2782_v19, %v2774_v28 }
 0x504   :  { %v4260_v14 = vpack.c.bf16 %v2737_v61, %v2729_v29  ;;  %v4212_v29 = vpack.c.bf16 %v2799_v48, %v2791_v27 }
 0x505   :  { %4179 = vmatpush1.bf16.msra.mxu0 %v4178_v38  ;;  %4243 = vmatpush1.bf16.msra.mxu1 %v4242_v42  ;;  %v2728_v38 = vld [vmem:[#allocation4 + $0x530] sm:$0xff] }
 0x506   :  { %4181 = vmatprep.subr.bf16.mxu0 %v4180_v36  ;;  %4245 = vmatprep.subr.bf16.mxu1 %v4244_v26  ;;  %v2736_v42 = vld [vmem:[#allocation4 + $0x570] sm:$0xff]  ;;  %v2745_v36 = vld [vmem:[#allocation4 + $0x5b8] sm:$0xff] }
 0x507   :  { %v2753_v26 = vld [vmem:[#allocation4 + $0x5f8] sm:$0xff]  ;;  %v4262_v30 = vpack.c.bf16 %v2736_v42, %v2728_v38  ;;  %v4214_v38 = vpack.c.bf16 %v2798_v47, %v2790_v31 }
 0x508   :  { %v4264_v49 = vpack.c.bf16 %v2753_v26, %v2745_v36  ;;  %v2814_v26 = vld [vmem:[#allocation4 + $0x7e0] sm:$0xff] }
 0x509   :  { %4183 = vmatpush1.bf16.msra.mxu0 %v4182_v51  ;;  %4247 = vmatpush1.bf16.msra.mxu1 %v4246_v21  ;;  %v2744_v51 = vld [vmem:[#allocation4 + $0x5b0] sm:$0xff]  ;;  %v4218_v41 = vpack.c.bf16 %v2814_v26, %v2806_v11  ;;  %v3195_v11 = vld [vmem:[#allocation7 + $0x40] sm:$0xff] }
 0x50a   :  { %4185 = vmatprep.subr.bf16.mxu0 %v4184_v56  ;;  %4249 = vmatprep.subr.bf16.mxu1 %v4248_v59  ;;  %v2752_v21 = vld [vmem:[#allocation4 + $0x5f0] sm:$0xff]  ;;  %v2761_v56 = vld [vmem:[#allocation4 + $0x638] sm:$0xff] }
 0x50b   :  { %v2769_v59 = vld [vmem:[#allocation4 + $0x678] sm:$0xff]  ;;  %v4266_v63 = vpack.c.bf16 %v2752_v21, %v2744_v51 }
 0x50c   :  { %v4268_v8 = vpack.c.bf16 %v2769_v59, %v2761_v56 }
 0x50d   :  { %4187 = vmatpush1.bf16.msra.mxu0 %v4186_v33  ;;  %4251 = vmatpush1.bf16.msra.mxu1 %v4250_v9  ;;  %v2760_v33 = vld [vmem:[#allocation4 + $0x630] sm:$0xff] }
 0x50e   :  { %4189 = vmatprep.subr.bf16.mxu0 %v4188_v40  ;;  %4253 = vmatprep.subr.bf16.mxu1 %v4252_v60  ;;  %v2768_v9 = vld [vmem:[#allocation4 + $0x670] sm:$0xff]  ;;  %v2777_v40 = vld [vmem:[#allocation4 + $0x6b8] sm:$0xff] }
 0x50f   :  { %v2785_v60 = vld [vmem:[#allocation4 + $0x6f8] sm:$0xff]  ;;  %v4270_v43 = vpack.c.bf16 %v2768_v9, %v2760_v33 }
 0x510   :  { %v4272_v22 = vpack.c.bf16 %v2785_v60, %v2777_v40 }
 0x511   :  { %4191 = vmatpush1.bf16.msra.mxu0 %v4190_v24  ;;  %4255 = vmatpush1.bf16.msra.mxu1 %v4254_v18  ;;  %v2776_v24 = vld [vmem:[#allocation4 + $0x6b0] sm:$0xff] }
 0x512   :  { %4193 = vmatprep.subr.bf16.mxu0 %v4192_v54  ;;  %4257 = vmatprep.subr.bf16.mxu1 %v4256_v4  ;;  %v2784_v18 = vld [vmem:[#allocation4 + $0x6f0] sm:$0xff]  ;;  %v2793_v54 = vld [vmem:[#allocation4 + $0x738] sm:$0xff] }
 0x513   :  { %v2801_v4 = vld [vmem:[#allocation4 + $0x778] sm:$0xff]  ;;  %v4274_v23 = vpack.c.bf16 %v2784_v18, %v2776_v24 }
 0x514   :  { %v4276_v61 = vpack.c.bf16 %v2801_v4, %v2793_v54 }
 0x515   :  { %4195 = vmatpush1.bf16.msra.mxu0 %v4194_v25  ;;  %4259 = vmatpush1.bf16.msra.mxu1 %v4258_v37  ;;  %v2792_v25 = vld [vmem:[#allocation4 + $0x730] sm:$0xff] }
 0x516   :  { %4197 = vmatprep.subr.bf16.mxu0 %v4196_v53  ;;  %4261 = vmatprep.subr.bf16.mxu1 %v4260_v14  ;;  %v2800_v37 = vld [vmem:[#allocation4 + $0x770] sm:$0xff]  ;;  %v2809_v53 = vld [vmem:[#allocation4 + $0x7b8] sm:$0xff] }
 0x517   :  { %v2817_v14 = vld [vmem:[#allocation4 + $0x7f8] sm:$0xff]  ;;  %v4278_v42 = vpack.c.bf16 %v2800_v37, %v2792_v25 }
 0x518   :  { %v4280_v36 = vpack.c.bf16 %v2817_v14, %v2809_v53  ;;  %v3196_v14 = vld [vmem:[#allocation7 + $0x48] sm:$0xff] }
 0x519   :  { %4199 = vmatpush1.bf16.msra.mxu0 %v4198_v55  ;;  %4263 = vmatpush1.bf16.msra.mxu1 %v4262_v30  ;;  %v2808_v55 = vld [vmem:[#allocation4 + $0x7b0] sm:$0xff] }
 0x51a   :  { %4201 = vmatprep.subr.bf16.mxu0 %v4200_v34  ;;  %4265 = vmatprep.subr.bf16.mxu1 %v4264_v49  ;;  %v2816_v30 = vld [vmem:[#allocation4 + $0x7f0] sm:$0xff]  ;;  %v2818_v34 = vld [vmem:[%s5045_s2] sm:$0xff] }
 0x51b   :  { %v4282_v10 = vpack.c.bf16 %v2816_v30, %v2808_v55  ;;  %v2823_v49 = vrot.slane %v2818_v34, %v4700_v44  ;;  %v2835_v33 = vrot.slane %v2818_v34, %v4708_v50  ;;  %v2847_v13 = vrot.slane %v2818_v34, %v4724_v5 }
 0x51c   :  { %v2843_v40 = vrot.slane %v2818_v34, %v4716_v57  ;;  %v2827_v50 = vrot.slane %v2818_v34, %v4702_v45  ;;  %v2839_v27 = vrot.slane %v2818_v34, %v4712_v52 }
 0x51d   :  { %4203 = vmatpush1.bf16.msra.mxu0 %v4202_v62  ;;  %4267 = vmatpush1.bf16.msra.mxu1 %v4266_v63  ;;  %v2831_v62 = vrot.slane %v2818_v34, %v4704_v46  ;;  %v2851_v46 = vrot.slane %v2818_v34, %v4728_v15 }
 0x51e   :  { %4205 = vmatprep.subr.bf16.mxu0 %v4204_v1  ;;  %4269 = vmatprep.subr.bf16.mxu1 %v4268_v8 }
 0x521   :  { %4207 = vmatpush1.bf16.msra.mxu0 %v4206_v32  ;;  %4271 = vmatpush1.bf16.msra.mxu1 %v4270_v43 }
 0x522   :  { %4209 = vmatprep.subr.bf16.mxu0 %v4208_v20  ;;  %4273 = vmatprep.subr.bf16.mxu1 %v4272_v22 }
 0x525   :  { %4211 = vmatpush1.bf16.msra.mxu0 %v4210_v3  ;;  %4275 = vmatpush1.bf16.msra.mxu1 %v4274_v23 }
 0x526   :  { %4213 = vmatprep.subr.bf16.mxu0 %v4212_v29  ;;  %4277 = vmatprep.subr.bf16.mxu1 %v4276_v61 }
 0x529   :  { %4215 = vmatpush1.bf16.msra.mxu0 %v4214_v38  ;;  %4279 = vmatpush1.bf16.msra.mxu1 %v4278_v42 }
 0x52a   :  { %4217 = vmatprep.subr.bf16.mxu0 %v4216_v16  ;;  %4281 = vmatprep.subr.bf16.mxu1 %v4280_v36 }
 0x52d   :  { %4219 = vmatpush1.bf16.msra.mxu0 %v4218_v41  ;;  %4283 = vmatpush1.bf16.msra.mxu1 %v4282_v10 }
 0x530   :  { %3067 = vmatmul.mubr.f32.vlgmr.msra.gmra.mrb[14].mxu0 %v5018_v35  ;;  %3138 = vmatmul.mubr.f32.vlgmr.msra.gmra.mrb[14].mxu1 %v5018_v35 }
 0x5c3   :  { %v2926_v51 = vpop.f32.mrb[12].mxu0  ;;  %v2997_v21 = vpop.f32.mrb[12].mxu1 }
 0x5c4   :  { %v2927_v17 = vadd.f32 %v2926_v51, %v2823_v49  ;;  %v2999_v0 = vpop.f32.mrb[13].mxu1  ;;  %v2928_v56 = vpop.f32.mrb[13].mxu0  ;;  %v2998_v63 = vadd.f32 %v2997_v21, %v2831_v62 }
 0x5c5   :  { %v3000_v44 = vadd.f32 %v2999_v0, %v2835_v33  ;;  %v2929_v57 = vadd.f32 %v2928_v56, %v2827_v50 }
 0x5c6   :  { %v3252_v59 = vmul.f32 -1.442695, %v2927_v17 }
 0x5c7   :  { %v3255_v9 = vmul.f32 -1.442695, %v3000_v44  ;;  %v3253_v48 = vmul.f32 -1.442695, %v2929_v57 }
 0x5c8   :  { %4432 = vpow2.f32 %v3252_v59 }
 0x5c9   :  { %4434 = vtanh.f32 %v2998_v63 }
 0x5d2   :  { %v4433_v7 = vpop.eup %4432 }
 0x5d3   :  { %v3147_v6 = vadd.f32 1.0, %v4433_v7  ;;  %v4435_v35 = vpop.eup %4434 }
 0x5d5   :  { %4436 = vrcp.f32 %v3147_v6 }
 0x5d6   :  { %4438 = vpow2.f32 %v3255_v9 }
 0x5df   :  { %v4437_v1 = vpop.eup %4436 }
 0x5e0   :  { %v3163_v8 = vmul.f32 %v4437_v1, %v4435_v35  ;;  %v4439_v12 = vpop.eup %4438 }
 0x5e1   :  { %v3171_v60 = vadd.f32 1.0, %v4439_v12 }
 0x5e3   :  { %4440 = vrcp.f32 %v3171_v60 }
 0x5ed   :  { %v4441_v4 = vpop.eup %4440 }
 0x603   :  { %v3068_v32 = vpop.f32.mrb[14].mxu0  ;;  %v3139_v43 = vpop.f32.mrb[14].mxu1 }
 0x604   :  { %v3140_v28 = vadd.f32 %v3139_v43, %v2847_v13  ;;  %v3070_v19 = vpop.f32.mrb[15].mxu0  ;;  %v3141_v20 = vpop.f32.mrb[15].mxu1  ;;  %v3069_v15 = vadd.f32 %v3068_v32, %v2839_v27 }
 0x605   :  { %v3071_v22 = vadd.f32 %v3070_v19, %v2843_v40  ;;  %v3142_v24 = vadd.f32 %v3141_v20, %v2851_v46 }
 0x606   :  { %v3254_v18 = vmul.f32 -1.442695, %v3140_v28  ;;  %v3256_v54 = vmul.f32 -1.442695, %v3069_v15 }
 0x607   :  { %4442 = vtanh.f32 %v3071_v22  ;;  %v3257_v5 = vmul.f32 -1.442695, %v3142_v24 }
 0x608   :  { %4444 = vpow2.f32 %v3254_v18 }
 0x609   :  { %4446 = vpow2.f32 %v3257_v5 }
 0x60a   :  { %4448 = vpow2.f32 %v3253_v48 }
 0x60b   :  { %4450 = vpow2.f32 %v3256_v54 }
 0x611   :  { %v4443_v3 = vpop.eup %4442 }
 0x612   :  { %v3187_v23 = vmul.f32 %v4443_v3, %v4441_v4  ;;  %v4445_v31 = vpop.eup %4444 }
 0x613   :  { %v4447_v47 = vpop.eup %4446  ;;  %v3160_v29 = vadd.f32 1.0, %v4445_v31 }
 0x614   :  { %v3184_v45 = vadd.f32 1.0, %v4447_v47  ;;  %v4449_v52 = vpop.eup %4448 }
 0x615   :  { %4452 = vrcp.f32 %v3160_v29  ;;  %v4451_v61 = vpop.eup %4450  ;;  %v3153_v25 = vadd.f32 1.0, %v4449_v52 }
 0x616   :  { %4454 = vrcp.f32 %v3184_v45  ;;  %v3177_v39 = vadd.f32 1.0, %v4451_v61 }
 0x617   :  { %4456 = vrcp.f32 %v3153_v25 }
 0x618   :  { %4458 = vrcp.f32 %v3177_v39 }
 0x61f   :  { %v4453_v37 = vpop.eup %4452 }
 0x620   :  { %v4455_v58 = vpop.eup %4454  ;;  %v3164_v53 = vmul.f32 %v4453_v37, %v5013_v2 }
 0x621   :  { %v3188_v38 = vmul.f32 %v4455_v58, %v5013_v2  ;;  %v4457_v30 = vpop.eup %4456 }
 0x622   :  { %v3165_v42 = vadd.f32 %v3164_v53, %v3163_v8  ;;  %v4459_v41 = vpop.eup %4458 }
 0x623   :  { %v3189_v16 = vadd.f32 %v3188_v38, %v3187_v23 }
 0x624   :  { %4460 = vtanh.f32 %v3165_v42  ;;  %v3198_v36 = vmul.f32 %v3196_v14, %v3165_v42 }
 0x625   :  { %4462 = vtanh.f32 %v3189_v16  ;;  %v3197_v26 = vmul.f32 %v3195_v11, %v3189_v16 }
 0x627   :  { %v3199_v55 = vadd.f32 %v3198_v36, %v3197_v26 }
 0x629   :  { %3258 = vst [vmem:[%s5048_s5 + $0x40] sm:$0xff] %v3199_v55 }
 0x62e   :  { %v4461_v10 = vpop.eup %4460 }
 0x62f   :  { %v4463_v34 = vpop.eup %4462  ;;  %v3167_v49 = vmul.f32 %v4461_v10, %v4457_v30 }
 0x630   :  { %v3191_v2 = vmul.f32 %v4463_v34, %v4459_v41 }
 0x631   :  { %v3204_v51 = vmul.f32 %v3196_v14, %v3167_v49 }
 0x632   :  { %v3203_v21 = vmul.f32 %v3195_v11, %v3191_v2 }
 0x634   :  { %v3205_v17 = vadd.f32 %v3204_v51, %v3203_v21 }
 0x636   :  { %3259 = vst [vmem:[%s5048_s5 + $0x48] sm:$0xff] %v3205_v17 }
 0x637   :  { %3211 = vsyncpa [#allocation3], 1 }
 0x638   :  { %3212 = vsyncpa [#allocation5], 1 }
 0x639   :  { %3213 = vsyncpa [#allocation8], 1 }

</bundles_post_ra>
